<compile_context>
chip_gen: v5e
topology: v5e:2x2
jax: 0.10.0
libtpu: 0.0.40
codegen_flags: <defaults>
</compile_context>

<pallas_src>
import functools

import numpy as np
import jax
import jax.numpy as jnp
from jax import lax
from jax.experimental import pallas as pl
from jax.experimental.pallas import tpu as pltpu


def _vecint_kernel(vec_ref, out_ref, *, W, nsteps, scale, tk, matmul_dtype):
    _, P = vec_ref.shape                     # (8, H*W)
    inv_w = 1.0 / W
    num_slabs = P // tk

    # ---- loop-invariant index vectors (no (P, P) residents) ----------------
    # Flat -> 2D decode via floor((q + 0.5) * (1/W)).  The +0.5 keeps the true
    # value at least 0.5/W away from any integer, so a ~1-ulp f32 rounding of
    # the product cannot cross a row boundary for P < ~4e6 — far beyond what
    # the dense P x P interpolation matrix permits anyway.
    p_lane = lax.broadcasted_iota(jnp.int32, (1, P), 1).astype(jnp.float32)
    base_i = jnp.floor((p_lane + 0.5) * inv_w)        # target row, (1, P)
    base_j = p_lane - base_i * W                      # target col, (1, P)

    q_sub = lax.broadcasted_iota(jnp.int32, (tk, 1), 0).astype(jnp.float32)
    rq_slabs, cq_slabs = [], []
    for k in range(num_slabs):
        qs = q_sub + float(k * tk)                    # flat source index, (tk, 1)
        rq = jnp.floor((qs + 0.5) * inv_w)            # source row
        rq_slabs.append(rq)
        cq_slabs.append(qs - rq * W)                  # source col

    v0 = vec_ref[...] * scale                         # (8, P): vec * 1/2**nsteps

    def step(_, v):
        # Sampling positions in pixel coordinates (grid + flow); the
        # normalize/unnormalize pair in SpatialTransformer + grid_sample
        # (align_corners=True) cancels exactly.  Channel 0 displaces rows,
        # channel 1 displaces cols (matches the torch module after its
        # channel flip for grid_sample's (x, y) convention).
        pos_i = base_i + v[0:1, :]                    # (1, P)
        pos_j = base_j + v[1:2, :]                    # (1, P)
        warped = None
        for k in range(num_slabs):
            off = k * tk
            # Bilinear "triangle" weights; out-of-range corners contribute 0,
            # matching padding_mode='zeros'.
            w_r = jnp.maximum(0.0, 1.0 - jnp.abs(pos_i - rq_slabs[k]))   # (tk, P)
            w_c = jnp.maximum(0.0, 1.0 - jnp.abs(pos_j - cq_slabs[k]))   # (tk, P)
            m_t = (w_r * w_c).astype(matmul_dtype)
            part = jnp.dot(v[:, off:off + tk].astype(matmul_dtype), m_t,
                           preferred_element_type=jnp.float32)           # (8, P)
            warped = part if warped is None else warped + part
        return v + warped                             # vec + warp(vec, vec)

    # Unrolled so the VPU work building M_T overlaps the previous step's MXU.
    out_ref[...] = lax.fori_loop(0, nsteps, step, v0, unroll=True)


def _pick_tk(P, tk_max):
    """Largest divisor of P that is <= tk_max (slab size for the q reduction)."""
    if P <= tk_max:
        return P
    for tk in range(tk_max, 0, -1):
        if P % tk == 0:
            return tk
    return P


def vecint(vec_nchw, nsteps, *, tk_max=512, matmul_dtype=jnp.float32):
    """vec_nchw: (B, 2, H, W) float32 (PyTorch NCHW). Returns same shape.

    matmul_dtype=jnp.bfloat16 trades ~1e-3-level accuracy for fewer MXU passes;
    default keeps full f32 so the 1e-4 reference tolerance holds.
    """
    B, C, H, W = vec_nchw.shape
    assert C == 2, "2-D vector field expected"
    P = H * W
    CP = 8                                    # pad 2 flow channels to one sublane group
    scale = 1.0 / (2 ** nsteps)
    tk = _pick_tk(P, tk_max)

    # NCHW -> (B, C, H*W): channels stay leading, so no transpose is needed;
    # pad channels 2 -> 8 (the zero rows stay zero through the integration).
    v = vec_nchw.astype(jnp.float32).reshape(B, C, P)
    v = jnp.pad(v, ((0, 0), (0, CP - C), (0, 0)))

    # Rough per-step VMEM footprint; raise the scoped limit only when needed
    # (large P on v5e's 16 MiB / v7x's 32 MiB scoped defaults).
    est_bytes = 3 * tk * P * 4 + 8 * CP * P * 4
    vmem_limit = None
    if est_bytes > 12 * (1 << 20):
        vmem_limit = min(100 * (1 << 20), 2 * est_bytes)

    kernel = functools.partial(_vecint_kernel, W=W, nsteps=nsteps, scale=scale,
                               tk=tk, matmul_dtype=matmul_dtype)
    out = pl.pallas_call(
        kernel,
        out_shape=jax.ShapeDtypeStruct((B, CP, P), jnp.float32),
        grid_spec=pltpu.PrefetchScalarGridSpec(
            num_scalar_prefetch=0,
            grid=(B,),
            in_specs=[pl.BlockSpec((pl.Squeezed(), CP, P), lambda b: (b, 0, 0))],
            out_specs=pl.BlockSpec((pl.Squeezed(), CP, P), lambda b: (b, 0, 0)),
        ),
        compiler_params=pltpu.CompilerParams(
            dimension_semantics=("parallel",),
            vmem_limit_bytes=vmem_limit,
        ),
    )(v)

    return out[:, :C, :].reshape(B, C, H, W)


def _vecint_reference(vec, nsteps):
    """Pure numpy reference: literal translation of VecInt/SpatialTransformer."""
    B, C, H, W = vec.shape
    v = vec.astype(np.float32) * (1.0 / 2 ** nsteps)
    rows = np.arange(H, dtype=np.float32)[:, None]
    cols = np.arange(W, dtype=np.float32)[None, :]
    for _ in range(nsteps):
        pos_i = rows + v[:, 0]          # (B, H, W)
        pos_j = cols + v[:, 1]          # (B, H, W)
        i0 = np.floor(pos_i)
        j0 = np.floor(pos_j)
        wi1 = pos_i - i0
        wj1 = pos_j - j0
        warped = np.zeros_like(v)
        for di, wi in ((0, 1.0 - wi1), (1, wi1)):
            for dj, wj in ((0, 1.0 - wj1), (1, wj1)):
                ii = (i0 + di).astype(np.int64)
                jj = (j0 + dj).astype(np.int64)
                valid = (ii >= 0) & (ii < H) & (jj >= 0) & (jj < W)
                iic = np.clip(ii, 0, H - 1)
                jjc = np.clip(jj, 0, W - 1)
                for b in range(B):
                    for c in range(C):
                        vals = v[b, c][iic[b], jjc[b]]
                        warped[b, c] += np.where(valid[b], wi[b] * wj[b] * vals, 0.0)
        v = v + warped
    return v


if __name__ == "__main__":
    B, C, H, W = 2, 2, 16, 16
    nsteps = 4

    key = jax.random.PRNGKey(0)
    vec = 2.0 * jax.random.normal(key, (B, C, H, W), dtype=jnp.float32)

    out = jax.block_until_ready(vecint(vec, nsteps))

    ref = _vecint_reference(np.asarray(vec), nsteps)
    np.testing.assert_allclose(np.asarray(out), ref, atol=1e-4, rtol=1e-4)

    print("KERNEL_OK")
</pallas_src>

<mosaic_0001>
module attributes {stable_mosaic.version = 11 : i64} {
  func.func @_vecint_kernel(%arg0: i32, %arg1: memref<1x8x256xf32, #tpu.memory_space<vmem>>, %arg2: memref<1x8x256xf32, #tpu.memory_space<vmem>>) attributes {dimension_semantics = [#tpu.dimension_semantics<parallel>], iteration_bounds = array<i64: 2>, scalar_prefetch = 0 : i64, scratch_operands = 0 : i64, tpu.core_type = #tpu.core_type<tc>, window_params = [{transform_indices = @transform_0, window_bounds = array<i64: 1, 8, 256>}, {transform_indices = @transform_1, window_bounds = array<i64: 1, 8, 256>}]} {
    %0 = tpu.iota {dimensions = array<i32: 1>} : vector<1x256xi32>
    %1 = arith.sitofp %0 : vector<1x256xi32> to vector<1x256xf32>
    %cst = arith.constant 5.000000e-01 : f32
    %2 = vector.broadcast %cst : f32 to vector<1x256xf32>
    %3 = arith.addf %1, %2 : vector<1x256xf32>
    %cst_0 = arith.constant 6.250000e-02 : f32
    %4 = vector.broadcast %cst_0 : f32 to vector<1x256xf32>
    %5 = arith.mulf %3, %4 : vector<1x256xf32>
    %6 = math.floor %5 : vector<1x256xf32>
    %cst_1 = arith.constant 1.600000e+01 : f32
    %7 = vector.broadcast %cst_1 : f32 to vector<1x256xf32>
    %8 = arith.mulf %6, %7 : vector<1x256xf32>
    %9 = arith.subf %1, %8 : vector<1x256xf32>
    %10 = tpu.iota {dimensions = array<i32: 0>} : vector<256x1xi32>
    %11 = arith.sitofp %10 : vector<256x1xi32> to vector<256x1xf32>
    %cst_2 = arith.constant 0.000000e+00 : f32
    %12 = vector.broadcast %cst_2 : f32 to vector<256x1xf32>
    %13 = arith.addf %11, %12 : vector<256x1xf32>
    %cst_3 = arith.constant 5.000000e-01 : f32
    %14 = vector.broadcast %cst_3 : f32 to vector<256x1xf32>
    %15 = arith.addf %13, %14 : vector<256x1xf32>
    %cst_4 = arith.constant 6.250000e-02 : f32
    %16 = vector.broadcast %cst_4 : f32 to vector<256x1xf32>
    %17 = arith.mulf %15, %16 : vector<256x1xf32>
    %18 = math.floor %17 : vector<256x1xf32>
    %cst_5 = arith.constant 1.600000e+01 : f32
    %19 = vector.broadcast %cst_5 : f32 to vector<256x1xf32>
    %20 = arith.mulf %18, %19 : vector<256x1xf32>
    %21 = arith.subf %13, %20 : vector<256x1xf32>
    %c0 = arith.constant 0 : index
    %c0_6 = arith.constant 0 : index
    %c0_7 = arith.constant 0 : index
    %22 = vector.load %arg1[%c0, %c0_6, %c0_7] : memref<1x8x256xf32, #tpu.memory_space<vmem>>, vector<1x8x256xf32>
    %23 = vector.shape_cast %22 : vector<1x8x256xf32> to vector<8x256xf32>
    %cst_8 = arith.constant 6.250000e-02 : f32
    %24 = vector.broadcast %cst_8 : f32 to vector<8x256xf32>
    %25 = arith.mulf %23, %24 : vector<8x256xf32>
    %c0_i32 = arith.constant 0 : i32
    %26 = vector.extract_strided_slice %25 {offsets = [0, 0], sizes = [1, 256], strides = [1, 1]} : vector<8x256xf32> to vector<1x256xf32>
    %27 = arith.addf %6, %26 : vector<1x256xf32>
    %28 = vector.extract_strided_slice %25 {offsets = [1, 0], sizes = [1, 256], strides = [1, 1]} : vector<8x256xf32> to vector<1x256xf32>
    %29 = arith.addf %9, %28 : vector<1x256xf32>
    %30 = vector.broadcast %27 : vector<1x256xf32> to vector<256x256xf32>
    %31 = vector.broadcast %18 : vector<256x1xf32> to vector<256x256xf32>
    %32 = arith.subf %30, %31 : vector<256x256xf32>
    %33 = math.absf %32 : vector<256x256xf32>
    %cst_9 = arith.constant 1.000000e+00 : f32
    %34 = vector.broadcast %cst_9 : f32 to vector<256x256xf32>
    %35 = arith.subf %34, %33 : vector<256x256xf32>
    %cst_10 = arith.constant 0.000000e+00 : f32
    %36 = vector.broadcast %cst_10 : f32 to vector<256x256xf32>
    %37 = arith.maximumf %36, %35 : vector<256x256xf32>
    %38 = vector.broadcast %29 : vector<1x256xf32> to vector<256x256xf32>
    %39 = vector.broadcast %21 : vector<256x1xf32> to vector<256x256xf32>
    %40 = arith.subf %38, %39 : vector<256x256xf32>
    %41 = math.absf %40 : vector<256x256xf32>
    %cst_11 = arith.constant 1.000000e+00 : f32
    %42 = vector.broadcast %cst_11 : f32 to vector<256x256xf32>
    %43 = arith.subf %42, %41 : vector<256x256xf32>
    %cst_12 = arith.constant 0.000000e+00 : f32
    %44 = vector.broadcast %cst_12 : f32 to vector<256x256xf32>
    %45 = arith.maximumf %44, %43 : vector<256x256xf32>
    %46 = arith.mulf %37, %45 : vector<256x256xf32>
    %cst_13 = arith.constant dense<0.000000e+00> : vector<8x256xf32>
    %47 = tpu.matmul %25, %46, %cst_13 {dimension_numbers = #tpu.dot_dimension_numbers<[1], [0], [0], [1], [0, 0, 1, 1], [], []>} : vector<8x256xf32>, vector<256x256xf32>, vector<8x256xf32> -> vector<8x256xf32>
    %48 = arith.addf %25, %47 : vector<8x256xf32>
    %c1_i32 = arith.constant 1 : i32
    %49 = vector.extract_strided_slice %48 {offsets = [0, 0], sizes = [1, 256], strides = [1, 1]} : vector<8x256xf32> to vector<1x256xf32>
    %50 = arith.addf %6, %49 : vector<1x256xf32>
    %51 = vector.extract_strided_slice %48 {offsets = [1, 0], sizes = [1, 256], strides = [1, 1]} : vector<8x256xf32> to vector<1x256xf32>
    %52 = arith.addf %9, %51 : vector<1x256xf32>
    %53 = vector.broadcast %50 : vector<1x256xf32> to vector<256x256xf32>
    %54 = vector.broadcast %18 : vector<256x1xf32> to vector<256x256xf32>
    %55 = arith.subf %53, %54 : vector<256x256xf32>
    %56 = math.absf %55 : vector<256x256xf32>
    %cst_14 = arith.constant 1.000000e+00 : f32
    %57 = vector.broadcast %cst_14 : f32 to vector<256x256xf32>
    %58 = arith.subf %57, %56 : vector<256x256xf32>
    %cst_15 = arith.constant 0.000000e+00 : f32
    %59 = vector.broadcast %cst_15 : f32 to vector<256x256xf32>
    %60 = arith.maximumf %59, %58 : vector<256x256xf32>
    %61 = vector.broadcast %52 : vector<1x256xf32> to vector<256x256xf32>
    %62 = vector.broadcast %21 : vector<256x1xf32> to vector<256x256xf32>
    %63 = arith.subf %61, %62 : vector<256x256xf32>
    %64 = math.absf %63 : vector<256x256xf32>
    %cst_16 = arith.constant 1.000000e+00 : f32
    %65 = vector.broadcast %cst_16 : f32 to vector<256x256xf32>
    %66 = arith.subf %65, %64 : vector<256x256xf32>
    %cst_17 = arith.constant 0.000000e+00 : f32
    %67 = vector.broadcast %cst_17 : f32 to vector<256x256xf32>
    %68 = arith.maximumf %67, %66 : vector<256x256xf32>
    %69 = arith.mulf %60, %68 : vector<256x256xf32>
    %cst_18 = arith.constant dense<0.000000e+00> : vector<8x256xf32>
    %70 = tpu.matmul %48, %69, %cst_18 {dimension_numbers = #tpu.dot_dimension_numbers<[1], [0], [0], [1], [0, 0, 1, 1], [], []>} : vector<8x256xf32>, vector<256x256xf32>, vector<8x256xf32> -> vector<8x256xf32>
    %71 = arith.addf %48, %70 : vector<8x256xf32>
    %c2_i32 = arith.constant 2 : i32
    %72 = vector.extract_strided_slice %71 {offsets = [0, 0], sizes = [1, 256], strides = [1, 1]} : vector<8x256xf32> to vector<1x256xf32>
    %73 = arith.addf %6, %72 : vector<1x256xf32>
    %74 = vector.extract_strided_slice %71 {offsets = [1, 0], sizes = [1, 256], strides = [1, 1]} : vector<8x256xf32> to vector<1x256xf32>
    %75 = arith.addf %9, %74 : vector<1x256xf32>
    %76 = vector.broadcast %73 : vector<1x256xf32> to vector<256x256xf32>
    %77 = vector.broadcast %18 : vector<256x1xf32> to vector<256x256xf32>
    %78 = arith.subf %76, %77 : vector<256x256xf32>
    %79 = math.absf %78 : vector<256x256xf32>
    %cst_19 = arith.constant 1.000000e+00 : f32
    %80 = vector.broadcast %cst_19 : f32 to vector<256x256xf32>
    %81 = arith.subf %80, %79 : vector<256x256xf32>
    %cst_20 = arith.constant 0.000000e+00 : f32
    %82 = vector.broadcast %cst_20 : f32 to vector<256x256xf32>
    %83 = arith.maximumf %82, %81 : vector<256x256xf32>
    %84 = vector.broadcast %75 : vector<1x256xf32> to vector<256x256xf32>
    %85 = vector.broadcast %21 : vector<256x1xf32> to vector<256x256xf32>
    %86 = arith.subf %84, %85 : vector<256x256xf32>
    %87 = math.absf %86 : vector<256x256xf32>
    %cst_21 = arith.constant 1.000000e+00 : f32
    %88 = vector.broadcast %cst_21 : f32 to vector<256x256xf32>
    %89 = arith.subf %88, %87 : vector<256x256xf32>
    %cst_22 = arith.constant 0.000000e+00 : f32
    %90 = vector.broadcast %cst_22 : f32 to vector<256x256xf32>
    %91 = arith.maximumf %90, %89 : vector<256x256xf32>
    %92 = arith.mulf %83, %91 : vector<256x256xf32>
    %cst_23 = arith.constant dense<0.000000e+00> : vector<8x256xf32>
    %93 = tpu.matmul %71, %92, %cst_23 {dimension_numbers = #tpu.dot_dimension_numbers<[1], [0], [0], [1], [0, 0, 1, 1], [], []>} : vector<8x256xf32>, vector<256x256xf32>, vector<8x256xf32> -> vector<8x256xf32>
    %94 = arith.addf %71, %93 : vector<8x256xf32>
    %c3_i32 = arith.constant 3 : i32
    %95 = vector.extract_strided_slice %94 {offsets = [0, 0], sizes = [1, 256], strides = [1, 1]} : vector<8x256xf32> to vector<1x256xf32>
    %96 = arith.addf %6, %95 : vector<1x256xf32>
    %97 = vector.extract_strided_slice %94 {offsets = [1, 0], sizes = [1, 256], strides = [1, 1]} : vector<8x256xf32> to vector<1x256xf32>
    %98 = arith.addf %9, %97 : vector<1x256xf32>
    %99 = vector.broadcast %96 : vector<1x256xf32> to vector<256x256xf32>
    %100 = vector.broadcast %18 : vector<256x1xf32> to vector<256x256xf32>
    %101 = arith.subf %99, %100 : vector<256x256xf32>
    %102 = math.absf %101 : vector<256x256xf32>
    %cst_24 = arith.constant 1.000000e+00 : f32
    %103 = vector.broadcast %cst_24 : f32 to vector<256x256xf32>
    %104 = arith.subf %103, %102 : vector<256x256xf32>
    %cst_25 = arith.constant 0.000000e+00 : f32
    %105 = vector.broadcast %cst_25 : f32 to vector<256x256xf32>
    %106 = arith.maximumf %105, %104 : vector<256x256xf32>
    %107 = vector.broadcast %98 : vector<1x256xf32> to vector<256x256xf32>
    %108 = vector.broadcast %21 : vector<256x1xf32> to vector<256x256xf32>
    %109 = arith.subf %107, %108 : vector<256x256xf32>
    %110 = math.absf %109 : vector<256x256xf32>
    %cst_26 = arith.constant 1.000000e+00 : f32
    %111 = vector.broadcast %cst_26 : f32 to vector<256x256xf32>
    %112 = arith.subf %111, %110 : vector<256x256xf32>
    %cst_27 = arith.constant 0.000000e+00 : f32
    %113 = vector.broadcast %cst_27 : f32 to vector<256x256xf32>
    %114 = arith.maximumf %113, %112 : vector<256x256xf32>
    %115 = arith.mulf %106, %114 : vector<256x256xf32>
    %cst_28 = arith.constant dense<0.000000e+00> : vector<8x256xf32>
    %116 = tpu.matmul %94, %115, %cst_28 {dimension_numbers = #tpu.dot_dimension_numbers<[1], [0], [0], [1], [0, 0, 1, 1], [], []>} : vector<8x256xf32>, vector<256x256xf32>, vector<8x256xf32> -> vector<8x256xf32>
    %117 = arith.addf %94, %116 : vector<8x256xf32>
    %c0_29 = arith.constant 0 : index
    %c0_30 = arith.constant 0 : index
    %c0_31 = arith.constant 0 : index
    %118 = vector.load %arg2[%c0_29, %c0_30, %c0_31] : memref<1x8x256xf32, #tpu.memory_space<vmem>>, vector<1x8x256xf32>
    %119 = vector.shape_cast %118 : vector<1x8x256xf32> to vector<8x256xf32>
    %120 = vector.shape_cast %117 : vector<8x256xf32> to vector<1x8x256xf32>
    tpu.vector_store %arg2[%c0_29, %c0_30, %c0_31], %120 {strides = array<i32>} : memref<1x8x256xf32, #tpu.memory_space<vmem>>, vector<1x8x256xf32>,
    return
  }
  func.func @transform_0(%arg0: i32) -> (i32, i32, i32) {
    %c0_i32 = arith.constant 0 : i32
    %c0_i32_0 = arith.constant 0 : i32
    %c0_i32_1 = arith.constant 0 : i32
    return %arg0, %c0_i32, %c0_i32_0 : i32, i32, i32
  }
  func.func @transform_1(%arg0: i32) -> (i32, i32, i32) {
    %c0_i32 = arith.constant 0 : i32
    %c0_i32_0 = arith.constant 0 : i32
    %c0_i32_1 = arith.constant 0 : i32
    return %arg0, %c0_i32, %c0_i32_0 : i32, i32, i32
  }
}

</mosaic_0001>

<bundles_post_ra>
// kernel: tpu_custom_call.1
= control target key start
LH: loop header
LB: loop body
LE: loop exit
PB: predicated region body
PF: predicated region fallthrough
CT: control target
= control target key end

     0   :  { %6 = vsyncpa [#allocation3], 0  ;;  %s4817_s0 = inlined_call_operand.hbm [shape: f32[2,8,256], index: 0, kind: input, shape index: {}]   ;;  %s4818_s1 = inlined_call_operand.hbm [shape: f32[2,8,256], index: 1, kind: output, shape index: {}]  }
   0x1   :  { %8 = vsyncpa [#allocation3 + $0x1], 0 }
   0x2   :  { %9 = vsyncpa [#allocation4], 0 }
   0x3   :  { %11 = vsyncpa [#allocation4 + $0x1], 0  ;;  %s3334_s6 = smov 0   ;;  %s3336_s7 = smov 0  }
   0x4   :  { %s3338_s8 = smov 0   ;;  %s3340_s9 = smov 0  }
   0x5 LB: > { %s3355_s10 = sadd.s32 4294967295, %s3322_s9   ;;  %s3164_s11 = sadd.s32 4294967294, %s3322_s9   ;;  %s3322_s9 = sphi %s3340_s9, %s5235_s9   ;;  %s3318_s8 = sphi %s3338_s8, %s5234_s8   ;;  %s3314_s7 = sphi %s3336_s7, %s5233_s7   ;;  %s3310_s6 = sphi %s3334_s6, %s5232_s6  }
   0x6   : > { %s3359_s12 = sadd.s32 1, %s3322_s9   ;;  %s24_s13 = sadd.s32 1, %s3318_s8 }
   0x7   : > { %s21_s14 = ssub.s32 %s3322_s9, %s3359_s12  ;;  %p31_p0 = scmp.ne.s32.totalorder %s3318_s8, %s3314_s7 }
   0x8   : > { %p22_p1 = scmp.eq.s32.totalorder %s21_s14, 0  ;;  %p32_p2 = scmp.eq.s32.totalorder %s3322_s9, 0 }
   0x9   : > { %p37_p3 = scmp.ne.s32.totalorder %s3314_s7, %s3310_s6  ;;  %p38_p4 = scmp.eq.s32.totalorder %s3355_s10, 0 }
   0xa   : > { %s3371_s15 = scalar_select %p22_p1, %s3318_s8, %s24_s13  }
   0xb   : > { %p3373_p5 = por %p32_p2, %p31_p0  ;;  %p3377_p6 = por %p38_p4, %p37_p3 }
   0xc   : > { %p61_p7 = scmp.eq.s32.totalorder %s3355_s10, 1  ;;  %p67_p8 = scmp.eq.s32.totalorder %s3164_s11, 1 }
   0xd   : > { %p3192_p10 = scmp.lt.s32.totalorder %s3322_s9, 2  ;;  %s87_s20 = sand.u32 1, %s3318_s8  }
   0xe   : > { %p3384_p11 = por %p61_p7, %p31_p0  ;;  %p3388_p12 = por %p67_p8, %p37_p3 }
   0xf   : > { %s3178_s21 = sshll.u32 %s3322_s9, 4  ;;  %s3167_s22 = sshll.u32 %s87_s20, 4 }
  0x10   : > { %s96_s25 = scalar_lea.hbm %s4817_s0, %s3178_s21  ;;  %s91_s27 = scalar_lea.vmem [#allocation2], %s3167_s22 }
  0x11   : > { %s98_s26 = sshll.u32 %s96_s25, 4  ;;  %s100_s28 = sshll.u32 %s91_s27, 4  ;;  %s99_s26 = int_to_ptr.hbm [resolvable:$true] %s98_s26  ;;  %s101_s28 = int_to_ptr.vmem [resolvable:$true] %s100_s28 }
  0x12   : > { %p3399_p13 = pnand %p3192_p10, %p3373_p5  ;;  %p3170_p0 = scmp.ge.s32.totalorder %s3322_s9, 1 }
  0x13   : > { %p105_p1 = scmp.lt.s32.totalorder %s3322_s9, 3  ;;  %s88_s30 = scalar_lea.sflag [#allocation3], %s87_s20 }
  0x14   : > { %s3226_s2 = sshra.s32 %s99_s26, 4  ;;  %p3230_p3 = pneg %p3399_p13  ;;  %s3227_s2 = int_to_ptr.hbm [resolvable:$true] %s3226_s2 }
  0x15   : > { %s3228_s3 = scalar_lea.hbm %s3227_s2, 16  ;;  %s3233_s11 = scalar_lea.hbm %s4817_s0, 32 }
  0x16   : > { %p3229_p2 = scmp.ne.s32.totalorder %s3227_s2, %s3228_s3  ;;  %p3234_p5 = scmp.lt.s32.totalorder %s3227_s2, %s4817_s0 }
  0x17   : > { %p3235_p8 = scmp.lt.s32.totalorder %s3233_s11, %s3228_s3 }
  0x18   : > { %p3231_p4 = pnand %p3230_p3, %p3229_p2 }
  0x19   : > { %p3236_p10 = por %p3235_p8, %p3234_p5 }
  0x1a   : > { %p3232_p7 = pneg %p3231_p4 }
  0x1c   : > { %p3237_p9 = pnand %p3236_p10, %p3232_p7 }
  0x1e   : > { %3240 = shalt.err (!%p3237_p9)
}
  0x1f   : > { %3187 = dma.hbm_to_vmem [thread:$0]  (!%p3399_p13), %s99_s26, 256, %s101_s28, %s88_s30  }
  0x20   : > { %p106_p2 = pnand %p3170_p0, %p105_p1 }
  0x22   : > { %109 = sbr.rel (%p106_p2) target bundleno = 1197 (0x4ad), region = 24 }
  0x27   : > { %s3420_s16 = sand.u32 1, %s3314_s7  }
  0x28   : > { %s3171_s20 = sshll.u32 %s3420_s16, 4  ;;  %s112_s21 = scalar_lea.sflag [#allocation3], %s3420_s16 }
  0x29   : > { %s115_s22 = scalar_lea.vmem [#allocation2], %s3171_s20 }
  0x2a   : > { %3301 = dma.done.wait (%p3377_p6), %s112_s21, 256  }
  0x2b   : > { %3303 = vsyncadd (%p3377_p6), %s112_s21, 4294967040  ;;  %v135_v0 = vlaneseq  ;;  %v407_v15 = vld [vmem:[%s115_s22] sm:$0xff]  ;;  %v408_v16 = vld [vmem:[%s115_s22 + $0x8] sm:$0xff]  ;;  %s134_s17 = scalar_lea.vmem [#allocation5], %s3171_s20  ;;  %s3179_s23 = sshll.u32 %s3355_s10, 4 }
  0x2c   : > { %v3444_v23 = vmul.f32 0.0625, %v407_v15  ;;  %v3446_v24 = vmul.f32 0.0625, %v408_v16  ;;  %s3089_s26 = scalar_lea.hbm %s4818_s1, %s3179_s23  ;;  %s3091_s27 = sshll.u32 %s134_s17, 4  ;;  %s3092_s27 = int_to_ptr.vmem [resolvable:$true] %s3091_s27 }
  0x2d   : > { %v136_v1 = vand.u32 127, %v135_v0  ;;  %v3430_v2 = vshrl.u32 %v135_v0, 7  ;;  %s3093_s28 = sshll.u32 %s3089_s26, 4  ;;  %s3078_s29 = scalar_lea.sflag [#allocation4], %s3420_s16  ;;  %s3094_s28 = int_to_ptr.hbm [resolvable:$true] %s3093_s28 }
  0x2e   : > { %s3270_s30 = sshra.s32 %s3094_s28, 4  ;;  %s3276_s4 = scalar_lea.hbm %s4818_s1, 32  ;;  %s3271_s30 = int_to_ptr.hbm [resolvable:$true] %s3270_s30 }
  0x2f   : > { %v137_v3 = vadd.s32 128, %v136_v1  ;;  %v138_v4 = vcvt.s32.f32 %v136_v1  ;;  %v166_v5 = vadd.s32 120, %v3430_v2  ;;  %v182_v6 = vadd.s32 248, %v3430_v2  ;;  %s3272_s2 = scalar_lea.hbm %s3271_s30, 16  ;;  %p3277_p0 = scmp.lt.s32.totalorder %s3271_s30, %s4818_s1 }
  0x30   : > { %v165_v7 = vadd.s32 112, %v3430_v2  ;;  %v181_v8 = vadd.s32 240, %v3430_v2  ;;  %v3437_v9 = vadd.s32 104, %v3430_v2  ;;  %v3440_v10 = vadd.s32 232, %v3430_v2  ;;  %p3273_p6 = scmp.ne.s32.totalorder %s3271_s30, %s3272_s2  ;;  %p3278_p1 = scmp.lt.s32.totalorder %s3276_s4, %s3272_s2 }
  0x31   : > { %v139_v11 = vcvt.s32.f32 %v137_v3  ;;  %v140_v12 = vadd.f32 0.5, %v138_v4  ;;  %v198_v13 = vcvt.s32.f32 %v166_v5  ;;  %v214_v14 = vcvt.s32.f32 %v182_v6 }
  0x32   : > { %v197_v17 = vcvt.s32.f32 %v165_v7  ;;  %v213_v18 = vcvt.s32.f32 %v181_v8  ;;  %v196_v19 = vcvt.s32.f32 %v3437_v9  ;;  %v212_v20 = vcvt.s32.f32 %v3440_v10  ;;  %p3274_p9 = pnand %p3273_p6, %p3384_p11  ;;  %p3279_p3 = por %p3278_p1, %p3277_p0 }
  0x33   : > { %v141_v21 = vadd.f32 0.5, %v139_v11  ;;  %v142_v22 = vmul.f32 0.0625, %v140_v12  ;;  %v262_v25 = vadd.f32 0.5, %v198_v13  ;;  %v278_v26 = vadd.f32 0.5, %v214_v14 }
  0x34   : > { %v261_v27 = vadd.f32 0.5, %v197_v17  ;;  %v277_v28 = vadd.f32 0.5, %v213_v18  ;;  %v260_v31 = vadd.f32 0.5, %v196_v19  ;;  %v3454_v32 = vadd.f32 0.5, %v212_v20  ;;  %p3275_p13 = pneg %p3274_p9 }
  0x35   : > { %v143_v29 = vmul.f32 0.0625, %v141_v21  ;;  %v3448_v30 = vfloor.f32 %v142_v22  ;;  %v294_v33 = vmul.f32 0.0625, %v262_v25  ;;  %v310_v34 = vmul.f32 0.0625, %v278_v26 }
  0x36   : > { %v293_v35 = vmul.f32 0.0625, %v261_v27  ;;  %v309_v36 = vmul.f32 0.0625, %v277_v28  ;;  %v3461_v40 = vmul.f32 0.0625, %v260_v31  ;;  %v163_v10 = vadd.s32 96, %v3430_v2  ;;  %p3280_p4 = pnand %p3279_p3, %p3275_p13 }
  0x37   : > { %5010 = vst [vmem:[#allocation8_spill] sm:$0xff] %v3448_v30  ;;  %v3456_v37 = vfloor.f32 %v143_v29  ;;  %v146_v38 = vmul.f32 16.0, %v3448_v30  ;;  %v411_v39 = vadd.f32 %v3444_v23, %v3448_v30  ;;  %v3463_v41 = vfloor.f32 %v294_v33 }
  0x38   : > { %v3465_v42 = vfloor.f32 %v310_v34  ;;  %v3467_v43 = vfloor.f32 %v293_v35  ;;  %v3469_v44 = vfloor.f32 %v309_v36 }
  0x39   : > { %5011 = vst [vmem:[#allocation9_spill] sm:$0xff] %v3456_v37  ;;  %v147_v45 = vmul.f32 16.0, %v3456_v37  ;;  %v3472_v46 = vsub.f32 %v138_v4, %v146_v38  ;;  %v412_v47 = vadd.f32 %v3446_v24, %v3456_v37  ;;  %v3476_v48 = vperm.slane %v411_v39, 0 }
  0x3a   : > { %5012 = vst [vmem:[#allocation10_spill] sm:$0xff] %v3465_v42  ;;  %v358_v49 = vmul.f32 16.0, %v3463_v41  ;;  %v374_v50 = vmul.f32 16.0, %v3465_v42  ;;  %v357_v51 = vmul.f32 16.0, %v3467_v43  ;;  %v373_v52 = vmul.f32 16.0, %v3469_v44 }
  0x3b   : > { %5013 = vst [vmem:[#allocation11_spill] sm:$0xff] %v3469_v44  ;;  %v3482_v53 = vsub.f32 %v139_v11, %v147_v45  ;;  %v413_v54 = vadd.f32 %v3444_v23, %v3472_v46  ;;  %v3486_v55 = vperm.slane %v412_v47, 0  ;;  %v447_v56 = vsub.f32 %v3476_v48, %v3463_v41 }
  0x3c   : > { %5014 = vst [vmem:[#allocation12_spill] sm:$0xff] %v3472_v46  ;;  %v3490_v57 = vsub.f32 %v198_v13, %v358_v49  ;;  %v3492_v58 = vsub.f32 %v214_v14, %v374_v50  ;;  %v479_v59 = vsub.f32 %v3476_v48, %v3465_v42  ;;  %v3496_v60 = vsub.f32 %v197_v17, %v357_v51 }
  0x3d   : > { %5015 = vst [vmem:[#allocation13_spill] sm:$0xff] %v3482_v53  ;;  %v414_v61 = vadd.f32 %v3446_v24, %v3482_v53  ;;  %v3500_v62 = vperm.slane %v413_v54, 1  ;;  %v511_v63 = vand.u32 2147483647, %v447_v56  ;;  %v445_v0 = vsub.f32 %v3476_v48, %v3467_v43 }
  0x3e   : > { %5016 = vst [vmem:[#allocation14_spill] sm:$0xff] %v3490_v57  ;;  %v543_v1 = vand.u32 2147483647, %v479_v59  ;;  %v3504_v3 = vsub.f32 %v213_v18, %v373_v52  ;;  %v477_v4 = vsub.f32 %v3476_v48, %v3469_v44  ;;  %v448_v5 = vsub.f32 %v3486_v55, %v3463_v41 }
  0x3f   : > { %5017 = vst [vmem:[#allocation15_spill] sm:$0xff] %v3492_v58  ;;  %v3510_v6 = vperm.slane %v414_v61, 1  ;;  %v575_v7 = vsub.f32 1.0, %v511_v63  ;;  %v705_v8 = vsub.f32 %v3500_v62, %v3490_v57  ;;  %v737_v11 = vsub.f32 %v3500_v62, %v3492_v58 }
  0x40   : > { %5018 = vst [vmem:[#allocation16_spill] sm:$0xff] %v3496_v60  ;;  %v607_v12 = vsub.f32 1.0, %v543_v1  ;;  %v509_v13 = vand.u32 2147483647, %v445_v0  ;;  %v703_v14 = vsub.f32 %v3500_v62, %v3496_v60  ;;  %v541_v15 = vand.u32 2147483647, %v477_v4 }
  0x41   : > { %5019 = vst [vmem:[#allocation17_spill] sm:$0xff] %v3504_v3  ;;  %v639_v16 = vmax.f32 %v575_v7, 0.0  ;;  %v769_v17 = vand.u32 2147483647, %v705_v8  ;;  %v801_v18 = vand.u32 2147483647, %v737_v11  ;;  %v735_v21 = vsub.f32 %v3500_v62, %v3504_v3 }
  0x42   : > { %v671_v22 = vmax.f32 %v607_v12, 0.0  ;;  %v573_v25 = vsub.f32 1.0, %v509_v13  ;;  %v767_v26 = vand.u32 2147483647, %v703_v14  ;;  %v605_v27 = vsub.f32 1.0, %v541_v15 }
  0x43   : > { %v833_v28 = vsub.f32 1.0, %v769_v17  ;;  %v865_v29 = vsub.f32 1.0, %v801_v18  ;;  %v799_v31 = vand.u32 2147483647, %v735_v21  ;;  %v512_v33 = vand.u32 2147483647, %v448_v5 }
  0x44   : > { %v637_v34 = vmax.f32 %v573_v25, 0.0  ;;  %v831_v35 = vsub.f32 1.0, %v767_v26  ;;  %v669_v36 = vmax.f32 %v605_v27, 0.0  ;;  %v706_v38 = vsub.f32 %v3510_v6, %v3490_v57 }
  0x45   : > { %v897_v39 = vmax.f32 %v833_v28, 0.0  ;;  %v929_v45 = vmax.f32 %v865_v29, 0.0  ;;  %v863_v47 = vsub.f32 1.0, %v799_v31  ;;  %v576_v49 = vsub.f32 1.0, %v512_v33 }
  0x46   : > { %v895_v50 = vmax.f32 %v831_v35, 0.0  ;;  %v770_v51 = vand.u32 2147483647, %v706_v38  ;;  %v480_v52 = vsub.f32 %v3486_v55, %v3465_v42  ;;  %v738_v54 = vsub.f32 %v3510_v6, %v3492_v58 }
  0x47   : > { %v961_v56 = vmul.f32 %v897_v39, %v639_v16  ;;  %v993_v59 = vmul.f32 %v929_v45, %v671_v22  ;;  %v927_v61 = vmax.f32 %v863_v47, 0.0  ;;  %v640_v63 = vmax.f32 %v576_v49, 0.0 }
  0x48   : > { %v959_v0 = vmul.f32 %v895_v50, %v637_v34  ;;  %v834_v1 = vsub.f32 1.0, %v770_v51  ;;  %v544_v4 = vand.u32 2147483647, %v480_v52  ;;  %v802_v5 = vand.u32 2147483647, %v738_v54 }
  0x49   : > { %995 = vmatpush.msra.mxu0 %v961_v56  ;;  %1015 = vmatpush.msra.mxu1 %v993_v59  ;;  %v991_v7 = vmul.f32 %v927_v61, %v669_v36  ;;  %v3527_v8 = vfloor.f32 %v3461_v40  ;;  %v308_v11 = vmul.f32 0.0625, %v3454_v32  ;;  %v446_v12 = vsub.f32 %v3486_v55, %v3467_v43 }
  0x4a   : > { %v898_v13 = vmax.f32 %v834_v1, 0.0  ;;  %v608_v14 = vsub.f32 1.0, %v544_v4  ;;  %v866_v15 = vsub.f32 1.0, %v802_v5  ;;  %v704_v16 = vsub.f32 %v3510_v6, %v3496_v60 }
  0x4b   : > { %5020 = vst [vmem:[#allocation18_spill] sm:$0xff] %v3527_v8  ;;  %996 = vmatpush.msra.mxu0 %v959_v0  ;;  %1016 = vmatpush.msra.mxu1 %v991_v7  ;;  %v356_v17 = vmul.f32 16.0, %v3527_v8  ;;  %v443_v18 = vsub.f32 %v3476_v48, %v3527_v8  ;;  %v3537_v40 = vfloor.f32 %v308_v11  ;;  %v510_v21 = vand.u32 2147483647, %v446_v12 }
  0x4c   : > { %v962_v32 = vmul.f32 %v898_v13, %v640_v63  ;;  %v672_v22 = vmax.f32 %v608_v14, 0.0  ;;  %v930_v25 = vmax.f32 %v866_v15, 0.0  ;;  %v768_v26 = vand.u32 2147483647, %v704_v16 }
  0x4d   : > { %5021 = vst [vmem:[#allocation19_spill] sm:$0xff] %v3537_v40  ;;  %v3541_v27 = vsub.f32 %v196_v19, %v356_v17  ;;  %v507_v28 = vand.u32 2147483647, %v443_v18  ;;  %v372_v29 = vmul.f32 16.0, %v3537_v40  ;;  %v475_v31 = vsub.f32 %v3476_v48, %v3537_v40 }
  0x4e   : > { %1035 = vmatpush.msra.mxu2 %v962_v32  ;;  %v994_v33 = vmul.f32 %v930_v25, %v672_v22  ;;  %v574_v34 = vsub.f32 1.0, %v510_v21  ;;  %v832_v35 = vsub.f32 1.0, %v768_v26  ;;  %v478_v36 = vsub.f32 %v3486_v55, %v3469_v44 }
  0x4f   : > { %5022 = vst [vmem:[#allocation20_spill] sm:$0xff] %v3541_v27  ;;  %v571_v38 = vsub.f32 1.0, %v507_v28  ;;  %v701_v39 = vsub.f32 %v3500_v62, %v3541_v27  ;;  %v3552_v9 = vsub.f32 %v212_v20, %v372_v29  ;;  %v539_v19 = vand.u32 2147483647, %v475_v31 }
  0x50   : > { %1055 = vmatpush.msra.mxu3 %v994_v33  ;;  %v638_v45 = vmax.f32 %v574_v34, 0.0  ;;  %v896_v47 = vmax.f32 %v832_v35, 0.0  ;;  %v542_v49 = vand.u32 2147483647, %v478_v36  ;;  %v736_v50 = vsub.f32 %v3510_v6, %v3504_v3 }
  0x51   : > { %5023 = vst [vmem:[#allocation21_spill] sm:$0xff] %v3552_v9  ;;  %v635_v51 = vmax.f32 %v571_v38, 0.0  ;;  %v765_v52 = vand.u32 2147483647, %v701_v39  ;;  %v603_v54 = vsub.f32 1.0, %v539_v19  ;;  %v733_v56 = vsub.f32 %v3500_v62, %v3552_v9 }
  0x52   : > { %v960_v59 = vmul.f32 %v896_v47, %v638_v45  ;;  %v606_v61 = vsub.f32 1.0, %v542_v49  ;;  %v800_v63 = vand.u32 2147483647, %v736_v50  ;;  %v179_v4 = vadd.s32 224, %v3430_v2 }
  0x53   : > { %v829_v20 = vsub.f32 1.0, %v765_v52  ;;  %v667_v0 = vmax.f32 %v603_v54, 0.0  ;;  %v797_v1 = vand.u32 2147483647, %v733_v56  ;;  %v195_v11 = vcvt.s32.f32 %v163_v10 }
  0x54   : > { %1036 = vmatpush.msra.mxu2 %v960_v59  ;;  %v670_v5 = vmax.f32 %v606_v61, 0.0  ;;  %v864_v7 = vsub.f32 1.0, %v800_v63  ;;  %v444_v12 = vsub.f32 %v3486_v55, %v3527_v8  ;;  %v211_v15 = vcvt.s32.f32 %v179_v4 }
  0x55   : > { %v893_v13 = vmax.f32 %v829_v20, 0.0  ;;  %v861_v14 = vsub.f32 1.0, %v797_v1  ;;  %v702_v16 = vsub.f32 %v3510_v6, %v3541_v27  ;;  %v259_v18 = vadd.f32 0.5, %v195_v11 }
  0x56   : > { %v928_v17 = vmax.f32 %v864_v7, 0.0  ;;  %v508_v21 = vand.u32 2147483647, %v444_v12  ;;  %v476_v32 = vsub.f32 %v3486_v55, %v3537_v40  ;;  %v275_v26 = vadd.f32 0.5, %v211_v15 }
  0x57   : > { %v957_v22 = vmul.f32 %v893_v13, %v635_v51  ;;  %v925_v25 = vmax.f32 %v861_v14, 0.0  ;;  %v766_v28 = vand.u32 2147483647, %v702_v16  ;;  %v291_v31 = vmul.f32 0.0625, %v259_v18 }
  0x58   : > { %v992_v29 = vmul.f32 %v928_v17, %v670_v5  ;;  %v572_v33 = vsub.f32 1.0, %v508_v21  ;;  %v540_v34 = vand.u32 2147483647, %v476_v32  ;;  %v307_v36 = vmul.f32 0.0625, %v275_v26 }
  0x59   : > { %997 = vmatpush.msra.mxu0 %v957_v22  ;;  %v989_v35 = vmul.f32 %v925_v25, %v667_v0  ;;  %v830_v38 = vsub.f32 1.0, %v766_v28  ;;  %v734_v39 = vsub.f32 %v3510_v6, %v3552_v9  ;;  %v3568_v19 = vfloor.f32 %v291_v31 }
  0x5a   : > { %1056 = vmatpush.msra.mxu3 %v992_v29  ;;  %v636_v45 = vmax.f32 %v572_v33, 0.0  ;;  %v604_v47 = vsub.f32 1.0, %v540_v34  ;;  %v162_v49 = vadd.s32 88, %v3430_v2  ;;  %v3571_v50 = vfloor.f32 %v307_v36 }
  0x5b   : > { %5024 = vst [vmem:[#allocation22_spill] sm:$0xff] %v3568_v19  ;;  %1017 = vmatpush.msra.mxu1 %v989_v35  ;;  %v894_v51 = vmax.f32 %v830_v38, 0.0  ;;  %v798_v52 = vand.u32 2147483647, %v734_v39  ;;  %v178_v54 = vadd.s32 216, %v3430_v2  ;;  %v355_v56 = vmul.f32 16.0, %v3568_v19 }
  0x5c   : > { %5025 = vst [vmem:[#allocation23_spill] sm:$0xff] %v3571_v50  ;;  %v441_v59 = vsub.f32 %v3476_v48, %v3568_v19  ;;  %v668_v61 = vmax.f32 %v604_v47, 0.0  ;;  %v194_v63 = vcvt.s32.f32 %v162_v49  ;;  %v371_v10 = vmul.f32 16.0, %v3571_v50 }
  0x5d   : > { %v473_v20 = vsub.f32 %v3476_v48, %v3571_v50  ;;  %v958_v0 = vmul.f32 %v894_v51, %v636_v45  ;;  %v862_v1 = vsub.f32 1.0, %v798_v52  ;;  %v3580_v4 = vsub.f32 %v195_v11, %v355_v56 }
  0x5e   : > { %v505_v5 = vand.u32 2147483647, %v441_v59  ;;  %v258_v7 = vadd.f32 0.5, %v194_v63  ;;  %v210_v12 = vcvt.s32.f32 %v178_v54  ;;  %v3582_v13 = vsub.f32 %v211_v15, %v371_v10 }
  0x5f   : > { %5026 = vst [vmem:[#allocation24_spill] sm:$0xff] %v3580_v4  ;;  %v537_v14 = vand.u32 2147483647, %v473_v20  ;;  %1037 = vmatpush.msra.mxu2 %v958_v0  ;;  %v926_v16 = vmax.f32 %v862_v1, 0.0  ;;  %v442_v17 = vsub.f32 %v3486_v55, %v3568_v19  ;;  %v699_v21 = vsub.f32 %v3500_v62, %v3580_v4 }
  0x60   : > { %5027 = vst [vmem:[#allocation25_spill] sm:$0xff] %v3582_v13  ;;  %v569_v18 = vsub.f32 1.0, %v505_v5  ;;  %v290_v32 = vmul.f32 0.0625, %v258_v7  ;;  %v274_v22 = vadd.f32 0.5, %v210_v12  ;;  %v731_v11 = vsub.f32 %v3500_v62, %v3582_v13 }
  0x61   : > { %v601_v25 = vsub.f32 1.0, %v537_v14  ;;  %v990_v26 = vmul.f32 %v926_v16, %v668_v61  ;;  %v506_v28 = vand.u32 2147483647, %v442_v17  ;;  %v763_v29 = vand.u32 2147483647, %v699_v21 }
  0x62   : > { %v633_v15 = vmax.f32 %v569_v18, 0.0  ;;  %v3590_v31 = vfloor.f32 %v290_v32  ;;  %v306_v33 = vmul.f32 0.0625, %v274_v22  ;;  %v795_v35 = vand.u32 2147483647, %v731_v11 }
  0x63   : > { %v665_v34 = vmax.f32 %v601_v25, 0.0  ;;  %1057 = vmatpush.msra.mxu3 %v990_v26  ;;  %v570_v36 = vsub.f32 1.0, %v506_v28  ;;  %v700_v38 = vsub.f32 %v3510_v6, %v3580_v4  ;;  %v827_v39 = vsub.f32 1.0, %v763_v29 }
  0x64   : > { %5028 = vst [vmem:[#allocation26_spill] sm:$0xff] %v3590_v31  ;;  %v354_v45 = vmul.f32 16.0, %v3590_v31  ;;  %v439_v47 = vsub.f32 %v3476_v48, %v3590_v31  ;;  %v3597_v49 = vfloor.f32 %v306_v33  ;;  %v859_v51 = vsub.f32 1.0, %v795_v35 }
  0x65   : > { %v634_v52 = vmax.f32 %v570_v36, 0.0  ;;  %v764_v54 = vand.u32 2147483647, %v700_v38  ;;  %v474_v56 = vsub.f32 %v3486_v55, %v3571_v50  ;;  %v891_v59 = vmax.f32 %v827_v39, 0.0 }
  0x66   : > { %5029 = vst [vmem:[#allocation27_spill] sm:$0xff] %v3597_v49  ;;  %v3601_v61 = vsub.f32 %v194_v63, %v354_v45  ;;  %v503_v10 = vand.u32 2147483647, %v439_v47  ;;  %v370_v20 = vmul.f32 16.0, %v3597_v49  ;;  %v923_v0 = vmax.f32 %v859_v51, 0.0 }
  0x67   : > { %v471_v1 = vsub.f32 %v3476_v48, %v3597_v49  ;;  %v828_v5 = vsub.f32 1.0, %v764_v54  ;;  %v538_v7 = vand.u32 2147483647, %v474_v56  ;;  %v955_v14 = vmul.f32 %v891_v59, %v633_v15 }
  0x68   : > { %5030 = vst [vmem:[#allocation28_spill] sm:$0xff] %v3601_v61  ;;  %v567_v16 = vsub.f32 1.0, %v503_v10  ;;  %v697_v17 = vsub.f32 %v3500_v62, %v3601_v61  ;;  %v3608_v18 = vsub.f32 %v210_v12, %v370_v20  ;;  %v987_v21 = vmul.f32 %v923_v0, %v665_v34 }
  0x69   : > { %v535_v32 = vand.u32 2147483647, %v471_v1  ;;  %v892_v63 = vmax.f32 %v828_v5, 0.0  ;;  %v602_v22 = vsub.f32 1.0, %v538_v7  ;;  %998 = vmatpush.msra.mxu0 %v955_v14  ;;  %v732_v28 = vsub.f32 %v3510_v6, %v3582_v13 }
  0x6a   : > { %5031 = vst [vmem:[#allocation29_spill] sm:$0xff] %v3608_v18  ;;  %v631_v25 = vmax.f32 %v567_v16, 0.0  ;;  %v761_v11 = vand.u32 2147483647, %v697_v17  ;;  %v729_v26 = vsub.f32 %v3500_v62, %v3608_v18  ;;  %1018 = vmatpush.msra.mxu1 %v987_v21  ;;  %v161_v12 = vadd.s32 80, %v3430_v2 }
  0x6b   : > { %v599_v15 = vsub.f32 1.0, %v535_v32  ;;  %v956_v29 = vmul.f32 %v892_v63, %v634_v52  ;;  %v666_v33 = vmax.f32 %v602_v22, 0.0  ;;  %v796_v36 = vand.u32 2147483647, %v732_v28 }
  0x6c   : > { %v825_v35 = vsub.f32 1.0, %v761_v11  ;;  %v793_v34 = vand.u32 2147483647, %v729_v26  ;;  %v177_v38 = vadd.s32 208, %v3430_v2  ;;  %v193_v45 = vcvt.s32.f32 %v161_v12 }
  0x6d   : > { %v663_v39 = vmax.f32 %v599_v15, 0.0  ;;  %1038 = vmatpush.msra.mxu2 %v956_v29  ;;  %v440_v47 = vsub.f32 %v3486_v55, %v3590_v31  ;;  %v698_v51 = vsub.f32 %v3510_v6, %v3601_v61  ;;  %v860_v52 = vsub.f32 1.0, %v796_v36 }
  0x6e   : > { %v889_v54 = vmax.f32 %v825_v35, 0.0  ;;  %v857_v56 = vsub.f32 1.0, %v793_v34  ;;  %v209_v59 = vcvt.s32.f32 %v177_v38  ;;  %v257_v10 = vadd.f32 0.5, %v193_v45 }
  0x6f   : > { %v504_v20 = vand.u32 2147483647, %v440_v47  ;;  %v762_v0 = vand.u32 2147483647, %v698_v51  ;;  %v472_v1 = vsub.f32 %v3486_v55, %v3597_v49  ;;  %v924_v14 = vmax.f32 %v860_v52, 0.0 }
  0x70   : > { %v953_v5 = vmul.f32 %v889_v54, %v631_v25  ;;  %v921_v7 = vmax.f32 %v857_v56, 0.0  ;;  %v273_v16 = vadd.f32 0.5, %v209_v59  ;;  %v289_v17 = vmul.f32 0.0625, %v257_v10 }
  0x71   : > { %v568_v21 = vsub.f32 1.0, %v504_v20  ;;  %v826_v32 = vsub.f32 1.0, %v762_v0  ;;  %v536_v63 = vand.u32 2147483647, %v472_v1  ;;  %v988_v11 = vmul.f32 %v924_v14, %v666_v33 }
  0x72   : > { %999 = vmatpush.msra.mxu0 %v953_v5  ;;  %v985_v22 = vmul.f32 %v921_v7, %v663_v39  ;;  %v305_v26 = vmul.f32 0.0625, %v273_v16  ;;  %v730_v28 = vsub.f32 %v3510_v6, %v3608_v18  ;;  %v3624_v15 = vfloor.f32 %v289_v17 }
  0x73   : > { %v632_v29 = vmax.f32 %v568_v21, 0.0  ;;  %v890_v12 = vmax.f32 %v826_v32, 0.0  ;;  %v600_v35 = vsub.f32 1.0, %v536_v63  ;;  %1058 = vmatpush.msra.mxu3 %v988_v11  ;;  %v160_v36 = vadd.s32 72, %v3430_v2 }
  0x74   : > { %5032 = vst [vmem:[#allocation30_spill] sm:$0xff] %v3624_v15  ;;  %1019 = vmatpush.msra.mxu1 %v985_v22  ;;  %v3626_v25 = vfloor.f32 %v305_v26  ;;  %v794_v34 = vand.u32 2147483647, %v730_v28  ;;  %v176_v38 = vadd.s32 200, %v3430_v2  ;;  %v353_v33 = vmul.f32 16.0, %v3624_v15 }
  0x75   : > { %v437_v39 = vsub.f32 %v3476_v48, %v3624_v15  ;;  %v954_v47 = vmul.f32 %v890_v12, %v632_v29  ;;  %v664_v51 = vmax.f32 %v600_v35, 0.0  ;;  %v192_v10 = vcvt.s32.f32 %v160_v36 }
  0x76   : > { %5033 = vst [vmem:[#allocation31_spill] sm:$0xff] %v3626_v25  ;;  %v369_v54 = vmul.f32 16.0, %v3626_v25  ;;  %v469_v56 = vsub.f32 %v3476_v48, %v3626_v25  ;;  %v858_v52 = vsub.f32 1.0, %v794_v34  ;;  %v3636_v20 = vsub.f32 %v193_v45, %v353_v33 }
  0x77   : > { %v501_v0 = vand.u32 2147483647, %v437_v39  ;;  %1039 = vmatpush.msra.mxu2 %v954_v47  ;;  %v208_v1 = vcvt.s32.f32 %v176_v38  ;;  %v438_v5 = vsub.f32 %v3486_v55, %v3624_v15  ;;  %v256_v17 = vadd.f32 0.5, %v192_v10 }
  0x78   : > { %5034 = vst [vmem:[#allocation32_spill] sm:$0xff] %v3636_v20  ;;  %v3640_v7 = vsub.f32 %v209_v59, %v369_v54  ;;  %v533_v14 = vand.u32 2147483647, %v469_v56  ;;  %v922_v16 = vmax.f32 %v858_v52, 0.0  ;;  %v695_v32 = vsub.f32 %v3500_v62, %v3636_v20 }
  0x79   : > { %v565_v21 = vsub.f32 1.0, %v501_v0  ;;  %v272_v63 = vadd.f32 0.5, %v208_v1  ;;  %v502_v22 = vand.u32 2147483647, %v438_v5  ;;  %v288_v28 = vmul.f32 0.0625, %v256_v17 }
  0x7a   : > { %5035 = vst [vmem:[#allocation33_spill] sm:$0xff] %v3640_v7  ;;  %v597_v11 = vsub.f32 1.0, %v533_v14  ;;  %v727_v45 = vsub.f32 %v3500_v62, %v3640_v7  ;;  %v986_v26 = vmul.f32 %v922_v16, %v664_v51  ;;  %v759_v12 = vand.u32 2147483647, %v695_v32 }
  0x7b   : > { %v629_v29 = vmax.f32 %v565_v21, 0.0  ;;  %v304_v35 = vmul.f32 0.0625, %v272_v63  ;;  %v566_v59 = vsub.f32 1.0, %v502_v22  ;;  %v3646_v38 = vfloor.f32 %v288_v28 }
  0x7c   : > { %v661_v34 = vmax.f32 %v597_v11, 0.0  ;;  %v791_v36 = vand.u32 2147483647, %v727_v45  ;;  %1059 = vmatpush.msra.mxu3 %v986_v26  ;;  %v696_v33 = vsub.f32 %v3510_v6, %v3636_v20  ;;  %v823_v39 = vsub.f32 1.0, %v759_v12 }
  0x7d   : > { %5036 = vst [vmem:[#allocation34_spill] sm:$0xff] %v3646_v38  ;;  %v3650_v47 = vfloor.f32 %v304_v35  ;;  %v630_v54 = vmax.f32 %v566_v59, 0.0  ;;  %v470_v51 = vsub.f32 %v3486_v55, %v3626_v25  ;;  %v352_v52 = vmul.f32 16.0, %v3646_v38 }
  0x7e   : > { %v855_v56 = vsub.f32 1.0, %v791_v36  ;;  %v435_v0 = vsub.f32 %v3476_v48, %v3646_v38  ;;  %v760_v5 = vand.u32 2147483647, %v696_v33  ;;  %v887_v14 = vmax.f32 %v823_v39, 0.0 }
  0x7f   : > { %5037 = vst [vmem:[#allocation35_spill] sm:$0xff] %v3650_v47  ;;  %v368_v16 = vmul.f32 16.0, %v3650_v47  ;;  %v467_v17 = vsub.f32 %v3476_v48, %v3650_v47  ;;  %v534_v21 = vand.u32 2147483647, %v470_v51  ;;  %v3660_v63 = vsub.f32 %v192_v10, %v352_v52 }
  0x80   : > { %v919_v32 = vmax.f32 %v855_v56, 0.0  ;;  %v499_v22 = vand.u32 2147483647, %v435_v0  ;;  %v824_v11 = vsub.f32 1.0, %v760_v5  ;;  %v951_v45 = vmul.f32 %v887_v14, %v629_v29 }
  0x81   : > { %5038 = vst [vmem:[#allocation36_spill] sm:$0xff] %v3660_v63  ;;  %v3662_v26 = vsub.f32 %v208_v1, %v368_v16  ;;  %v531_v28 = vand.u32 2147483647, %v467_v17  ;;  %v598_v12 = vsub.f32 1.0, %v534_v21  ;;  %v693_v36 = vsub.f32 %v3500_v62, %v3660_v63 }
  0x82   : > { %v983_v35 = vmul.f32 %v919_v32, %v661_v34  ;;  %v563_v59 = vsub.f32 1.0, %v499_v22  ;;  %v888_v33 = vmax.f32 %v824_v11, 0.0  ;;  %1000 = vmatpush.msra.mxu0 %v951_v45  ;;  %v728_v56 = vsub.f32 %v3510_v6, %v3640_v7 }
  0x83   : > { %5039 = vst [vmem:[#allocation37_spill] sm:$0xff] %v3662_v26  ;;  %v595_v39 = vsub.f32 1.0, %v531_v28  ;;  %v725_v51 = vsub.f32 %v3500_v62, %v3662_v26  ;;  %v662_v10 = vmax.f32 %v598_v12, 0.0  ;;  %v757_v29 = vand.u32 2147483647, %v693_v36 }
  0x84   : > { %1020 = vmatpush.msra.mxu1 %v983_v35  ;;  %v627_v1 = vmax.f32 %v563_v59, 0.0  ;;  %v952_v52 = vmul.f32 %v888_v33, %v630_v54  ;;  %v159_v34 = vadd.s32 64, %v3430_v2  ;;  %v792_v14 = vand.u32 2147483647, %v728_v56 }
  0x85   : > { %v659_v0 = vmax.f32 %v595_v39, 0.0  ;;  %v789_v5 = vand.u32 2147483647, %v725_v51  ;;  %v175_v16 = vadd.s32 192, %v3430_v2  ;;  %v821_v17 = vsub.f32 1.0, %v757_v29 }
  0x86   : > { %1040 = vmatpush.msra.mxu2 %v952_v52  ;;  %v191_v21 = vcvt.s32.f32 %v159_v34  ;;  %v436_v32 = vsub.f32 %v3486_v55, %v3646_v38  ;;  %v694_v22 = vsub.f32 %v3510_v6, %v3660_v63  ;;  %v856_v45 = vsub.f32 1.0, %v792_v14 }
  0x87   : > { %v853_v11 = vsub.f32 1.0, %v789_v5  ;;  %v207_v28 = vcvt.s32.f32 %v175_v16  ;;  %v468_v54 = vsub.f32 %v3486_v55, %v3650_v47  ;;  %v885_v12 = vmax.f32 %v821_v17, 0.0 }
  0x88   : > { %v255_v35 = vadd.f32 0.5, %v191_v21  ;;  %v500_v59 = vand.u32 2147483647, %v436_v32  ;;  %v758_v36 = vand.u32 2147483647, %v694_v22  ;;  %v920_v39 = vmax.f32 %v856_v45, 0.0 }
  0x89   : > { %v917_v33 = vmax.f32 %v853_v11, 0.0  ;;  %v271_v51 = vadd.f32 0.5, %v207_v28  ;;  %v532_v56 = vand.u32 2147483647, %v468_v54  ;;  %v949_v29 = vmul.f32 %v885_v12, %v627_v1 }
  0x8a   : > { %v287_v52 = vmul.f32 0.0625, %v255_v35  ;;  %v564_v34 = vsub.f32 1.0, %v500_v59  ;;  %v822_v38 = vsub.f32 1.0, %v758_v36  ;;  %v984_v63 = vmul.f32 %v920_v39, %v662_v10 }
  0x8b   : > { %v981_v7 = vmul.f32 %v917_v33, %v659_v0  ;;  %v303_v5 = vmul.f32 0.0625, %v271_v51  ;;  %v596_v14 = vsub.f32 1.0, %v532_v56  ;;  %1001 = vmatpush.msra.mxu0 %v949_v29  ;;  %v726_v32 = vsub.f32 %v3510_v6, %v3662_v26 }
  0x8c   : > { %v3678_v16 = vfloor.f32 %v287_v52  ;;  %v628_v47 = vmax.f32 %v564_v34, 0.0  ;;  %v886_v17 = vmax.f32 %v822_v38, 0.0  ;;  %1060 = vmatpush.msra.mxu3 %v984_v63  ;;  %v158_v11 = vadd.s32 56, %v3430_v2 }
  0x8d   : > { %1021 = vmatpush.msra.mxu1 %v981_v7  ;;  %v3682_v22 = vfloor.f32 %v303_v5  ;;  %v660_v1 = vmax.f32 %v596_v14, 0.0  ;;  %v174_v0 = vadd.s32 184, %v3430_v2  ;;  %v790_v12 = vand.u32 2147483647, %v726_v32 }
  0x8e   : > { %5040 = vst [vmem:[#allocation38_spill] sm:$0xff] %v3678_v16  ;;  %v351_v10 = vmul.f32 16.0, %v3678_v16  ;;  %v433_v45 = vsub.f32 %v3476_v48, %v3678_v16  ;;  %v950_v54 = vmul.f32 %v886_v17, %v628_v47  ;;  %v190_v63 = vcvt.s32.f32 %v158_v11 }
  0x8f   : > { %5041 = vst [vmem:[#allocation39_spill] sm:$0xff] %v3682_v22  ;;  %v367_v38 = vmul.f32 16.0, %v3682_v22  ;;  %v465_v7 = vsub.f32 %v3476_v48, %v3682_v22  ;;  %v206_v35 = vcvt.s32.f32 %v174_v0  ;;  %v854_v33 = vsub.f32 1.0, %v790_v12 }
  0x90   : > { %v3692_v59 = vsub.f32 %v191_v21, %v351_v10  ;;  %v497_v36 = vand.u32 2147483647, %v433_v45  ;;  %1041 = vmatpush.msra.mxu2 %v950_v54  ;;  %v434_v39 = vsub.f32 %v3486_v55, %v3678_v16  ;;  %v254_v47 = vadd.f32 0.5, %v190_v63 }
  0x91   : > { %v3696_v51 = vsub.f32 %v207_v28, %v367_v38  ;;  %v529_v56 = vand.u32 2147483647, %v465_v7  ;;  %v270_v29 = vadd.f32 0.5, %v206_v35  ;;  %v918_v5 = vmax.f32 %v854_v33, 0.0 }
  0x92   : > { %5042 = vst [vmem:[#allocation40_spill] sm:$0xff] %v3692_v59  ;;  %v561_v52 = vsub.f32 1.0, %v497_v36  ;;  %v691_v34 = vsub.f32 %v3500_v62, %v3692_v59  ;;  %v498_v14 = vand.u32 2147483647, %v434_v39  ;;  %v286_v32 = vmul.f32 0.0625, %v254_v47 }
  0x93   : > { %5043 = vst [vmem:[#allocation41_spill] sm:$0xff] %v3696_v51  ;;  %v593_v17 = vsub.f32 1.0, %v529_v56  ;;  %v723_v21 = vsub.f32 %v3500_v62, %v3696_v51  ;;  %v302_v11 = vmul.f32 0.0625, %v270_v29  ;;  %v982_v45 = vmul.f32 %v918_v5, %v660_v1 }
  0x94   : > { %v625_v0 = vmax.f32 %v561_v52, 0.0  ;;  %v755_v10 = vand.u32 2147483647, %v691_v34  ;;  %v562_v28 = vsub.f32 1.0, %v498_v14  ;;  %v3702_v38 = vfloor.f32 %v286_v32 }
  0x95   : > { %v657_v54 = vmax.f32 %v593_v17, 0.0  ;;  %v787_v12 = vand.u32 2147483647, %v723_v21  ;;  %v3704_v7 = vfloor.f32 %v302_v11  ;;  %1061 = vmatpush.msra.mxu3 %v982_v45  ;;  %v692_v39 = vsub.f32 %v3510_v6, %v3692_v59 }
  0x96   : > { %5044 = vst [vmem:[#allocation42_spill] sm:$0xff] %v3702_v38  ;;  %v819_v36 = vsub.f32 1.0, %v755_v10  ;;  %v626_v33 = vmax.f32 %v562_v28, 0.0  ;;  %v466_v56 = vsub.f32 %v3486_v55, %v3682_v22  ;;  %v350_v29 = vmul.f32 16.0, %v3702_v38 }
  0x97   : > { %5045 = vst [vmem:[#allocation43_spill] sm:$0xff] %v3704_v7  ;;  %v851_v47 = vsub.f32 1.0, %v787_v12  ;;  %v431_v1 = vsub.f32 %v3476_v48, %v3702_v38  ;;  %v366_v52 = vmul.f32 16.0, %v3704_v7  ;;  %v463_v5 = vsub.f32 %v3476_v48, %v3704_v7 }
  0x98   : > { %v883_v34 = vmax.f32 %v819_v36, 0.0  ;;  %v756_v14 = vand.u32 2147483647, %v692_v39  ;;  %v530_v17 = vand.u32 2147483647, %v466_v56  ;;  %v3716_v32 = vsub.f32 %v190_v63, %v350_v29 }
  0x99   : > { %v915_v21 = vmax.f32 %v851_v47, 0.0  ;;  %v495_v11 = vand.u32 2147483647, %v431_v1  ;;  %v3718_v10 = vsub.f32 %v206_v35, %v366_v52  ;;  %v527_v28 = vand.u32 2147483647, %v463_v5 }
  0x9a   : > { %5046 = vst [vmem:[#allocation44_spill] sm:$0xff] %v3716_v32  ;;  %v947_v45 = vmul.f32 %v883_v34, %v625_v0  ;;  %v820_v12 = vsub.f32 1.0, %v756_v14  ;;  %v594_v22 = vsub.f32 1.0, %v530_v17  ;;  %v689_v36 = vsub.f32 %v3500_v62, %v3716_v32 }
  0x9b   : > { %5047 = vst [vmem:[#allocation45_spill] sm:$0xff] %v3718_v10  ;;  %v979_v59 = vmul.f32 %v915_v21, %v657_v54  ;;  %v559_v16 = vsub.f32 1.0, %v495_v11  ;;  %v721_v26 = vsub.f32 %v3500_v62, %v3718_v10  ;;  %v591_v39 = vsub.f32 1.0, %v527_v28 }
  0x9c   : > { %1002 = vmatpush.msra.mxu0 %v947_v45  ;;  %v884_v56 = vmax.f32 %v820_v12, 0.0  ;;  %v658_v63 = vmax.f32 %v594_v22, 0.0  ;;  %v724_v35 = vsub.f32 %v3510_v6, %v3696_v51  ;;  %v753_v47 = vand.u32 2147483647, %v689_v36 }
  0x9d   : > { %1022 = vmatpush.msra.mxu1 %v979_v59  ;;  %v623_v0 = vmax.f32 %v559_v16, 0.0  ;;  %v785_v29 = vand.u32 2147483647, %v721_v26  ;;  %v157_v54 = vadd.s32 48, %v3430_v2  ;;  %v655_v1 = vmax.f32 %v591_v39, 0.0 }
  0x9e   : > { %v948_v52 = vmul.f32 %v884_v56, %v626_v33  ;;  %v788_v34 = vand.u32 2147483647, %v724_v35  ;;  %v173_v5 = vadd.s32 176, %v3430_v2  ;;  %v817_v14 = vsub.f32 1.0, %v753_v47 }
  0x9f   : > { %v849_v17 = vsub.f32 1.0, %v785_v29  ;;  %v189_v21 = vcvt.s32.f32 %v157_v54  ;;  %v432_v22 = vsub.f32 %v3486_v55, %v3702_v38  ;;  %v690_v16 = vsub.f32 %v3510_v6, %v3716_v32 }
  0xa0   : > { %1042 = vmatpush.msra.mxu2 %v948_v52  ;;  %v852_v11 = vsub.f32 1.0, %v788_v34  ;;  %v205_v45 = vcvt.s32.f32 %v173_v5  ;;  %v464_v26 = vsub.f32 %v3486_v55, %v3704_v7  ;;  %v881_v59 = vmax.f32 %v817_v14, 0.0 }
  0xa1   : > { %v913_v33 = vmax.f32 %v849_v17, 0.0  ;;  %v253_v28 = vadd.f32 0.5, %v189_v21  ;;  %v496_v12 = vand.u32 2147483647, %v432_v22  ;;  %v754_v56 = vand.u32 2147483647, %v690_v16 }
  0xa2   : > { %v916_v36 = vmax.f32 %v852_v11, 0.0  ;;  %v269_v39 = vadd.f32 0.5, %v205_v45  ;;  %v528_v35 = vand.u32 2147483647, %v464_v26  ;;  %v945_v47 = vmul.f32 %v881_v59, %v623_v0 }
  0xa3   : > { %v977_v29 = vmul.f32 %v913_v33, %v655_v1  ;;  %v285_v54 = vmul.f32 0.0625, %v253_v28  ;;  %v560_v52 = vsub.f32 1.0, %v496_v12  ;;  %v818_v38 = vsub.f32 1.0, %v754_v56 }
  0xa4   : > { %v980_v34 = vmul.f32 %v916_v36, %v658_v63  ;;  %v301_v5 = vmul.f32 0.0625, %v269_v39  ;;  %v592_v51 = vsub.f32 1.0, %v528_v35  ;;  %1003 = vmatpush.msra.mxu0 %v945_v47  ;;  %v722_v17 = vsub.f32 %v3510_v6, %v3718_v10 }
  0xa5   : > { %1023 = vmatpush.msra.mxu1 %v977_v29  ;;  %v3734_v32 = vfloor.f32 %v285_v54  ;;  %v624_v14 = vmax.f32 %v560_v52, 0.0  ;;  %v156_v22 = vadd.s32 40, %v3430_v2  ;;  %v882_v0 = vmax.f32 %v818_v38, 0.0 }
  0xa6   : > { %1062 = vmatpush.msra.mxu3 %v980_v34  ;;  %v3739_v11 = vfloor.f32 %v301_v5  ;;  %v656_v1 = vmax.f32 %v592_v51, 0.0  ;;  %v172_v63 = vadd.s32 168, %v3430_v2  ;;  %v786_v59 = vand.u32 2147483647, %v722_v17 }
  0xa7   : > { %5048 = vst [vmem:[#allocation46_spill] sm:$0xff] %v3734_v32  ;;  %v349_v16 = vmul.f32 16.0, %v3734_v32  ;;  %v429_v26 = vsub.f32 %v3476_v48, %v3734_v32  ;;  %v188_v33 = vcvt.s32.f32 %v156_v22  ;;  %v946_v36 = vmul.f32 %v882_v0, %v624_v14 }
  0xa8   : > { %5049 = vst [vmem:[#allocation47_spill] sm:$0xff] %v3739_v11  ;;  %v365_v28 = vmul.f32 16.0, %v3739_v11  ;;  %v461_v12 = vsub.f32 %v3476_v48, %v3739_v11  ;;  %v204_v39 = vcvt.s32.f32 %v172_v63  ;;  %v850_v51 = vsub.f32 1.0, %v786_v59 }
  0xa9   : > { %v3748_v56 = vsub.f32 %v189_v21, %v349_v16  ;;  %v493_v38 = vand.u32 2147483647, %v429_v26  ;;  %v252_v35 = vadd.f32 0.5, %v188_v33  ;;  %1043 = vmatpush.msra.mxu2 %v946_v36  ;;  %v430_v52 = vsub.f32 %v3486_v55, %v3734_v32 }
  0xaa   : > { %v3750_v47 = vsub.f32 %v205_v45, %v365_v28  ;;  %v525_v29 = vand.u32 2147483647, %v461_v12  ;;  %v268_v54 = vadd.f32 0.5, %v204_v39  ;;  %v914_v17 = vmax.f32 %v850_v51, 0.0 }
  0xab   : > { %5050 = vst [vmem:[#allocation48_spill] sm:$0xff] %v3748_v56  ;;  %v557_v34 = vsub.f32 1.0, %v493_v38  ;;  %v687_v5 = vsub.f32 %v3500_v62, %v3748_v56  ;;  %v284_v14 = vmul.f32 0.0625, %v252_v35  ;;  %v494_v63 = vand.u32 2147483647, %v430_v52 }
  0xac   : > { %5051 = vst [vmem:[#allocation49_spill] sm:$0xff] %v3750_v47  ;;  %v589_v22 = vsub.f32 1.0, %v525_v29  ;;  %v719_v21 = vsub.f32 %v3500_v62, %v3750_v47  ;;  %v300_v0 = vmul.f32 0.0625, %v268_v54  ;;  %v978_v26 = vmul.f32 %v914_v17, %v656_v1 }
  0xad   : > { %v621_v45 = vmax.f32 %v557_v34, 0.0  ;;  %v751_v16 = vand.u32 2147483647, %v687_v5  ;;  %v3758_v59 = vfloor.f32 %v284_v14  ;;  %v558_v38 = vsub.f32 1.0, %v494_v63 }
  0xae   : > { %v653_v28 = vmax.f32 %v589_v22, 0.0  ;;  %v783_v12 = vand.u32 2147483647, %v719_v21  ;;  %v3760_v36 = vfloor.f32 %v300_v0  ;;  %1063 = vmatpush.msra.mxu3 %v978_v26  ;;  %v688_v29 = vsub.f32 %v3510_v6, %v3748_v56 }
  0xaf   : > { %5052 = vst [vmem:[#allocation50_spill] sm:$0xff] %v3758_v59  ;;  %v815_v32 = vsub.f32 1.0, %v751_v16  ;;  %v348_v51 = vmul.f32 16.0, %v3758_v59  ;;  %v427_v35 = vsub.f32 %v3476_v48, %v3758_v59  ;;  %v622_v34 = vmax.f32 %v558_v38, 0.0 }
  0xb0   : > { %5053 = vst [vmem:[#allocation51_spill] sm:$0xff] %v3760_v36  ;;  %v847_v54 = vsub.f32 1.0, %v783_v12  ;;  %v364_v1 = vmul.f32 16.0, %v3760_v36  ;;  %v459_v52 = vsub.f32 %v3476_v48, %v3760_v36  ;;  %v752_v22 = vand.u32 2147483647, %v688_v29 }
  0xb1   : > { %v879_v5 = vmax.f32 %v815_v32, 0.0  ;;  %v3770_v17 = vsub.f32 %v188_v33, %v348_v51  ;;  %v491_v14 = vand.u32 2147483647, %v427_v35  ;;  %v462_v16 = vsub.f32 %v3486_v55, %v3739_v11 }
  0xb2   : > { %v911_v21 = vmax.f32 %v847_v54, 0.0  ;;  %v3772_v0 = vsub.f32 %v204_v39, %v364_v1  ;;  %v523_v63 = vand.u32 2147483647, %v459_v52  ;;  %v816_v10 = vsub.f32 1.0, %v752_v22 }
  0xb3   : > { %5054 = vst [vmem:[#allocation52_spill] sm:$0xff] %v3770_v17  ;;  %v943_v26 = vmul.f32 %v879_v5, %v621_v45  ;;  %v555_v12 = vsub.f32 1.0, %v491_v14  ;;  %v685_v56 = vsub.f32 %v3500_v62, %v3770_v17  ;;  %v526_v33 = vand.u32 2147483647, %v462_v16 }
  0xb4   : > { %5055 = vst [vmem:[#allocation53_spill] sm:$0xff] %v3772_v0  ;;  %v975_v7 = vmul.f32 %v911_v21, %v653_v28  ;;  %v587_v38 = vsub.f32 1.0, %v523_v63  ;;  %v717_v32 = vsub.f32 %v3500_v62, %v3772_v0  ;;  %v880_v35 = vmax.f32 %v816_v10, 0.0 }
  0xb5   : > { %1004 = vmatpush.msra.mxu0 %v943_v26  ;;  %v619_v51 = vmax.f32 %v555_v12, 0.0  ;;  %v749_v39 = vand.u32 2147483647, %v685_v56  ;;  %v720_v29 = vsub.f32 %v3510_v6, %v3750_v47  ;;  %v590_v1 = vsub.f32 1.0, %v526_v33 }
  0xb6   : > { %1024 = vmatpush.msra.mxu1 %v975_v7  ;;  %v651_v45 = vmax.f32 %v587_v38, 0.0  ;;  %v781_v54 = vand.u32 2147483647, %v717_v32  ;;  %v155_v52 = vadd.s32 32, %v3430_v2  ;;  %v944_v28 = vmul.f32 %v880_v35, %v622_v34 }
  0xb7   : > { %v813_v5 = vsub.f32 1.0, %v749_v39  ;;  %v784_v14 = vand.u32 2147483647, %v720_v29  ;;  %v171_v22 = vadd.s32 160, %v3430_v2  ;;  %v654_v63 = vmax.f32 %v590_v1, 0.0 }
  0xb8   : > { %v845_v21 = vsub.f32 1.0, %v781_v54  ;;  %v187_v16 = vcvt.s32.f32 %v155_v52  ;;  %v428_v10 = vsub.f32 %v3486_v55, %v3758_v59  ;;  %1044 = vmatpush.msra.mxu2 %v944_v28  ;;  %v686_v12 = vsub.f32 %v3510_v6, %v3770_v17 }
  0xb9   : > { %v877_v56 = vmax.f32 %v813_v5, 0.0  ;;  %v848_v26 = vsub.f32 1.0, %v784_v14  ;;  %v203_v7 = vcvt.s32.f32 %v171_v22  ;;  %v460_v34 = vsub.f32 %v3486_v55, %v3760_v36 }
  0xba   : > { %v909_v38 = vmax.f32 %v845_v21, 0.0  ;;  %v251_v32 = vadd.f32 0.5, %v187_v16  ;;  %v492_v33 = vand.u32 2147483647, %v428_v10  ;;  %v750_v54 = vand.u32 2147483647, %v686_v12 }
  0xbb   : > { %v941_v39 = vmul.f32 %v877_v56, %v619_v51  ;;  %v912_v35 = vmax.f32 %v848_v26, 0.0  ;;  %v267_v29 = vadd.f32 0.5, %v203_v7  ;;  %v524_v5 = vand.u32 2147483647, %v460_v34 }
  0xbc   : > { %v973_v1 = vmul.f32 %v909_v38, %v651_v45  ;;  %v283_v52 = vmul.f32 0.0625, %v251_v32  ;;  %v556_v59 = vsub.f32 1.0, %v492_v33  ;;  %v814_v22 = vsub.f32 1.0, %v750_v54 }
  0xbd   : > { %1005 = vmatpush.msra.mxu0 %v941_v39  ;;  %v976_v28 = vmul.f32 %v912_v35, %v654_v63  ;;  %v299_v14 = vmul.f32 0.0625, %v267_v29  ;;  %v718_v21 = vsub.f32 %v3510_v6, %v3772_v0  ;;  %v588_v36 = vsub.f32 1.0, %v524_v5 }
  0xbe   : > { %1025 = vmatpush.msra.mxu1 %v973_v1  ;;  %v3792_v10 = vfloor.f32 %v283_v52  ;;  %v620_v17 = vmax.f32 %v556_v59, 0.0  ;;  %v154_v51 = vadd.s32 24, %v3430_v2  ;;  %v878_v45 = vmax.f32 %v814_v22, 0.0 }
  0xbf   : > { %1064 = vmatpush.msra.mxu3 %v976_v28  ;;  %v3795_v56 = vfloor.f32 %v299_v14  ;;  %v782_v26 = vand.u32 2147483647, %v718_v21  ;;  %v170_v12 = vadd.s32 152, %v3430_v2  ;;  %v652_v32 = vmax.f32 %v588_v36, 0.0 }
  0xc0   : > { %5056 = vst [vmem:[#allocation54_spill] sm:$0xff] %v3792_v10  ;;  %v347_v63 = vmul.f32 16.0, %v3792_v10  ;;  %v425_v38 = vsub.f32 %v3476_v48, %v3792_v10  ;;  %v186_v33 = vcvt.s32.f32 %v154_v51  ;;  %v942_v39 = vmul.f32 %v878_v45, %v620_v17 }
  0xc1   : > { %5057 = vst [vmem:[#allocation55_spill] sm:$0xff] %v3795_v56  ;;  %v363_v34 = vmul.f32 16.0, %v3795_v56  ;;  %v457_v59 = vsub.f32 %v3476_v48, %v3795_v56  ;;  %v846_v35 = vsub.f32 1.0, %v782_v26  ;;  %v202_v52 = vcvt.s32.f32 %v170_v12 }
  0xc2   : > { %v3804_v29 = vsub.f32 %v187_v16, %v347_v63  ;;  %v489_v54 = vand.u32 2147483647, %v425_v38  ;;  %v250_v1 = vadd.f32 0.5, %v186_v33  ;;  %1045 = vmatpush.msra.mxu2 %v942_v39  ;;  %v426_v36 = vsub.f32 %v3486_v55, %v3792_v10 }
  0xc3   : > { %v3806_v5 = vsub.f32 %v203_v7, %v363_v34  ;;  %v521_v28 = vand.u32 2147483647, %v457_v59  ;;  %v910_v14 = vmax.f32 %v846_v35, 0.0  ;;  %v266_v17 = vadd.f32 0.5, %v202_v52 }
  0xc4   : > { %5058 = vst [vmem:[#allocation56_spill] sm:$0xff] %v3804_v29  ;;  %v553_v22 = vsub.f32 1.0, %v489_v54  ;;  %v683_v21 = vsub.f32 %v3500_v62, %v3804_v29  ;;  %v282_v51 = vmul.f32 0.0625, %v250_v1  ;;  %v490_v12 = vand.u32 2147483647, %v426_v36 }
  0xc5   : > { %5059 = vst [vmem:[#allocation57_spill] sm:$0xff] %v3806_v5  ;;  %v585_v45 = vsub.f32 1.0, %v521_v28  ;;  %v715_v16 = vsub.f32 %v3500_v62, %v3806_v5  ;;  %v974_v26 = vmul.f32 %v910_v14, %v652_v32  ;;  %v298_v34 = vmul.f32 0.0625, %v266_v17 }
  0xc6   : > { %v617_v7 = vmax.f32 %v553_v22, 0.0  ;;  %v747_v63 = vand.u32 2147483647, %v683_v21  ;;  %v3814_v38 = vfloor.f32 %v282_v51  ;;  %v554_v35 = vsub.f32 1.0, %v490_v12 }
  0xc7   : > { %v649_v59 = vmax.f32 %v585_v45, 0.0  ;;  %v779_v39 = vand.u32 2147483647, %v715_v16  ;;  %1065 = vmatpush.msra.mxu3 %v974_v26  ;;  %v684_v54 = vsub.f32 %v3510_v6, %v3804_v29  ;;  %v3821_v32 = vfloor.f32 %v298_v34 }
  0xc8   : > { %5060 = vst [vmem:[#allocation58_spill] sm:$0xff] %v3814_v38  ;;  %v811_v1 = vsub.f32 1.0, %v747_v63  ;;  %v346_v28 = vmul.f32 16.0, %v3814_v38  ;;  %v423_v10 = vsub.f32 %v3476_v48, %v3814_v38  ;;  %v618_v36 = vmax.f32 %v554_v35, 0.0 }
  0xc9   : > { %5061 = vst [vmem:[#allocation59_spill] sm:$0xff] %v3821_v32  ;;  %v843_v14 = vsub.f32 1.0, %v779_v39  ;;  %v748_v22 = vand.u32 2147483647, %v684_v54  ;;  %v458_v21 = vsub.f32 %v3486_v55, %v3795_v56  ;;  %v362_v16 = vmul.f32 16.0, %v3821_v32 }
  0xca   : > { %v875_v51 = vmax.f32 %v811_v1, 0.0  ;;  %v3825_v17 = vsub.f32 %v186_v33, %v346_v28  ;;  %v487_v45 = vand.u32 2147483647, %v423_v10  ;;  %v455_v12 = vsub.f32 %v3476_v48, %v3821_v32 }
  0xcb   : > { %v907_v26 = vmax.f32 %v843_v14, 0.0  ;;  %v812_v63 = vsub.f32 1.0, %v748_v22  ;;  %v522_v29 = vand.u32 2147483647, %v458_v21  ;;  %v3832_v35 = vsub.f32 %v202_v52, %v362_v16 }
  0xcc   : > { %5062 = vst [vmem:[#allocation60_spill] sm:$0xff] %v3825_v17  ;;  %v939_v34 = vmul.f32 %v875_v51, %v617_v7  ;;  %v551_v0 = vsub.f32 1.0, %v487_v45  ;;  %v681_v39 = vsub.f32 %v3500_v62, %v3825_v17  ;;  %v519_v1 = vand.u32 2147483647, %v455_v12 }
  0xcd   : > { %5063 = vst [vmem:[#allocation61_spill] sm:$0xff] %v3832_v35  ;;  %v971_v54 = vmul.f32 %v907_v26, %v649_v59  ;;  %v876_v33 = vmax.f32 %v812_v63, 0.0  ;;  %v586_v28 = vsub.f32 1.0, %v522_v29  ;;  %v713_v14 = vsub.f32 %v3500_v62, %v3832_v35 }
  0xce   : > { %1006 = vmatpush.msra.mxu0 %v939_v34  ;;  %v615_v10 = vmax.f32 %v551_v0, 0.0  ;;  %v745_v56 = vand.u32 2147483647, %v681_v39  ;;  %v716_v22 = vsub.f32 %v3510_v6, %v3806_v5  ;;  %v583_v7 = vsub.f32 1.0, %v519_v1 }
  0xcf   : > { %1026 = vmatpush.msra.mxu1 %v971_v54  ;;  %v940_v21 = vmul.f32 %v876_v33, %v618_v36  ;;  %v650_v51 = vmax.f32 %v586_v28, 0.0  ;;  %v153_v52 = vadd.s32 16, %v3430_v2  ;;  %v777_v59 = vand.u32 2147483647, %v713_v14 }
  0xd0   : > { %v809_v45 = vsub.f32 1.0, %v745_v56  ;;  %v780_v16 = vand.u32 2147483647, %v716_v22  ;;  %v169_v29 = vadd.s32 144, %v3430_v2  ;;  %v647_v26 = vmax.f32 %v583_v7, 0.0 }
  0xd1   : > { %1046 = vmatpush.msra.mxu2 %v940_v21  ;;  %v185_v0 = vcvt.s32.f32 %v153_v52  ;;  %v424_v12 = vsub.f32 %v3486_v55, %v3814_v38  ;;  %v682_v63 = vsub.f32 %v3510_v6, %v3825_v17  ;;  %v841_v39 = vsub.f32 1.0, %v777_v59 }
  0xd2   : > { %v873_v34 = vmax.f32 %v809_v45, 0.0  ;;  %v844_v36 = vsub.f32 1.0, %v780_v16  ;;  %v201_v54 = vcvt.s32.f32 %v169_v29  ;;  %v456_v28 = vsub.f32 %v3486_v55, %v3821_v32 }
  0xd3   : > { %v249_v1 = vadd.f32 0.5, %v185_v0  ;;  %v488_v33 = vand.u32 2147483647, %v424_v12  ;;  %v746_v56 = vand.u32 2147483647, %v682_v63  ;;  %v905_v22 = vmax.f32 %v841_v39, 0.0 }
  0xd4   : > { %v937_v14 = vmul.f32 %v873_v34, %v615_v10  ;;  %v908_v7 = vmax.f32 %v844_v36, 0.0  ;;  %v265_v21 = vadd.f32 0.5, %v201_v54  ;;  %v520_v47 = vand.u32 2147483647, %v456_v28 }
  0xd5   : > { %v281_v52 = vmul.f32 0.0625, %v249_v1  ;;  %v552_v5 = vsub.f32 1.0, %v488_v33  ;;  %v810_v38 = vsub.f32 1.0, %v746_v56  ;;  %v969_v17 = vmul.f32 %v905_v22, %v647_v26 }
  0xd6   : > { %1007 = vmatpush.msra.mxu0 %v937_v14  ;;  %v972_v45 = vmul.f32 %v908_v7, %v650_v51  ;;  %v297_v59 = vmul.f32 0.0625, %v265_v21  ;;  %v714_v16 = vsub.f32 %v3510_v6, %v3832_v35  ;;  %v584_v32 = vsub.f32 1.0, %v520_v47 }
  0xd7   : > { %v3848_v29 = vfloor.f32 %v281_v52  ;;  %v616_v12 = vmax.f32 %v552_v5, 0.0  ;;  %v874_v63 = vmax.f32 %v810_v38, 0.0  ;;  %1027 = vmatpush.msra.mxu1 %v969_v17  ;;  %v152_v39 = vadd.s32 8, %v3430_v2 }
  0xd8   : > { %1066 = vmatpush.msra.mxu3 %v972_v45  ;;  %v3850_v10 = vfloor.f32 %v297_v59  ;;  %v778_v34 = vand.u32 2147483647, %v714_v16  ;;  %v168_v36 = vadd.s32 136, %v3430_v2  ;;  %v648_v33 = vmax.f32 %v584_v32, 0.0 }
  0xd9   : > { %5064 = vst [vmem:[#allocation62_spill] sm:$0xff] %v3848_v29  ;;  %v345_v51 = vmul.f32 16.0, %v3848_v29  ;;  %v421_v26 = vsub.f32 %v3476_v48, %v3848_v29  ;;  %v938_v1 = vmul.f32 %v874_v63, %v616_v12  ;;  %v184_v17 = vcvt.s32.f32 %v152_v39 }
  0xda   : > { %5065 = vst [vmem:[#allocation63_spill] sm:$0xff] %v3850_v10  ;;  %v361_v5 = vmul.f32 16.0, %v3850_v10  ;;  %v453_v47 = vsub.f32 %v3476_v48, %v3850_v10  ;;  %v842_v38 = vsub.f32 1.0, %v778_v34  ;;  %v200_v14 = vcvt.s32.f32 %v168_v36 }
  0xdb   : > { %v3860_v56 = vsub.f32 %v185_v0, %v345_v51  ;;  %v485_v28 = vand.u32 2147483647, %v421_v26  ;;  %1047 = vmatpush.msra.mxu2 %v938_v1  ;;  %v422_v22 = vsub.f32 %v3486_v55, %v3848_v29  ;;  %v248_v32 = vadd.f32 0.5, %v184_v17 }
  0xdc   : > { %v3864_v7 = vsub.f32 %v201_v54, %v361_v5  ;;  %v517_v21 = vand.u32 2147483647, %v453_v47  ;;  %v906_v52 = vmax.f32 %v842_v38, 0.0  ;;  %v264_v16 = vadd.f32 0.5, %v200_v14 }
  0xdd   : > { %5066 = vst [vmem:[#allocation64_spill] sm:$0xff] %v3860_v56  ;;  %v549_v45 = vsub.f32 1.0, %v485_v28  ;;  %v679_v59 = vsub.f32 %v3500_v62, %v3860_v56  ;;  %v486_v12 = vand.u32 2147483647, %v422_v22  ;;  %v280_v39 = vmul.f32 0.0625, %v248_v32 }
  0xde   : > { %5067 = vst [vmem:[#allocation65_spill] sm:$0xff] %v3864_v7  ;;  %v581_v63 = vsub.f32 1.0, %v517_v21  ;;  %v711_v0 = vsub.f32 %v3500_v62, %v3864_v7  ;;  %v970_v34 = vmul.f32 %v906_v52, %v648_v33  ;;  %v296_v26 = vmul.f32 0.0625, %v264_v16 }
  0xdf   : > { %v613_v36 = vmax.f32 %v549_v45, 0.0  ;;  %v743_v51 = vand.u32 2147483647, %v679_v59  ;;  %v550_v54 = vsub.f32 1.0, %v486_v12  ;;  %v3870_v47 = vfloor.f32 %v280_v39 }
  0xe0   : > { %v645_v1 = vmax.f32 %v581_v63, 0.0  ;;  %v775_v5 = vand.u32 2147483647, %v711_v0  ;;  %1067 = vmatpush.msra.mxu3 %v970_v34  ;;  %v680_v38 = vsub.f32 %v3510_v6, %v3860_v56  ;;  %v3874_v22 = vfloor.f32 %v296_v26 }
  0xe1   : > { %5068 = vst [vmem:[#allocation66_spill] sm:$0xff] %v3870_v47  ;;  %v807_v28 = vsub.f32 1.0, %v743_v51  ;;  %v614_v21 = vmax.f32 %v550_v54, 0.0  ;;  %v454_v33 = vsub.f32 %v3486_v55, %v3850_v10  ;;  %v344_v32 = vmul.f32 16.0, %v3870_v47 }
  0xe2   : > { %5069 = vst [vmem:[#allocation67_spill] sm:$0xff] %v3874_v22  ;;  %v839_v52 = vsub.f32 1.0, %v775_v5  ;;  %v419_v45 = vsub.f32 %v3476_v48, %v3870_v47  ;;  %v744_v59 = vand.u32 2147483647, %v680_v38  ;;  %v360_v12 = vmul.f32 16.0, %v3874_v22 }
  0xe3   : > { %v871_v16 = vmax.f32 %v807_v28, 0.0  ;;  %v451_v63 = vsub.f32 %v3476_v48, %v3874_v22  ;;  %v518_v0 = vand.u32 2147483647, %v454_v33  ;;  %v3884_v39 = vsub.f32 %v184_v17, %v344_v32 }
  0xe4   : > { %v903_v34 = vmax.f32 %v839_v52, 0.0  ;;  %v483_v51 = vand.u32 2147483647, %v419_v45  ;;  %v808_v26 = vsub.f32 1.0, %v744_v59  ;;  %v3886_v5 = vsub.f32 %v200_v14, %v360_v12 }
  0xe5   : > { %5070 = vst [vmem:[#allocation68_spill] sm:$0xff] %v3884_v39  ;;  %v935_v54 = vmul.f32 %v871_v16, %v613_v36  ;;  %v515_v10 = vand.u32 2147483647, %v451_v63  ;;  %v582_v56 = vsub.f32 1.0, %v518_v0  ;;  %v677_v38 = vsub.f32 %v3500_v62, %v3884_v39 }
  0xe6   : > { %5071 = vst [vmem:[#allocation69_spill] sm:$0xff] %v3886_v5  ;;  %v967_v29 = vmul.f32 %v903_v34, %v645_v1  ;;  %v547_v35 = vsub.f32 1.0, %v483_v51  ;;  %v872_v28 = vmax.f32 %v808_v26, 0.0  ;;  %v709_v33 = vsub.f32 %v3500_v62, %v3886_v5 }
  0xe7   : > { %1008 = vmatpush.msra.mxu0 %v935_v54  ;;  %v579_v11 = vsub.f32 1.0, %v515_v10  ;;  %v646_v17 = vmax.f32 %v582_v56, 0.0  ;;  %v712_v52 = vsub.f32 %v3510_v6, %v3864_v7  ;;  %v741_v36 = vand.u32 2147483647, %v677_v38 }
  0xe8   : > { %1028 = vmatpush.msra.mxu1 %v967_v29  ;;  %v611_v14 = vmax.f32 %v547_v35, 0.0  ;;  %v936_v32 = vmul.f32 %v872_v28, %v614_v21  ;;  %v183_v1 = vcvt.s32.f32 %v3430_v2  ;;  %v773_v59 = vand.u32 2147483647, %v709_v33 }
  0xe9   : > { %v643_v45 = vmax.f32 %v579_v11, 0.0  ;;  %v776_v16 = vand.u32 2147483647, %v712_v52  ;;  %v167_v12 = vadd.s32 128, %v3430_v2  ;;  %v805_v63 = vsub.f32 1.0, %v741_v36 }
  0xea   : > { %1048 = vmatpush.msra.mxu2 %v936_v32  ;;  %v247_v10 = vadd.f32 0.5, %v183_v1  ;;  %v420_v56 = vsub.f32 %v3486_v55, %v3870_v47  ;;  %v678_v0 = vsub.f32 %v3510_v6, %v3884_v39  ;;  %v837_v29 = vsub.f32 1.0, %v773_v59 }
  0xeb   : > { %v840_v35 = vsub.f32 1.0, %v776_v16  ;;  %v199_v34 = vcvt.s32.f32 %v167_v12  ;;  %v452_v21 = vsub.f32 %v3486_v55, %v3874_v22  ;;  %v869_v11 = vmax.f32 %v805_v63, 0.0 }
  0xec   : > { %v279_v51 = vmul.f32 0.0625, %v247_v10  ;;  %v484_v26 = vand.u32 2147483647, %v420_v56  ;;  %v742_v54 = vand.u32 2147483647, %v678_v0  ;;  %v901_v2 = vmax.f32 %v837_v29, 0.0 }
  0xed   : > { %v904_v38 = vmax.f32 %v840_v35, 0.0  ;;  %v263_v28 = vadd.f32 0.5, %v199_v34  ;;  %v516_v33 = vand.u32 2147483647, %v452_v21  ;;  %v933_v52 = vmul.f32 %v869_v11, %v611_v14 }
  0xee   : > { %v3902_v36 = vfloor.f32 %v279_v51  ;;  %v548_v32 = vsub.f32 1.0, %v484_v26  ;;  %v806_v47 = vsub.f32 1.0, %v742_v54  ;;  %v965_v39 = vmul.f32 %v901_v2, %v643_v45 }
  0xef   : > { %v968_v59 = vmul.f32 %v904_v38, %v646_v17  ;;  %v295_v16 = vmul.f32 0.0625, %v263_v28  ;;  %v580_v12 = vsub.f32 1.0, %v516_v33  ;;  %1009 = vmatpush.msra.mxu0 %v933_v52  ;;  %v710_v14 = vsub.f32 %v3510_v6, %v3886_v5 }
  0xf0   : > { %5072 = vst [vmem:[#allocation70_spill] sm:$0xff] %v3902_v36  ;;  %v343_v22 = vmul.f32 16.0, %v3902_v36  ;;  %v417_v63 = vsub.f32 %v3476_v48, %v3902_v36  ;;  %v612_v10 = vmax.f32 %v548_v32, 0.0  ;;  %v870_v56 = vmax.f32 %v806_v47, 0.0  ;;  %1029 = vmatpush.msra.mxu1 %v965_v39 }
  0xf1   : > { %1068 = vmatpush.msra.mxu3 %v968_v59  ;;  %v3907_v0 = vfloor.f32 %v295_v16  ;;  %v418_v17 = vsub.f32 %v3486_v55, %v3902_v36  ;;  %v644_v21 = vmax.f32 %v580_v12, 0.0  ;;  %v774_v39 = vand.u32 2147483647, %v710_v14 }
  0xf2   : > { %v3913_v45 = vsub.f32 %v183_v1, %v343_v22  ;;  %v481_v29 = vand.u32 2147483647, %v417_v63  ;;  %v934_v35 = vmul.f32 %v870_v56, %v612_v10 }
  0xf3   : > { %5073 = vst [vmem:[#allocation71_spill] sm:$0xff] %v3907_v0  ;;  %v359_v11 = vmul.f32 16.0, %v3907_v0  ;;  %v449_v47 = vsub.f32 %v3476_v48, %v3907_v0  ;;  %v482_v51 = vand.u32 2147483647, %v418_v17  ;;  %v450_v22 = vsub.f32 %v3486_v55, %v3907_v0 }
  0xf4   : > { %5074 = vst [vmem:[#allocation72_spill] sm:$0xff] %v3913_v45  ;;  %v545_v26 = vsub.f32 1.0, %v481_v29  ;;  %v675_v54 = vsub.f32 %v3500_v62, %v3913_v45  ;;  %1049 = vmatpush.msra.mxu2 %v934_v35  ;;  %v676_v2 = vsub.f32 %v3510_v6, %v3913_v45  ;;  %v838_v28 = vsub.f32 1.0, %v774_v39 }
  0xf5   : > { %v3924_v1 = vsub.f32 %v199_v34, %v359_v11  ;;  %v513_v38 = vand.u32 2147483647, %v449_v47  ;;  %v546_v33 = vsub.f32 1.0, %v482_v51  ;;  %v514_v14 = vand.u32 2147483647, %v450_v22 }
  0xf6   : > { %v609_v52 = vmax.f32 %v545_v26, 0.0  ;;  %v739_v48 = vand.u32 2147483647, %v675_v54  ;;  %v740_v32 = vand.u32 2147483647, %v676_v2  ;;  %v902_v12 = vmax.f32 %v838_v28, 0.0 }
  0xf7   : > { %5075 = vst [vmem:[#allocation73_spill] sm:$0xff] %v3924_v1  ;;  %v577_v59 = vsub.f32 1.0, %v513_v38  ;;  %v707_v16 = vsub.f32 %v3500_v62, %v3924_v1  ;;  %v610_v63 = vmax.f32 %v546_v33, 0.0  ;;  %v708_v55 = vsub.f32 %v3510_v6, %v3924_v1 }
  0xf8   : > { %v803_v10 = vsub.f32 1.0, %v739_v48  ;;  %v804_v56 = vsub.f32 1.0, %v740_v32  ;;  %v966_v17 = vmul.f32 %v902_v12, %v644_v21  ;;  %v578_v11 = vsub.f32 1.0, %v514_v14 }
  0xf9   : > { %v771_v34 = vand.u32 2147483647, %v707_v16  ;;  %v772_v47 = vand.u32 2147483647, %v708_v55  ;;  %v641_v39 = vmax.f32 %v577_v59, 0.0 }
  0xfa   : > { %v867_v29 = vmax.f32 %v803_v10, 0.0  ;;  %v868_v35 = vmax.f32 %v804_v56, 0.0  ;;  %1069 = vmatpush.msra.mxu3 %v966_v17  ;;  %v642_v62 = vmax.f32 %v578_v11, 0.0 }
  0xfb   : > { %v835_v51 = vsub.f32 1.0, %v771_v34  ;;  %v836_v2 = vsub.f32 1.0, %v772_v47 }
  0xfc   : > { %v931_v26 = vmul.f32 %v867_v29, %v609_v52  ;;  %v932_v54 = vmul.f32 %v868_v35, %v610_v63 }
  0xfd   : > { %v899_v38 = vmax.f32 %v835_v51, 0.0  ;;  %v900_v22 = vmax.f32 %v836_v2, 0.0 }
  0xfe   : > { %1010 = vmatpush.msra.mxu0 %v931_v26  ;;  %1050 = vmatpush.msra.mxu2 %v932_v54 }
  0xff   : > { %v963_v28 = vmul.f32 %v899_v38, %v641_v39  ;;  %1011 = vmatmul.f32.vlgmr.msra.gmra.mxu0 %v3444_v23  ;;  %1051 = vmatmul.f32.vlgmr.msra.gmra.mxu2 %v3444_v23  ;;  %v964_v6 = vmul.f32 %v900_v22, %v642_v62 }
 0x101   : > { %1030 = vmatpush.msra.mxu1 %v963_v28  ;;  %1070 = vmatpush.msra.mxu3 %v964_v6 }
 0x102   : > { %1031 = vmatmul.f32.vlgmr.msra.gmra.mxu1 %v3446_v24  ;;  %1071 = vmatmul.f32.vlgmr.msra.gmra.mxu3 %v3446_v24 }
 0x17c   : > { %v1012_v21 = vpop.f32.mrf.mxu0 }
 0x17f   : > { %v1032_v33 = vpop.f32.mrf.mxu1 }
 0x180   : > { %v1033_v52 = vadd.f32 %v1032_v33, %v1012_v21 }
 0x182   : > { %v3935_v48 = vadd.f32 %v1033_v52, %v3444_v23  ;;  %v1052_v16 = vpop.f32.mrf.mxu2 }
 0x184   : > { %v1077_v32 = vadd.f32 %v3935_v48, %v3448_v30  ;;  %v1079_v59 = vadd.f32 %v3935_v48, %v3472_v46 }
 0x185   : > { %v1072_v10 = vpop.f32.mrf.mxu3 }
 0x186   : > { %v3941_v12 = vperm.slane %v1077_v32, 0  ;;  %v3943_v63 = vperm.slane %v1079_v59, 1  ;;  %v1073_v56 = vadd.f32 %v1072_v10, %v1052_v16 }
 0x188   : > { %v1113_v14 = vsub.f32 %v3941_v12, %v3463_v41  ;;  %v1371_v23 = vsub.f32 %v3943_v63, %v3490_v57  ;;  %v1145_v55 = vsub.f32 %v3941_v12, %v3465_v42  ;;  %v1403_v34 = vsub.f32 %v3943_v63, %v3492_v58 }
 0x189   : > { %v3954_v17 = vadd.f32 %v1073_v56, %v3446_v24  ;;  %v1111_v29 = vsub.f32 %v3941_v12, %v3467_v43  ;;  %v1369_v35 = vsub.f32 %v3943_v63, %v3496_v60  ;;  %v1143_v11 = vsub.f32 %v3941_v12, %v3469_v44 }
 0x18a   : > { %v1177_v47 = vand.u32 2147483647, %v1113_v14  ;;  %v1435_v39 = vand.u32 2147483647, %v1371_v23  ;;  %v1209_v51 = vand.u32 2147483647, %v1145_v55  ;;  %v1401_v26 = vsub.f32 %v3943_v63, %v3504_v3 }
 0x18b   : > { %v1078_v54 = vadd.f32 %v3954_v17, %v3456_v37  ;;  %v1080_v24 = vadd.f32 %v3954_v17, %v3482_v53  ;;  %v1467_v62 = vand.u32 2147483647, %v1403_v34  ;;  %v1175_v2 = vand.u32 2147483647, %v1111_v29 }
 0x18c   : > { %v1241_v38 = vsub.f32 1.0, %v1177_v47  ;;  %v1499_v22 = vsub.f32 1.0, %v1435_v39  ;;  %v1273_v28 = vsub.f32 1.0, %v1209_v51  ;;  %v1433_v6 = vand.u32 2147483647, %v1369_v35 }
 0x18d   : > { %v3968_v21 = vperm.slane %v1078_v54, 0  ;;  %v3970_v33 = vperm.slane %v1080_v24, 1  ;;  %v1531_v52 = vsub.f32 1.0, %v1467_v62  ;;  %v1239_v32 = vsub.f32 1.0, %v1175_v2 }
 0x18e   : > { %v1305_v59 = vmax.f32 %v1241_v38, 0.0  ;;  %v1563_v16 = vmax.f32 %v1499_v22, 0.0  ;;  %v1337_v10 = vmax.f32 %v1273_v28, 0.0  ;;  %v1497_v56 = vsub.f32 1.0, %v1433_v6 }
 0x18f   : > { %v1595_v14 = vmax.f32 %v1531_v52, 0.0  ;;  %v1303_v23 = vmax.f32 %v1239_v32, 0.0  ;;  %v1207_v55 = vand.u32 2147483647, %v1143_v11  ;;  %v1465_v53 = vand.u32 2147483647, %v1401_v26 }
 0x190   : > { %v1627_v34 = vmul.f32 %v1563_v16, %v1305_v59  ;;  %v1561_v29 = vmax.f32 %v1497_v56, 0.0  ;;  %v1109_v47 = vsub.f32 %v3941_v12, %v3527_v8  ;;  %v1367_v35 = vsub.f32 %v3943_v63, %v3541_v27 }
 0x191   : > { %v1659_v39 = vmul.f32 %v1595_v14, %v1337_v10  ;;  %v1271_v51 = vsub.f32 1.0, %v1207_v55  ;;  %v1529_v54 = vsub.f32 1.0, %v1465_v53  ;;  %v1141_v24 = vsub.f32 %v3941_v12, %v3537_v40 }
 0x192   : > { %1661 = vmatpush.msrb.mxu0 %v1627_v34  ;;  %v1625_v62 = vmul.f32 %v1561_v29, %v1303_v23  ;;  %v1173_v2 = vand.u32 2147483647, %v1109_v47  ;;  %v1431_v38 = vand.u32 2147483647, %v1367_v35  ;;  %v1399_v11 = vsub.f32 %v3943_v63, %v3552_v9 }
 0x193   : > { %1681 = vmatpush.msrb.mxu1 %v1659_v39  ;;  %v1335_v26 = vmax.f32 %v1271_v51, 0.0  ;;  %v1593_v22 = vmax.f32 %v1529_v54, 0.0  ;;  %v1205_v28 = vand.u32 2147483647, %v1141_v24  ;;  %v1107_v6 = vsub.f32 %v3941_v12, %v3568_v19 }
 0x194   : > { %1662 = vmatpush.msrb.mxu0 %v1625_v62  ;;  %v1237_v52 = vsub.f32 1.0, %v1173_v2  ;;  %v1495_v53 = vsub.f32 1.0, %v1431_v38  ;;  %v1463_v32 = vand.u32 2147483647, %v1399_v11  ;;  %v1365_v59 = vsub.f32 %v3943_v63, %v3580_v4 }
 0x195   : > { %v1657_v16 = vmul.f32 %v1593_v22, %v1335_v26  ;;  %v1269_v10 = vsub.f32 1.0, %v1205_v28  ;;  %v1171_v56 = vand.u32 2147483647, %v1107_v6  ;;  %v1139_v14 = vsub.f32 %v3941_v12, %v3571_v50 }
 0x196   : > { %v1301_v23 = vmax.f32 %v1237_v52, 0.0  ;;  %v1559_v55 = vmax.f32 %v1495_v53, 0.0  ;;  %v1527_v34 = vsub.f32 1.0, %v1463_v32  ;;  %v1429_v29 = vand.u32 2147483647, %v1365_v59 }
 0x197   : > { %1682 = vmatpush.msrb.mxu1 %v1657_v16  ;;  %v1333_v47 = vmax.f32 %v1269_v10, 0.0  ;;  %v1235_v35 = vsub.f32 1.0, %v1171_v56  ;;  %v1203_v39 = vand.u32 2147483647, %v1139_v14  ;;  %v1397_v51 = vsub.f32 %v3943_v63, %v3582_v13 }
 0x198   : > { %v1623_v54 = vmul.f32 %v1559_v55, %v1301_v23  ;;  %v1591_v24 = vmax.f32 %v1527_v34, 0.0  ;;  %v1493_v62 = vsub.f32 1.0, %v1429_v29  ;;  %v1105_v2 = vsub.f32 %v3941_v12, %v3590_v31 }
 0x199   : > { %v1299_v38 = vmax.f32 %v1235_v35, 0.0  ;;  %v1267_v11 = vsub.f32 1.0, %v1203_v39  ;;  %v1461_v26 = vand.u32 2147483647, %v1397_v51  ;;  %v1363_v22 = vsub.f32 %v3943_v63, %v3601_v61 }
 0x19a   : > { %1663 = vmatpush.msrb.mxu0 %v1623_v54  ;;  %v1655_v28 = vmul.f32 %v1591_v24, %v1333_v47  ;;  %v1557_v6 = vmax.f32 %v1493_v62, 0.0  ;;  %v1169_v52 = vand.u32 2147483647, %v1105_v2  ;;  %v1137_v53 = vsub.f32 %v3941_v12, %v3597_v49 }
 0x19b   : > { %v1331_v32 = vmax.f32 %v1267_v11, 0.0  ;;  %v1525_v59 = vsub.f32 1.0, %v1461_v26  ;;  %v1427_v16 = vand.u32 2147483647, %v1363_v22  ;;  %v1395_v10 = vsub.f32 %v3943_v63, %v3608_v18 }
 0x19c   : > { %1683 = vmatpush.msrb.mxu1 %v1655_v28  ;;  %v1621_v56 = vmul.f32 %v1557_v6, %v1299_v38  ;;  %v1233_v14 = vsub.f32 1.0, %v1169_v52  ;;  %v1201_v23 = vand.u32 2147483647, %v1137_v53  ;;  %v1114_v55 = vsub.f32 %v3968_v21, %v3463_v41 }
 0x19d   : > { %v1589_v34 = vmax.f32 %v1525_v59, 0.0  ;;  %v1491_v29 = vsub.f32 1.0, %v1427_v16  ;;  %v1459_v47 = vand.u32 2147483647, %v1395_v10  ;;  %v1372_v35 = vsub.f32 %v3970_v33, %v3490_v57 }
 0x19e   : > { %1664 = vmatpush.msrb.mxu0 %v1621_v56  ;;  %v1297_v39 = vmax.f32 %v1233_v14, 0.0  ;;  %v1265_v51 = vsub.f32 1.0, %v1201_v23  ;;  %v1178_v54 = vand.u32 2147483647, %v1114_v55  ;;  %v1146_v24 = vsub.f32 %v3968_v21, %v3465_v42 }
 0x19f   : > { %v1653_v62 = vmul.f32 %v1589_v34, %v1331_v32  ;;  %v1555_v2 = vmax.f32 %v1491_v29, 0.0  ;;  %v1523_v38 = vsub.f32 1.0, %v1459_v47  ;;  %v1436_v11 = vand.u32 2147483647, %v1372_v35 }
 0x1a0   : > { %v1329_v26 = vmax.f32 %v1265_v51, 0.0  ;;  %v1242_v22 = vsub.f32 1.0, %v1178_v54  ;;  %v1210_v28 = vand.u32 2147483647, %v1146_v24  ;;  %v1404_v6 = vsub.f32 %v3970_v33, %v3492_v58  ;;  %v5076_v51 = vld [vmem:[#allocation33_spill] sm:$0xff] }
 0x1a1   : > { %1684 = vmatpush.msrb.mxu1 %v1653_v62  ;;  %v1619_v52 = vmul.f32 %v1555_v2, %v1297_v39  ;;  %v1587_v53 = vmax.f32 %v1523_v38, 0.0  ;;  %v1500_v59 = vsub.f32 1.0, %v1436_v11  ;;  %v1103_v16 = vsub.f32 %v3941_v12, %v3624_v15 }
 0x1a2   : > { %v1306_v10 = vmax.f32 %v1242_v22, 0.0  ;;  %v1274_v56 = vsub.f32 1.0, %v1210_v28  ;;  %v1468_v14 = vand.u32 2147483647, %v1404_v6  ;;  %v1361_v32 = vsub.f32 %v3943_v63, %v3636_v20 }
 0x1a3   : > { %1665 = vmatpush.msrb.mxu0 %v1619_v52  ;;  %v1651_v23 = vmul.f32 %v1587_v53, %v1329_v26  ;;  %v1564_v55 = vmax.f32 %v1500_v59, 0.0  ;;  %v1167_v34 = vand.u32 2147483647, %v1103_v16  ;;  %v1135_v29 = vsub.f32 %v3941_v12, %v3626_v25 }
 0x1a4   : > { %v1338_v47 = vmax.f32 %v1274_v56, 0.0  ;;  %v1532_v35 = vsub.f32 1.0, %v1468_v14  ;;  %v1425_v39 = vand.u32 2147483647, %v1361_v32  ;;  %v1393_v54 = vsub.f32 %v3943_v63, %v5076_v51 }
 0x1a5   : > { %1685 = vmatpush.msrb.mxu1 %v1651_v23  ;;  %v1628_v24 = vmul.f32 %v1564_v55, %v1306_v10  ;;  %v1231_v62 = vsub.f32 1.0, %v1167_v34  ;;  %v1199_v2 = vand.u32 2147483647, %v1135_v29  ;;  %v1112_v38 = vsub.f32 %v3968_v21, %v3467_v43 }
 0x1a6   : > { %v1596_v11 = vmax.f32 %v1532_v35, 0.0  ;;  %v1489_v26 = vsub.f32 1.0, %v1425_v39  ;;  %v1457_v22 = vand.u32 2147483647, %v1393_v54  ;;  %v1370_v28 = vsub.f32 %v3970_v33, %v3496_v60  ;;  %v5077_v54 = vld [vmem:[#allocation34_spill] sm:$0xff] }
 0x1a7   : > { %1701 = vmatpush.msrb.mxu2 %v1628_v24  ;;  %v1295_v6 = vmax.f32 %v1231_v62, 0.0  ;;  %v1263_v52 = vsub.f32 1.0, %v1199_v2  ;;  %v1176_v53 = vand.u32 2147483647, %v1112_v38  ;;  %v1144_v59 = vsub.f32 %v3968_v21, %v3469_v44 }
 0x1a8   : > { %v1660_v16 = vmul.f32 %v1596_v11, %v1338_v47  ;;  %v1553_v10 = vmax.f32 %v1489_v26, 0.0  ;;  %v1521_v56 = vsub.f32 1.0, %v1457_v22  ;;  %v1434_v14 = vand.u32 2147483647, %v1370_v28  ;;  %v5078_v47 = vld [vmem:[#allocation36_spill] sm:$0xff] }
 0x1a9   : > { %v1327_v32 = vmax.f32 %v1263_v52, 0.0  ;;  %v1240_v23 = vsub.f32 1.0, %v1176_v53  ;;  %v1208_v55 = vand.u32 2147483647, %v1144_v59  ;;  %v1402_v34 = vsub.f32 %v3970_v33, %v3504_v3  ;;  %v5079_v52 = vld [vmem:[#allocation35_spill] sm:$0xff] }
 0x1aa   : > { %1721 = vmatpush.msrb.mxu3 %v1660_v16  ;;  %v1617_v29 = vmul.f32 %v1553_v10, %v1295_v6  ;;  %v1585_v35 = vmax.f32 %v1521_v56, 0.0  ;;  %v1498_v39 = vsub.f32 1.0, %v1434_v14  ;;  %v1101_v24 = vsub.f32 %v3941_v12, %v5077_v54  ;;  %v5080_v10 = vld [vmem:[#allocation37_spill] sm:$0xff] }
 0x1ab   : > { %v1304_v62 = vmax.f32 %v1240_v23, 0.0  ;;  %v1272_v2 = vsub.f32 1.0, %v1208_v55  ;;  %v1466_v38 = vand.u32 2147483647, %v1402_v34  ;;  %v1359_v11 = vsub.f32 %v3943_v63, %v5078_v47 }
 0x1ac   : > { %1666 = vmatpush.msrb.mxu0 %v1617_v29  ;;  %v1649_v26 = vmul.f32 %v1585_v35, %v1327_v32  ;;  %v1562_v22 = vmax.f32 %v1498_v39, 0.0  ;;  %v1165_v28 = vand.u32 2147483647, %v1101_v24  ;;  %v1133_v53 = vsub.f32 %v3941_v12, %v5079_v52 }
 0x1ad   : > { %v1336_v59 = vmax.f32 %v1272_v2, 0.0  ;;  %v1530_v6 = vsub.f32 1.0, %v1466_v38  ;;  %v1423_v16 = vand.u32 2147483647, %v1359_v11  ;;  %v1391_v56 = vsub.f32 %v3943_v63, %v5080_v10 }
 0x1ae   : > { %1686 = vmatpush.msrb.mxu1 %v1649_v26  ;;  %v1626_v14 = vmul.f32 %v1562_v22, %v1304_v62  ;;  %v1229_v23 = vsub.f32 1.0, %v1165_v28  ;;  %v1197_v55 = vand.u32 2147483647, %v1133_v53  ;;  %v1110_v34 = vsub.f32 %v3968_v21, %v3527_v8 }
 0x1af   : > { %v1594_v29 = vmax.f32 %v1530_v6, 0.0  ;;  %v1487_v32 = vsub.f32 1.0, %v1423_v16  ;;  %v1455_v35 = vand.u32 2147483647, %v1391_v56  ;;  %v1368_v39 = vsub.f32 %v3970_v33, %v3541_v27 }
 0x1b0   : > { %1702 = vmatpush.msrb.mxu2 %v1626_v14  ;;  %v1293_v24 = vmax.f32 %v1229_v23, 0.0  ;;  %v1261_v2 = vsub.f32 1.0, %v1197_v55  ;;  %v1174_v38 = vand.u32 2147483647, %v1110_v34  ;;  %v1142_v11 = vsub.f32 %v3968_v21, %v3537_v40  ;;  %v5081_v23 = vld [vmem:[#allocation38_spill] sm:$0xff] }
 0x1b1   : > { %v1658_v26 = vmul.f32 %v1594_v29, %v1336_v59  ;;  %v1551_v62 = vmax.f32 %v1487_v32, 0.0  ;;  %v1519_v22 = vsub.f32 1.0, %v1455_v35  ;;  %v1432_v28 = vand.u32 2147483647, %v1368_v39  ;;  %v5082_v59 = vld [vmem:[#allocation40_spill] sm:$0xff] }
 0x1b2   : > { %v1325_v53 = vmax.f32 %v1261_v2, 0.0  ;;  %v1238_v37 = vsub.f32 1.0, %v1174_v38  ;;  %v1206_v8 = vand.u32 2147483647, %v1142_v11  ;;  %v1400_v6 = vsub.f32 %v3970_v33, %v3552_v9  ;;  %v5083_v2 = vld [vmem:[#allocation39_spill] sm:$0xff] }
 0x1b3   : > { %1722 = vmatpush.msrb.mxu3 %v1658_v26  ;;  %v1615_v16 = vmul.f32 %v1551_v62, %v1293_v24  ;;  %v1583_v56 = vmax.f32 %v1519_v22, 0.0  ;;  %v1496_v14 = vsub.f32 1.0, %v1432_v28  ;;  %v1099_v55 = vsub.f32 %v3941_v12, %v5081_v23  ;;  %v5084_v62 = vld [vmem:[#allocation41_spill] sm:$0xff] }
 0x1b4   : > { %v1302_v34 = vmax.f32 %v1238_v37, 0.0  ;;  %v1270_v27 = vsub.f32 1.0, %v1206_v8  ;;  %v1464_v40 = vand.u32 2147483647, %v1400_v6  ;;  %v1357_v29 = vsub.f32 %v3943_v63, %v5082_v59 }
 0x1b5   : > { %1667 = vmatpush.msrb.mxu0 %v1615_v16  ;;  %v1647_v32 = vmul.f32 %v1583_v56, %v1325_v53  ;;  %v1560_v35 = vmax.f32 %v1496_v14, 0.0  ;;  %v1163_v39 = vand.u32 2147483647, %v1099_v55  ;;  %v1131_v38 = vsub.f32 %v3941_v12, %v5083_v2 }
 0x1b6   : > { %v1334_v11 = vmax.f32 %v1270_v27, 0.0  ;;  %v1528_v24 = vsub.f32 1.0, %v1464_v40  ;;  %v1421_v26 = vand.u32 2147483647, %v1357_v29  ;;  %v1389_v22 = vsub.f32 %v3943_v63, %v5084_v62 }
 0x1b7   : > { %1687 = vmatpush.msrb.mxu1 %v1647_v32  ;;  %v1624_v37 = vmul.f32 %v1560_v35, %v1302_v34  ;;  %v1227_v8 = vsub.f32 1.0, %v1163_v39  ;;  %v1195_v28 = vand.u32 2147483647, %v1131_v38  ;;  %v1108_v6 = vsub.f32 %v3968_v21, %v3568_v19 }
 0x1b8   : > { %v1592_v16 = vmax.f32 %v1528_v24, 0.0  ;;  %v1485_v53 = vsub.f32 1.0, %v1421_v26  ;;  %v1453_v56 = vand.u32 2147483647, %v1389_v22  ;;  %v1366_v14 = vsub.f32 %v3970_v33, %v3580_v4 }
 0x1b9   : > { %1703 = vmatpush.msrb.mxu2 %v1624_v37  ;;  %v1291_v27 = vmax.f32 %v1227_v8, 0.0  ;;  %v1259_v40 = vsub.f32 1.0, %v1195_v28  ;;  %v1172_v55 = vand.u32 2147483647, %v1108_v6  ;;  %v1140_v29 = vsub.f32 %v3968_v21, %v3571_v50  ;;  %v5085_v8 = vld [vmem:[#allocation42_spill] sm:$0xff] }
 0x1ba   : > { %v1656_v32 = vmul.f32 %v1592_v16, %v1334_v11  ;;  %v1549_v34 = vmax.f32 %v1485_v53, 0.0  ;;  %v1517_v35 = vsub.f32 1.0, %v1453_v56  ;;  %v1430_v39 = vand.u32 2147483647, %v1366_v14  ;;  %v5086_v11 = vld [vmem:[#allocation44_spill] sm:$0xff] }
 0x1bb   : > { %v1323_v38 = vmax.f32 %v1259_v40, 0.0  ;;  %v1236_v9 = vsub.f32 1.0, %v1172_v55  ;;  %v1204_v19 = vand.u32 2147483647, %v1140_v29  ;;  %v1398_v24 = vsub.f32 %v3970_v33, %v3582_v13  ;;  %v5087_v40 = vld [vmem:[#allocation43_spill] sm:$0xff] }
 0x1bc   : > { %1723 = vmatpush.msrb.mxu3 %v1656_v32  ;;  %v1613_v26 = vmul.f32 %v1549_v34, %v1291_v27  ;;  %v1581_v22 = vmax.f32 %v1517_v35, 0.0  ;;  %v1494_v37 = vsub.f32 1.0, %v1430_v39  ;;  %v1097_v28 = vsub.f32 %v3941_v12, %v5085_v8  ;;  %v5088_v34 = vld [vmem:[#allocation45_spill] sm:$0xff] }
 0x1bd   : > { %v1300_v6 = vmax.f32 %v1236_v9, 0.0  ;;  %v1268_v4 = vsub.f32 1.0, %v1204_v19  ;;  %v1462_v50 = vand.u32 2147483647, %v1398_v24  ;;  %v1355_v16 = vsub.f32 %v3943_v63, %v5086_v11 }
 0x1be   : > { %1668 = vmatpush.msrb.mxu0 %v1613_v26  ;;  %v1645_v53 = vmul.f32 %v1581_v22, %v1323_v38  ;;  %v1558_v56 = vmax.f32 %v1494_v37, 0.0  ;;  %v1161_v14 = vand.u32 2147483647, %v1097_v28  ;;  %v1129_v55 = vsub.f32 %v3941_v12, %v5087_v40 }
 0x1bf   : > { %v1332_v29 = vmax.f32 %v1268_v4, 0.0  ;;  %v1526_v27 = vsub.f32 1.0, %v1462_v50  ;;  %v1419_v32 = vand.u32 2147483647, %v1355_v16  ;;  %v1387_v35 = vsub.f32 %v3943_v63, %v5088_v34 }
 0x1c0   : > { %1688 = vmatpush.msrb.mxu1 %v1645_v53  ;;  %v1622_v9 = vmul.f32 %v1558_v56, %v1300_v6  ;;  %v1225_v19 = vsub.f32 1.0, %v1161_v14  ;;  %v1193_v39 = vand.u32 2147483647, %v1129_v55  ;;  %v1106_v24 = vsub.f32 %v3968_v21, %v3590_v31 }
 0x1c1   : > { %v1590_v26 = vmax.f32 %v1526_v27, 0.0  ;;  %v1483_v38 = vsub.f32 1.0, %v1419_v32  ;;  %v1451_v22 = vand.u32 2147483647, %v1387_v35  ;;  %v1364_v37 = vsub.f32 %v3970_v33, %v3601_v61 }
 0x1c2   : > { %1704 = vmatpush.msrb.mxu2 %v1622_v9  ;;  %v1289_v4 = vmax.f32 %v1225_v19, 0.0  ;;  %v1257_v50 = vsub.f32 1.0, %v1193_v39  ;;  %v1170_v28 = vand.u32 2147483647, %v1106_v24  ;;  %v1138_v16 = vsub.f32 %v3968_v21, %v3597_v49  ;;  %v5089_v19 = vld [vmem:[#allocation46_spill] sm:$0xff] }
 0x1c3   : > { %v1654_v53 = vmul.f32 %v1590_v26, %v1332_v29  ;;  %v1547_v6 = vmax.f32 %v1483_v38, 0.0  ;;  %v1515_v56 = vsub.f32 1.0, %v1451_v22  ;;  %v1428_v14 = vand.u32 2147483647, %v1364_v37  ;;  %v5090_v29 = vld [vmem:[#allocation48_spill] sm:$0xff] }
 0x1c4   : > { %v1321_v55 = vmax.f32 %v1257_v50, 0.0  ;;  %v1234_v13 = vsub.f32 1.0, %v1170_v28  ;;  %v1202_v31 = vand.u32 2147483647, %v1138_v16  ;;  %v1396_v27 = vsub.f32 %v3970_v33, %v3608_v18  ;;  %v5091_v50 = vld [vmem:[#allocation47_spill] sm:$0xff] }
 0x1c5   : > { %1724 = vmatpush.msrb.mxu3 %v1654_v53  ;;  %v1611_v32 = vmul.f32 %v1547_v6, %v1289_v4  ;;  %v1579_v35 = vmax.f32 %v1515_v56, 0.0  ;;  %v1492_v9 = vsub.f32 1.0, %v1428_v14  ;;  %v1095_v39 = vsub.f32 %v3941_v12, %v5089_v19  ;;  %v5092_v6 = vld [vmem:[#allocation49_spill] sm:$0xff] }
 0x1c6   : > { %v1298_v24 = vmax.f32 %v1234_v13, 0.0  ;;  %v1266_v61 = vsub.f32 1.0, %v1202_v31  ;;  %v1460_v49 = vand.u32 2147483647, %v1396_v27  ;;  %v1353_v26 = vsub.f32 %v3943_v63, %v5090_v29 }
 0x1c7   : > { %1669 = vmatpush.msrb.mxu0 %v1611_v32  ;;  %v1643_v38 = vmul.f32 %v1579_v35, %v1321_v55  ;;  %v1556_v22 = vmax.f32 %v1492_v9, 0.0  ;;  %v1159_v37 = vand.u32 2147483647, %v1095_v39  ;;  %v1127_v28 = vsub.f32 %v3941_v12, %v5091_v50 }
 0x1c8   : > { %v1330_v16 = vmax.f32 %v1266_v61, 0.0  ;;  %v1524_v4 = vsub.f32 1.0, %v1460_v49  ;;  %v1417_v53 = vand.u32 2147483647, %v1353_v26  ;;  %v1385_v56 = vsub.f32 %v3943_v63, %v5092_v6 }
 0x1c9   : > { %1689 = vmatpush.msrb.mxu1 %v1643_v38  ;;  %v1620_v13 = vmul.f32 %v1556_v22, %v1298_v24  ;;  %v1223_v31 = vsub.f32 1.0, %v1159_v37  ;;  %v1191_v14 = vand.u32 2147483647, %v1127_v28  ;;  %v1104_v27 = vsub.f32 %v3968_v21, %v3624_v15 }
 0x1ca   : > { %v1588_v32 = vmax.f32 %v1524_v4, 0.0  ;;  %v1481_v55 = vsub.f32 1.0, %v1417_v53  ;;  %v1449_v35 = vand.u32 2147483647, %v1385_v56  ;;  %v1362_v9 = vsub.f32 %v3970_v33, %v3636_v20 }
 0x1cb   : > { %1705 = vmatpush.msrb.mxu2 %v1620_v13  ;;  %v1287_v61 = vmax.f32 %v1223_v31, 0.0  ;;  %v1255_v49 = vsub.f32 1.0, %v1191_v14  ;;  %v1168_v39 = vand.u32 2147483647, %v1104_v27  ;;  %v1136_v26 = vsub.f32 %v3968_v21, %v3626_v25  ;;  %v5093_v31 = vld [vmem:[#allocation50_spill] sm:$0xff] }
 0x1cc   : > { %v1652_v38 = vmul.f32 %v1588_v32, %v1330_v16  ;;  %v1545_v24 = vmax.f32 %v1481_v55, 0.0  ;;  %v1513_v22 = vsub.f32 1.0, %v1449_v35  ;;  %v1426_v37 = vand.u32 2147483647, %v1362_v9  ;;  %v5094_v16 = vld [vmem:[#allocation52_spill] sm:$0xff] }
 0x1cd   : > { %v1319_v28 = vmax.f32 %v1255_v49, 0.0  ;;  %v1232_v18 = vsub.f32 1.0, %v1168_v39  ;;  %v1200_v15 = vand.u32 2147483647, %v1136_v26  ;;  %v1394_v4 = vsub.f32 %v3970_v33, %v5076_v51  ;;  %v5095_v49 = vld [vmem:[#allocation51_spill] sm:$0xff] }
 0x1ce   : > { %1725 = vmatpush.msrb.mxu3 %v1652_v38  ;;  %v1609_v53 = vmul.f32 %v1545_v24, %v1287_v61  ;;  %v1577_v56 = vmax.f32 %v1513_v22, 0.0  ;;  %v1490_v13 = vsub.f32 1.0, %v1426_v37  ;;  %v1093_v14 = vsub.f32 %v3941_v12, %v5093_v31  ;;  %v5096_v24 = vld [vmem:[#allocation53_spill] sm:$0xff] }
 0x1cf   : > { %v1296_v27 = vmax.f32 %v1232_v18, 0.0  ;;  %v1264_v20 = vsub.f32 1.0, %v1200_v15  ;;  %v1458_v25 = vand.u32 2147483647, %v1394_v4  ;;  %v1351_v32 = vsub.f32 %v3943_v63, %v5094_v16 }
 0x1d0   : > { %1670 = vmatpush.msrb.mxu0 %v1609_v53  ;;  %v1641_v55 = vmul.f32 %v1577_v56, %v1319_v28  ;;  %v1554_v35 = vmax.f32 %v1490_v13, 0.0  ;;  %v1157_v9 = vand.u32 2147483647, %v1093_v14  ;;  %v1125_v39 = vsub.f32 %v3941_v12, %v5095_v49 }
 0x1d1   : > { %v1328_v26 = vmax.f32 %v1264_v20, 0.0  ;;  %v1522_v61 = vsub.f32 1.0, %v1458_v25  ;;  %v1415_v38 = vand.u32 2147483647, %v1351_v32  ;;  %v1383_v22 = vsub.f32 %v3943_v63, %v5096_v24 }
 0x1d2   : > { %1690 = vmatpush.msrb.mxu1 %v1641_v55  ;;  %v1618_v18 = vmul.f32 %v1554_v35, %v1296_v27  ;;  %v1221_v15 = vsub.f32 1.0, %v1157_v9  ;;  %v1189_v37 = vand.u32 2147483647, %v1125_v39  ;;  %v1102_v4 = vsub.f32 %v3968_v21, %v5077_v54 }
 0x1d3   : > { %v1586_v53 = vmax.f32 %v1522_v61, 0.0  ;;  %v1479_v28 = vsub.f32 1.0, %v1415_v38  ;;  %v1447_v56 = vand.u32 2147483647, %v1383_v22  ;;  %v1360_v13 = vsub.f32 %v3970_v33, %v5078_v47 }
 0x1d4   : > { %1706 = vmatpush.msrb.mxu2 %v1618_v18  ;;  %v1285_v20 = vmax.f32 %v1221_v15, 0.0  ;;  %v1253_v25 = vsub.f32 1.0, %v1189_v37  ;;  %v1166_v14 = vand.u32 2147483647, %v1102_v4  ;;  %v1134_v32 = vsub.f32 %v3968_v21, %v5079_v52  ;;  %v5097_v15 = vld [vmem:[#allocation54_spill] sm:$0xff] }
 0x1d5   : > { %v1650_v55 = vmul.f32 %v1586_v53, %v1328_v26  ;;  %v1543_v27 = vmax.f32 %v1479_v28, 0.0  ;;  %v1511_v35 = vsub.f32 1.0, %v1447_v56  ;;  %v1424_v9 = vand.u32 2147483647, %v1360_v13  ;;  %v5098_v26 = vld [vmem:[#allocation56_spill] sm:$0xff] }
 0x1d6   : > { %v1317_v39 = vmax.f32 %v1253_v25, 0.0  ;;  %v1230_v51 = vsub.f32 1.0, %v1166_v14  ;;  %v1198_v54 = vand.u32 2147483647, %v1134_v32  ;;  %v1392_v61 = vsub.f32 %v3970_v33, %v5080_v10  ;;  %v5099_v25 = vld [vmem:[#allocation55_spill] sm:$0xff] }
 0x1d7   : > { %1726 = vmatpush.msrb.mxu3 %v1650_v55  ;;  %v1607_v38 = vmul.f32 %v1543_v27, %v1285_v20  ;;  %v1575_v22 = vmax.f32 %v1511_v35, 0.0  ;;  %v1488_v18 = vsub.f32 1.0, %v1424_v9  ;;  %v1091_v37 = vsub.f32 %v3941_v12, %v5097_v15  ;;  %v5100_v27 = vld [vmem:[#allocation57_spill] sm:$0xff] }
 0x1d8   : > { %v1294_v4 = vmax.f32 %v1230_v51, 0.0  ;;  %v1262_v47 = vsub.f32 1.0, %v1198_v54  ;;  %v1456_v52 = vand.u32 2147483647, %v1392_v61  ;;  %v1349_v53 = vsub.f32 %v3943_v63, %v5098_v26 }
 0x1d9   : > { %1671 = vmatpush.msrb.mxu0 %v1607_v38  ;;  %v1639_v28 = vmul.f32 %v1575_v22, %v1317_v39  ;;  %v1552_v56 = vmax.f32 %v1488_v18, 0.0  ;;  %v1155_v13 = vand.u32 2147483647, %v1091_v37  ;;  %v1123_v14 = vsub.f32 %v3941_v12, %v5099_v25 }
 0x1da   : > { %v1326_v32 = vmax.f32 %v1262_v47, 0.0  ;;  %v1520_v20 = vsub.f32 1.0, %v1456_v52  ;;  %v1413_v55 = vand.u32 2147483647, %v1349_v53  ;;  %v1381_v35 = vsub.f32 %v3943_v63, %v5100_v27 }
 0x1db   : > { %1691 = vmatpush.msrb.mxu1 %v1639_v28  ;;  %v1616_v51 = vmul.f32 %v1552_v56, %v1294_v4  ;;  %v1219_v54 = vsub.f32 1.0, %v1155_v13  ;;  %v1187_v9 = vand.u32 2147483647, %v1123_v14  ;;  %v1100_v61 = vsub.f32 %v3968_v21, %v5081_v23 }
 0x1dc   : > { %v1584_v38 = vmax.f32 %v1520_v20, 0.0  ;;  %v1477_v39 = vsub.f32 1.0, %v1413_v55  ;;  %v1445_v22 = vand.u32 2147483647, %v1381_v35  ;;  %v1358_v18 = vsub.f32 %v3970_v33, %v5082_v59 }
 0x1dd   : > { %1707 = vmatpush.msrb.mxu2 %v1616_v51  ;;  %v1283_v47 = vmax.f32 %v1219_v54, 0.0  ;;  %v1251_v52 = vsub.f32 1.0, %v1187_v9  ;;  %v1164_v37 = vand.u32 2147483647, %v1100_v61  ;;  %v1132_v53 = vsub.f32 %v3968_v21, %v5083_v2  ;;  %v5101_v54 = vld [vmem:[#allocation58_spill] sm:$0xff] }
 0x1de   : > { %v1648_v28 = vmul.f32 %v1584_v38, %v1326_v32  ;;  %v1541_v4 = vmax.f32 %v1477_v39, 0.0  ;;  %v1509_v56 = vsub.f32 1.0, %v1445_v22  ;;  %v1422_v13 = vand.u32 2147483647, %v1358_v18  ;;  %v5102_v32 = vld [vmem:[#allocation60_spill] sm:$0xff] }
 0x1df   : > { %v1315_v14 = vmax.f32 %v1251_v52, 0.0  ;;  %v1228_v10 = vsub.f32 1.0, %v1164_v37  ;;  %v1196_v23 = vand.u32 2147483647, %v1132_v53  ;;  %v1390_v20 = vsub.f32 %v3970_v33, %v5084_v62  ;;  %v5103_v52 = vld [vmem:[#allocation59_spill] sm:$0xff] }
 0x1e0   : > { %1727 = vmatpush.msrb.mxu3 %v1648_v28  ;;  %v1605_v55 = vmul.f32 %v1541_v4, %v1283_v47  ;;  %v1573_v35 = vmax.f32 %v1509_v56, 0.0  ;;  %v1486_v51 = vsub.f32 1.0, %v1422_v13  ;;  %v1089_v9 = vsub.f32 %v3941_v12, %v5101_v54  ;;  %v5104_v4 = vld [vmem:[#allocation61_spill] sm:$0xff] }
 0x1e1   : > { %v1292_v61 = vmax.f32 %v1228_v10, 0.0  ;;  %v1260_v59 = vsub.f32 1.0, %v1196_v23  ;;  %v1454_v2 = vand.u32 2147483647, %v1390_v20  ;;  %v1347_v38 = vsub.f32 %v3943_v63, %v5102_v32 }
 0x1e2   : > { %1672 = vmatpush.msrb.mxu0 %v1605_v55  ;;  %v1637_v39 = vmul.f32 %v1573_v35, %v1315_v14  ;;  %v1550_v22 = vmax.f32 %v1486_v51, 0.0  ;;  %v1153_v18 = vand.u32 2147483647, %v1089_v9  ;;  %v1121_v37 = vsub.f32 %v3941_v12, %v5103_v52 }
 0x1e3   : > { %v1324_v53 = vmax.f32 %v1260_v59, 0.0  ;;  %v1518_v47 = vsub.f32 1.0, %v1454_v2  ;;  %v1411_v28 = vand.u32 2147483647, %v1347_v38  ;;  %v1379_v56 = vsub.f32 %v3943_v63, %v5104_v4 }
 0x1e4   : > { %1692 = vmatpush.msrb.mxu1 %v1637_v39  ;;  %v1614_v10 = vmul.f32 %v1550_v22, %v1292_v61  ;;  %v1217_v23 = vsub.f32 1.0, %v1153_v18  ;;  %v1185_v13 = vand.u32 2147483647, %v1121_v37  ;;  %v1098_v20 = vsub.f32 %v3968_v21, %v5085_v8 }
 0x1e5   : > { %v1582_v55 = vmax.f32 %v1518_v47, 0.0  ;;  %v1475_v14 = vsub.f32 1.0, %v1411_v28  ;;  %v1443_v35 = vand.u32 2147483647, %v1379_v56  ;;  %v1356_v51 = vsub.f32 %v3970_v33, %v5086_v11 }
 0x1e6   : > { %1708 = vmatpush.msrb.mxu2 %v1614_v10  ;;  %v1281_v59 = vmax.f32 %v1217_v23, 0.0  ;;  %v1249_v2 = vsub.f32 1.0, %v1185_v13  ;;  %v1162_v9 = vand.u32 2147483647, %v1098_v20  ;;  %v1130_v38 = vsub.f32 %v3968_v21, %v5087_v40  ;;  %v5105_v23 = vld [vmem:[#allocation62_spill] sm:$0xff] }
 0x1e7   : > { %v1646_v39 = vmul.f32 %v1582_v55, %v1324_v53  ;;  %v1539_v61 = vmax.f32 %v1475_v14, 0.0  ;;  %v1507_v22 = vsub.f32 1.0, %v1443_v35  ;;  %v1420_v18 = vand.u32 2147483647, %v1356_v51  ;;  %v5106_v53 = vld [vmem:[#allocation64_spill] sm:$0xff] }
 0x1e8   : > { %v1313_v37 = vmax.f32 %v1249_v2, 0.0  ;;  %v1226_v62 = vsub.f32 1.0, %v1162_v9  ;;  %v1194_v8 = vand.u32 2147483647, %v1130_v38  ;;  %v1388_v47 = vsub.f32 %v3970_v33, %v5088_v34  ;;  %v5107_v2 = vld [vmem:[#allocation63_spill] sm:$0xff] }
 0x1e9   : > { %1728 = vmatpush.msrb.mxu3 %v1646_v39  ;;  %v1603_v28 = vmul.f32 %v1539_v61, %v1281_v59  ;;  %v1571_v56 = vmax.f32 %v1507_v22, 0.0  ;;  %v1484_v10 = vsub.f32 1.0, %v1420_v18  ;;  %v1087_v13 = vsub.f32 %v3941_v12, %v5105_v23 }
 0x1ea   : > { %v1290_v20 = vmax.f32 %v1226_v62, 0.0  ;;  %v1258_v11 = vsub.f32 1.0, %v1194_v8  ;;  %v1452_v40 = vand.u32 2147483647, %v1388_v47  ;;  %v1345_v55 = vsub.f32 %v3943_v63, %v5106_v53 }
 0x1eb   : > { %1673 = vmatpush.msrb.mxu0 %v1603_v28  ;;  %v1635_v14 = vmul.f32 %v1571_v56, %v1313_v37  ;;  %v1548_v35 = vmax.f32 %v1484_v10, 0.0  ;;  %v1151_v51 = vand.u32 2147483647, %v1087_v13  ;;  %v1119_v9 = vsub.f32 %v3941_v12, %v5107_v2 }
 0x1ec   : > { %v1322_v38 = vmax.f32 %v1258_v11, 0.0  ;;  %v1516_v59 = vsub.f32 1.0, %v1452_v40  ;;  %v1409_v39 = vand.u32 2147483647, %v1345_v55  ;;  %v1377_v61 = vsub.f32 %v3943_v63, %v3864_v7 }
 0x1ed   : > { %1693 = vmatpush.msrb.mxu1 %v1635_v14  ;;  %v1612_v62 = vmul.f32 %v1548_v35, %v1290_v20  ;;  %v1215_v8 = vsub.f32 1.0, %v1151_v51  ;;  %v1183_v22 = vand.u32 2147483647, %v1119_v9  ;;  %v1096_v18 = vsub.f32 %v3968_v21, %v5089_v19 }
 0x1ee   : > { %v1580_v47 = vmax.f32 %v1516_v59, 0.0  ;;  %v1473_v37 = vsub.f32 1.0, %v1409_v39  ;;  %v1441_v28 = vand.u32 2147483647, %v1377_v61  ;;  %v1354_v56 = vsub.f32 %v3970_v33, %v5090_v29 }
 0x1ef   : > { %1709 = vmatpush.msrb.mxu2 %v1612_v62  ;;  %v1279_v11 = vmax.f32 %v1215_v8, 0.0  ;;  %v1247_v40 = vsub.f32 1.0, %v1183_v22  ;;  %v1160_v10 = vand.u32 2147483647, %v1096_v18  ;;  %v1128_v13 = vsub.f32 %v3968_v21, %v5091_v50  ;;  %v5108_v8 = vld [vmem:[#allocation66_spill] sm:$0xff] }
 0x1f0   : > { %v1644_v55 = vmul.f32 %v1580_v47, %v1322_v38  ;;  %v1537_v20 = vmax.f32 %v1473_v37, 0.0  ;;  %v1505_v14 = vsub.f32 1.0, %v1441_v28  ;;  %v1418_v35 = vand.u32 2147483647, %v1354_v56  ;;  %v5109_v38 = vld [vmem:[#allocation68_spill] sm:$0xff] }
 0x1f1   : > { %v1311_v51 = vmax.f32 %v1247_v40, 0.0  ;;  %v1224_v9 = vsub.f32 1.0, %v1160_v10  ;;  %v1192_v19 = vand.u32 2147483647, %v1128_v13  ;;  %v1386_v59 = vsub.f32 %v3970_v33, %v5092_v6  ;;  %v5110_v40 = vld [vmem:[#allocation67_spill] sm:$0xff] }
 0x1f2   : > { %1729 = vmatpush.msrb.mxu3 %v1644_v55  ;;  %v1601_v39 = vmul.f32 %v1537_v20, %v1279_v11  ;;  %v1569_v61 = vmax.f32 %v1505_v14, 0.0  ;;  %v1482_v62 = vsub.f32 1.0, %v1418_v35  ;;  %v1085_v22 = vsub.f32 %v3941_v12, %v5108_v8 }
 0x1f3   : > { %v1288_v18 = vmax.f32 %v1224_v9, 0.0  ;;  %v1256_v29 = vsub.f32 1.0, %v1192_v19  ;;  %v1450_v50 = vand.u32 2147483647, %v1386_v59  ;;  %v1343_v47 = vsub.f32 %v3943_v63, %v5109_v38 }
 0x1f4   : > { %1674 = vmatpush.msrb.mxu0 %v1601_v39  ;;  %v1633_v37 = vmul.f32 %v1569_v61, %v1311_v51  ;;  %v1546_v28 = vmax.f32 %v1482_v62, 0.0  ;;  %v1149_v56 = vand.u32 2147483647, %v1085_v22  ;;  %v1117_v10 = vsub.f32 %v3941_v12, %v5110_v40 }
 0x1f5   : > { %v1320_v13 = vmax.f32 %v1256_v29, 0.0  ;;  %v1514_v11 = vsub.f32 1.0, %v1450_v50  ;;  %v1407_v55 = vand.u32 2147483647, %v1343_v47  ;;  %v1375_v20 = vsub.f32 %v3943_v63, %v3886_v5 }
 0x1f6   : > { %1694 = vmatpush.msrb.mxu1 %v1633_v37  ;;  %v1610_v14 = vmul.f32 %v1546_v28, %v1288_v18  ;;  %v1213_v19 = vsub.f32 1.0, %v1149_v56  ;;  %v1181_v35 = vand.u32 2147483647, %v1117_v10  ;;  %v1094_v9 = vsub.f32 %v3968_v21, %v5093_v31 }
 0x1f7   : > { %v1578_v59 = vmax.f32 %v1514_v11, 0.0  ;;  %v1471_v51 = vsub.f32 1.0, %v1407_v55  ;;  %v1439_v39 = vand.u32 2147483647, %v1375_v20  ;;  %v1352_v61 = vsub.f32 %v3970_v33, %v5094_v16 }
 0x1f8   : > { %1710 = vmatpush.msrb.mxu2 %v1610_v14  ;;  %v1277_v29 = vmax.f32 %v1213_v19, 0.0  ;;  %v1245_v50 = vsub.f32 1.0, %v1181_v35  ;;  %v1158_v62 = vand.u32 2147483647, %v1094_v9  ;;  %v1126_v22 = vsub.f32 %v3968_v21, %v5095_v49 }
 0x1f9   : > { %v1642_v47 = vmul.f32 %v1578_v59, %v1320_v13  ;;  %v1535_v18 = vmax.f32 %v1471_v51, 0.0  ;;  %v1503_v37 = vsub.f32 1.0, %v1439_v39  ;;  %v1416_v28 = vand.u32 2147483647, %v1352_v61 }
 0x1fa   : > { %v1309_v56 = vmax.f32 %v1245_v50, 0.0  ;;  %v1222_v10 = vsub.f32 1.0, %v1158_v62  ;;  %v1190_v31 = vand.u32 2147483647, %v1126_v22  ;;  %v1384_v11 = vsub.f32 %v3970_v33, %v5096_v24 }
 0x1fb   : > { %1730 = vmatpush.msrb.mxu3 %v1642_v47  ;;  %v1599_v55 = vmul.f32 %v1535_v18, %v1277_v29  ;;  %v1567_v20 = vmax.f32 %v1503_v37, 0.0  ;;  %v1480_v14 = vsub.f32 1.0, %v1416_v28  ;;  %v1083_v19 = vsub.f32 %v3941_v12, %v3902_v36 }
 0x1fc   : > { %v1286_v35 = vmax.f32 %v1222_v10, 0.0  ;;  %v1254_v9 = vsub.f32 1.0, %v1190_v31  ;;  %v1448_v49 = vand.u32 2147483647, %v1384_v11  ;;  %v1341_v13 = vsub.f32 %v3943_v63, %v3913_v45 }
 0x1fd   : > { %1675 = vmatpush.msrb.mxu0 %v1599_v55  ;;  %v1631_v59 = vmul.f32 %v1567_v20, %v1309_v56  ;;  %v1544_v51 = vmax.f32 %v1480_v14, 0.0  ;;  %v1147_v39 = vand.u32 2147483647, %v1083_v19  ;;  %v1115_v61 = vsub.f32 %v3941_v12, %v3907_v0 }
 0x1fe   : > { %v1318_v50 = vmax.f32 %v1254_v9, 0.0  ;;  %v1512_v29 = vsub.f32 1.0, %v1448_v49  ;;  %v1405_v62 = vand.u32 2147483647, %v1341_v13  ;;  %v1373_v22 = vsub.f32 %v3943_v63, %v3924_v1 }
 0x1ff   : > { %1695 = vmatpush.msrb.mxu1 %v1631_v59  ;;  %v1608_v47 = vmul.f32 %v1544_v51, %v1286_v35  ;;  %v1211_v31 = vsub.f32 1.0, %v1147_v39  ;;  %v1179_v18 = vand.u32 2147483647, %v1115_v61  ;;  %v1092_v37 = vsub.f32 %v3968_v21, %v5097_v15 }
 0x200   : > { %v1576_v28 = vmax.f32 %v1512_v29, 0.0  ;;  %v1469_v56 = vsub.f32 1.0, %v1405_v62  ;;  %v1437_v10 = vand.u32 2147483647, %v1373_v22  ;;  %v1350_v11 = vsub.f32 %v3970_v33, %v5098_v26 }
 0x201   : > { %1711 = vmatpush.msrb.mxu2 %v1608_v47  ;;  %v1275_v12 = vmax.f32 %v1211_v31, 0.0  ;;  %v1243_v49 = vsub.f32 1.0, %v1179_v18  ;;  %v1156_v55 = vand.u32 2147483647, %v1092_v37  ;;  %v1124_v63 = vsub.f32 %v3968_v21, %v5099_v25 }
 0x202   : > { %v1640_v20 = vmul.f32 %v1576_v28, %v1318_v50  ;;  %v1533_v14 = vmax.f32 %v1469_v56, 0.0  ;;  %v1501_v19 = vsub.f32 1.0, %v1437_v10  ;;  %v1414_v35 = vand.u32 2147483647, %v1350_v11 }
 0x203   : > { %v1307_v9 = vmax.f32 %v1243_v49, 0.0  ;;  %v1220_v13 = vsub.f32 1.0, %v1156_v55  ;;  %v1188_v59 = vand.u32 2147483647, %v1124_v63  ;;  %v1382_v51 = vsub.f32 %v3970_v33, %v5100_v27 }
 0x204   : > { %1731 = vmatpush.msrb.mxu3 %v1640_v20  ;;  %v1597_v39 = vmul.f32 %v1533_v14, %v1275_v12  ;;  %v1565_v61 = vmax.f32 %v1501_v19, 0.0  ;;  %v1478_v29 = vsub.f32 1.0, %v1414_v35  ;;  %v1090_v62 = vsub.f32 %v3968_v21, %v5101_v54 }
 0x205   : > { %v1284_v22 = vmax.f32 %v1220_v13, 0.0  ;;  %v1252_v47 = vsub.f32 1.0, %v1188_v59  ;;  %v1446_v31 = vand.u32 2147483647, %v1382_v51  ;;  %v1348_v50 = vsub.f32 %v3970_v33, %v5102_v32 }
 0x206   : > { %1676 = vmatpush.msrb.mxu0 %v1597_v39  ;;  %v1629_v18 = vmul.f32 %v1565_v61, %v1307_v9  ;;  %v1542_v37 = vmax.f32 %v1478_v29, 0.0  ;;  %v1154_v28 = vand.u32 2147483647, %v1090_v62  ;;  %v1122_v56 = vsub.f32 %v3968_v21, %v5103_v52 }
 0x207   : > { %v1316_v10 = vmax.f32 %v1252_v47, 0.0  ;;  %v1510_v11 = vsub.f32 1.0, %v1446_v31  ;;  %1677 = vmatmul.f32.vlgmr.msrb.gmra.mxu0 %v3935_v48  ;;  %v1412_v12 = vand.u32 2147483647, %v1348_v50  ;;  %v1380_v49 = vsub.f32 %v3970_v33, %v5104_v4 }
 0x208   : > { %1696 = vmatpush.msrb.mxu1 %v1629_v18  ;;  %v1606_v55 = vmul.f32 %v1542_v37, %v1284_v22  ;;  %v1218_v63 = vsub.f32 1.0, %v1154_v28  ;;  %v1186_v20 = vand.u32 2147483647, %v1122_v56  ;;  %v1088_v14 = vsub.f32 %v3968_v21, %v5105_v23 }
 0x209   : > { %v1574_v19 = vmax.f32 %v1510_v11, 0.0  ;;  %1697 = vmatmul.f32.vlgmr.msrb.gmra.mxu1 %v3954_v17  ;;  %v1476_v35 = vsub.f32 1.0, %v1412_v12  ;;  %v1444_v9 = vand.u32 2147483647, %v1380_v49  ;;  %v1346_v13 = vsub.f32 %v3970_v33, %v5106_v53 }
 0x20a   : > { %1712 = vmatpush.msrb.mxu2 %v1606_v55  ;;  %v1282_v59 = vmax.f32 %v1218_v63, 0.0  ;;  %v1250_v51 = vsub.f32 1.0, %v1186_v20  ;;  %v1152_v39 = vand.u32 2147483647, %v1088_v14  ;;  %v1120_v61 = vsub.f32 %v3968_v21, %v5107_v2 }
 0x20b   : > { %v1638_v29 = vmul.f32 %v1574_v19, %v1316_v10  ;;  %v1540_v62 = vmax.f32 %v1476_v35, 0.0  ;;  %v1508_v22 = vsub.f32 1.0, %v1444_v9  ;;  %v1410_v47 = vand.u32 2147483647, %v1346_v13 }
 0x20c   : > { %v1314_v31 = vmax.f32 %v1250_v51, 0.0  ;;  %v1216_v50 = vsub.f32 1.0, %v1152_v39  ;;  %v1184_v18 = vand.u32 2147483647, %v1120_v61  ;;  %v1378_v37 = vsub.f32 %v3970_v33, %v3864_v7 }
 0x20d   : > { %1732 = vmatpush.msrb.mxu3 %v1638_v29  ;;  %v1604_v28 = vmul.f32 %v1540_v62, %v1282_v59  ;;  %v1572_v56 = vmax.f32 %v1508_v22, 0.0  ;;  %v1474_v11 = vsub.f32 1.0, %v1410_v47  ;;  %v1086_v12 = vsub.f32 %v3968_v21, %v5108_v8 }
 0x20e   : > { %v1280_v49 = vmax.f32 %v1216_v50, 0.0  ;;  %v1248_v55 = vsub.f32 1.0, %v1184_v18  ;;  %v1442_v63 = vand.u32 2147483647, %v1378_v37  ;;  %v1344_v10 = vsub.f32 %v3970_v33, %v5109_v38  ;;  %v5125_v38 = vld [vmem:[#allocation32_spill] sm:$0xff] }
 0x20f   : > { %1713 = vmatpush.msrb.mxu2 %v1604_v28  ;;  %v1636_v20 = vmul.f32 %v1572_v56, %v1314_v31  ;;  %v1538_v14 = vmax.f32 %v1474_v11, 0.0  ;;  %v1150_v19 = vand.u32 2147483647, %v1086_v12  ;;  %v1118_v35 = vsub.f32 %v3968_v21, %v5110_v40 }
 0x210   : > { %v1312_v9 = vmax.f32 %v1248_v55, 0.0  ;;  %v1506_v13 = vsub.f32 1.0, %v1442_v63  ;;  %v1408_v59 = vand.u32 2147483647, %v1344_v10  ;;  %v1376_v51 = vsub.f32 %v3970_v33, %v3886_v5 }
 0x211   : > { %1733 = vmatpush.msrb.mxu3 %v1636_v20  ;;  %v1602_v39 = vmul.f32 %v1538_v14, %v1280_v49  ;;  %v1214_v61 = vsub.f32 1.0, %v1150_v19  ;;  %v1182_v29 = vand.u32 2147483647, %v1118_v35  ;;  %v1084_v62 = vsub.f32 %v3968_v21, %v3902_v36 }
 0x212   : > { %v1570_v22 = vmax.f32 %v1506_v13, 0.0  ;;  %v1472_v47 = vsub.f32 1.0, %v1408_v59  ;;  %v1440_v31 = vand.u32 2147483647, %v1376_v51  ;;  %v1342_v50 = vsub.f32 %v3970_v33, %v3913_v45 }
 0x213   : > { %1714 = vmatpush.msrb.mxu2 %v1602_v39  ;;  %v1278_v18 = vmax.f32 %v1214_v61, 0.0  ;;  %v1246_v37 = vsub.f32 1.0, %v1182_v29  ;;  %v1148_v28 = vand.u32 2147483647, %v1084_v62  ;;  %v1116_v56 = vsub.f32 %v3968_v21, %v3907_v0 }
 0x214   : > { %v1634_v11 = vmul.f32 %v1570_v22, %v1312_v9  ;;  %v1536_v12 = vmax.f32 %v1472_v47, 0.0  ;;  %v1504_v49 = vsub.f32 1.0, %v1440_v31  ;;  %v1406_v55 = vand.u32 2147483647, %v1342_v50 }
 0x215   : > { %v1310_v63 = vmax.f32 %v1246_v37, 0.0  ;;  %v1212_v10 = vsub.f32 1.0, %v1148_v28  ;;  %v1180_v20 = vand.u32 2147483647, %v1116_v56  ;;  %v1374_v14 = vsub.f32 %v3970_v33, %v3924_v1 }
 0x216   : > { %1734 = vmatpush.msrb.mxu3 %v1634_v11  ;;  %v1600_v19 = vmul.f32 %v1536_v12, %v1278_v18  ;;  %v1568_v35 = vmax.f32 %v1504_v49, 0.0  ;;  %v1470_v13 = vsub.f32 1.0, %v1406_v55 }
 0x217   : > { %v1276_v59 = vmax.f32 %v1212_v10, 0.0  ;;  %v1244_v51 = vsub.f32 1.0, %v1180_v20  ;;  %v1438_v39 = vand.u32 2147483647, %v1374_v14 }
 0x218   : > { %1715 = vmatpush.msrb.mxu2 %v1600_v19  ;;  %v1632_v61 = vmul.f32 %v1568_v35, %v1310_v63  ;;  %v1534_v21 = vmax.f32 %v1470_v13, 0.0 }
 0x219   : > { %v1308_v9 = vmax.f32 %v1244_v51, 0.0  ;;  %v1502_v29 = vsub.f32 1.0, %v1438_v39 }
 0x21a   : > { %1735 = vmatpush.msrb.mxu3 %v1632_v61  ;;  %v1598_v62 = vmul.f32 %v1534_v21, %v1276_v59  ;;  %v5112_v59 = vld [vmem:[#allocation18_spill] sm:$0xff] }
 0x21b   : > { %v1566_v22 = vmax.f32 %v1502_v29, 0.0 }
 0x21c   : > { %1716 = vmatpush.msrb.mxu2 %v1598_v62 }
 0x21d   : > { %v1630_v47 = vmul.f32 %v1566_v22, %v1308_v9  ;;  %1717 = vmatmul.f32.vlgmr.msrb.gmra.mxu2 %v3935_v48  ;;  %v5113_v9 = vld [vmem:[#allocation20_spill] sm:$0xff] }
 0x21f   : > { %1736 = vmatpush.msrb.mxu3 %v1630_v47 }
 0x220   : > { %1737 = vmatmul.f32.vlgmr.msrb.gmra.mxu3 %v3954_v17 }
 0x284   : > { %v1678_v33 = vpop.f32.mrf.mxu0 }
 0x286   : > { %v1698_v31 = vpop.f32.mrf.mxu1 }
 0x287   : > { %v1699_v50 = vadd.f32 %v1698_v31, %v1678_v33 }
 0x289   : > { %v4217_v18 = vadd.f32 %v1699_v50, %v3935_v48 }
 0x28b   : > { %5111 = vst [vmem:[#allocation45_spill] sm:$0xff] %v4217_v18  ;;  %v1743_v37 = vadd.f32 %v4217_v18, %v3448_v30  ;;  %v1745_v28 = vadd.f32 %v4217_v18, %v3472_v46 }
 0x28d   : > { %v4223_v56 = vperm.slane %v1743_v37, 0  ;;  %v4225_v11 = vperm.slane %v1745_v28, 1 }
 0x28f   : > { %v1779_v12 = vsub.f32 %v4223_v56, %v3463_v41  ;;  %v2037_v49 = vsub.f32 %v4225_v11, %v3490_v57  ;;  %v1811_v48 = vsub.f32 %v4223_v56, %v3465_v42  ;;  %v2069_v55 = vsub.f32 %v4225_v11, %v3492_v58 }
 0x290   : > { %v1777_v63 = vsub.f32 %v4223_v56, %v3467_v43  ;;  %v2035_v10 = vsub.f32 %v4225_v11, %v3496_v60  ;;  %v1809_v20 = vsub.f32 %v4223_v56, %v3469_v44  ;;  %v2067_v14 = vsub.f32 %v4225_v11, %v3504_v3 }
 0x291   : > { %v1843_v19 = vand.u32 2147483647, %v1779_v12  ;;  %v2101_v35 = vand.u32 2147483647, %v2037_v49  ;;  %v1875_v13 = vand.u32 2147483647, %v1811_v48  ;;  %v1775_v51 = vsub.f32 %v4223_v56, %v5112_v59 }
 0x292   : > { %v2133_v39 = vand.u32 2147483647, %v2069_v55  ;;  %v1841_v61 = vand.u32 2147483647, %v1777_v63  ;;  %v2099_v21 = vand.u32 2147483647, %v2035_v10  ;;  %v2033_v29 = vsub.f32 %v4225_v11, %v5113_v9 }
 0x293   : > { %v1907_v62 = vsub.f32 1.0, %v1843_v19  ;;  %v2165_v22 = vsub.f32 1.0, %v2101_v35  ;;  %v1939_v47 = vsub.f32 1.0, %v1875_v13  ;;  %v1873_v33 = vand.u32 2147483647, %v1809_v20  ;;  %v5114_v20 = vld [vmem:[#allocation19_spill] sm:$0xff] }
 0x294   : > { %v2197_v31 = vsub.f32 1.0, %v2133_v39  ;;  %v1905_v50 = vsub.f32 1.0, %v1841_v61  ;;  %v2163_v37 = vsub.f32 1.0, %v2099_v21  ;;  %v2131_v28 = vand.u32 2147483647, %v2067_v14  ;;  %v5115_v21 = vld [vmem:[#allocation21_spill] sm:$0xff] }
 0x295   : > { %v1971_v12 = vmax.f32 %v1907_v62, 0.0  ;;  %v2229_v49 = vmax.f32 %v2165_v22, 0.0  ;;  %v2003_v48 = vmax.f32 %v1939_v47, 0.0  ;;  %v1937_v46 = vsub.f32 1.0, %v1873_v33  ;;  %v5116_v22 = vld [vmem:[#allocation22_spill] sm:$0xff] }
 0x296   : > { %v2261_v30 = vmax.f32 %v2197_v31, 0.0  ;;  %v1969_v18 = vmax.f32 %v1905_v50, 0.0  ;;  %v2227_v55 = vmax.f32 %v2163_v37, 0.0  ;;  %v2195_v63 = vsub.f32 1.0, %v2131_v28 }
 0x297   : > { %v2293_v10 = vmul.f32 %v2229_v49, %v1971_v12  ;;  %v2001_v1 = vmax.f32 %v1937_v46, 0.0  ;;  %v1839_v0 = vand.u32 2147483647, %v1775_v51  ;;  %v2097_v45 = vand.u32 2147483647, %v2033_v29  ;;  %v5117_v51 = vld [vmem:[#allocation24_spill] sm:$0xff] }
 0x298   : > { %v2325_v19 = vmul.f32 %v2261_v30, %v2003_v48  ;;  %v2291_v35 = vmul.f32 %v2227_v55, %v1969_v18  ;;  %v2259_v13 = vmax.f32 %v2195_v63, 0.0  ;;  %v1807_v39 = vsub.f32 %v4223_v56, %v5114_v20  ;;  %v5118_v18 = vld [vmem:[#allocation23_spill] sm:$0xff]  ;;  %v5119_v49 = vld [vmem:[#allocation25_spill] sm:$0xff] }
 0x299   : > { %2327 = vmatpush.msra.mxu0 %v2293_v10  ;;  %v1903_v14 = vsub.f32 1.0, %v1839_v0  ;;  %v2161_v61 = vsub.f32 1.0, %v2097_v45  ;;  %v2065_v62 = vsub.f32 %v4225_v11, %v5115_v21  ;;  %v1773_v47 = vsub.f32 %v4223_v56, %v5116_v22  ;;  %v5120_v10 = vld [vmem:[#allocation26_spill] sm:$0xff] }
 0x29a   : > { %2347 = vmatpush.msra.mxu1 %v2325_v19  ;;  %v2323_v33 = vmul.f32 %v2259_v13, %v2001_v1  ;;  %v1871_v46 = vand.u32 2147483647, %v1807_v39  ;;  %v2031_v30 = vsub.f32 %v4225_v11, %v5117_v51  ;;  %v1805_v29 = vsub.f32 %v4223_v56, %v5118_v18 }
 0x29b   : > { %2328 = vmatpush.msra.mxu0 %v2291_v35  ;;  %v1967_v31 = vmax.f32 %v1903_v14, 0.0  ;;  %v2225_v50 = vmax.f32 %v2161_v61, 0.0  ;;  %v2129_v0 = vand.u32 2147483647, %v2065_v62  ;;  %v1837_v45 = vand.u32 2147483647, %v1773_v47 }
 0x29c   : > { %2348 = vmatpush.msra.mxu1 %v2323_v33  ;;  %v1935_v37 = vsub.f32 1.0, %v1871_v46  ;;  %v2095_v28 = vand.u32 2147483647, %v2031_v30  ;;  %v1869_v12 = vand.u32 2147483647, %v1805_v29  ;;  %v2063_v48 = vsub.f32 %v4225_v11, %v5119_v49  ;;  %v5121_v33 = vld [vmem:[#allocation28_spill] sm:$0xff] }
 0x29d   : > { %v2289_v1 = vmul.f32 %v2225_v50, %v1967_v31  ;;  %v2193_v55 = vsub.f32 1.0, %v2129_v0  ;;  %v1901_v63 = vsub.f32 1.0, %v1837_v45  ;;  %v1771_v19 = vsub.f32 %v4223_v56, %v5120_v10  ;;  %v5122_v31 = vld [vmem:[#allocation27_spill] sm:$0xff] }
 0x29e   : > { %v1999_v13 = vmax.f32 %v1935_v37, 0.0  ;;  %v2159_v39 = vsub.f32 1.0, %v2095_v28  ;;  %v1933_v35 = vsub.f32 1.0, %v1869_v12  ;;  %v2127_v14 = vand.u32 2147483647, %v2063_v48  ;;  %v5123_v28 = vld [vmem:[#allocation29_spill] sm:$0xff] }
 0x29f   : > { %2329 = vmatpush.msra.mxu0 %v2289_v1  ;;  %v2257_v61 = vmax.f32 %v2193_v55, 0.0  ;;  %v1965_v62 = vmax.f32 %v1901_v63, 0.0  ;;  %v1835_v47 = vand.u32 2147483647, %v1771_v19  ;;  %v2029_v46 = vsub.f32 %v4225_v11, %v5121_v33  ;;  %v5124_v63 = vld [vmem:[#allocation30_spill] sm:$0xff] }
 0x2a0   : > { %v2223_v30 = vmax.f32 %v2159_v39, 0.0  ;;  %v1997_v29 = vmax.f32 %v1933_v35, 0.0  ;;  %v2191_v36 = vsub.f32 1.0, %v2127_v14  ;;  %v1803_v50 = vsub.f32 %v4223_v56, %v5122_v31  ;;  %v1718_v0 = vpop.f32.mrf.mxu2 }
 0x2a1   : > { %v2321_v45 = vmul.f32 %v2257_v61, %v1999_v13  ;;  %v1899_v5 = vsub.f32 1.0, %v1835_v47  ;;  %v2093_v37 = vand.u32 2147483647, %v2029_v46  ;;  %v2061_v12 = vsub.f32 %v4225_v11, %v5123_v28 }
 0x2a2   : > { %v2287_v48 = vmul.f32 %v2223_v30, %v1965_v62  ;;  %v2255_v1 = vmax.f32 %v2191_v36, 0.0  ;;  %v1867_v55 = vand.u32 2147483647, %v1803_v50  ;;  %v1769_v19 = vsub.f32 %v4223_v56, %v5124_v63  ;;  %v5126_v30 = vld [vmem:[#allocation31_spill] sm:$0xff] }
 0x2a3   : > { %v1738_v40 = vpop.f32.mrf.mxu3  ;;  %2349 = vmatpush.msra.mxu1 %v2321_v45  ;;  %v1963_v39 = vmax.f32 %v1899_v5, 0.0  ;;  %v2157_v35 = vsub.f32 1.0, %v2093_v37  ;;  %v2125_v14 = vand.u32 2147483647, %v2061_v12  ;;  %v2027_v8 = vsub.f32 %v4225_v11, %v5125_v38  ;;  %v5128_v37 = vld [vmem:[#allocation33_spill] sm:$0xff] }
 0x2a4   : > { %v1739_v13 = vadd.f32 %v1738_v40, %v1718_v0  ;;  %2330 = vmatpush.msra.mxu0 %v2287_v48  ;;  %v2319_v61 = vmul.f32 %v2255_v1, %v1997_v29  ;;  %v1931_v47 = vsub.f32 1.0, %v1867_v55  ;;  %v1833_v46 = vand.u32 2147483647, %v1769_v19  ;;  %v5129_v1 = vld [vmem:[#allocation9_spill] sm:$0xff] }
 0x2a5   : > { %v2221_v7 = vmax.f32 %v2157_v35, 0.0  ;;  %v2189_v62 = vsub.f32 1.0, %v2125_v14  ;;  %v2091_v36 = vand.u32 2147483647, %v2027_v8  ;;  %v1801_v50 = vsub.f32 %v4223_v56, %v5126_v30  ;;  %v5130_v8 = vld [vmem:[#allocation13_spill] sm:$0xff] }
 0x2a6   : > { %v4274_v2 = vadd.f32 %v1739_v13, %v3954_v17  ;;  %2350 = vmatpush.msra.mxu1 %v2319_v61  ;;  %v1995_v5 = vmax.f32 %v1931_v47, 0.0  ;;  %v1897_v45 = vsub.f32 1.0, %v1833_v46  ;;  %v2059_v12 = vsub.f32 %v4225_v11, %v5128_v37  ;;  %v5131_v47 = vld [vmem:[#allocation34_spill] sm:$0xff] }
 0x2a7   : > { %v2285_v40 = vmul.f32 %v2221_v7, %v1963_v39  ;;  %v2253_v0 = vmax.f32 %v2189_v62, 0.0  ;;  %v2155_v29 = vsub.f32 1.0, %v2091_v36  ;;  %v1865_v48 = vand.u32 2147483647, %v1801_v50  ;;  %v5132_v62 = vld [vmem:[#allocation36_spill] sm:$0xff] }
 0x2a8   : > { %5127 = vst [vmem:[#allocation49_spill] sm:$0xff] %v4274_v2  ;;  %v1744_v55 = vadd.f32 %v4274_v2, %v5129_v1  ;;  %v1746_v19 = vadd.f32 %v4274_v2, %v5130_v8  ;;  %v1961_v35 = vmax.f32 %v1897_v45, 0.0  ;;  %v2123_v14 = vand.u32 2147483647, %v2059_v12  ;;  %v5133_v12 = vld [vmem:[#allocation35_spill] sm:$0xff]  ;;  %v5136_v2 = vld [vmem:[#allocation40_spill] sm:$0xff] }
 0x2a9   : > { %2331 = vmatpush.msra.mxu0 %v2285_v40  ;;  %v2317_v17 = vmul.f32 %v2253_v0, %v1995_v5  ;;  %v2219_v13 = vmax.f32 %v2155_v29, 0.0  ;;  %v1929_v61 = vsub.f32 1.0, %v1865_v48  ;;  %v1767_v46 = vsub.f32 %v4223_v56, %v5131_v47  ;;  %v5134_v29 = vld [vmem:[#allocation37_spill] sm:$0xff] }
 0x2aa   : > { %v4284_v53 = vperm.slane %v1744_v55, 0  ;;  %v4286_v7 = vperm.slane %v1746_v19, 1  ;;  %v2187_v39 = vsub.f32 1.0, %v2123_v14  ;;  %v2025_v36 = vsub.f32 %v4225_v11, %v5132_v62  ;;  %v5135_v55 = vld [vmem:[#allocation38_spill] sm:$0xff] }
 0x2ab   : > { %2351 = vmatpush.msra.mxu1 %v2317_v17  ;;  %v2283_v50 = vmul.f32 %v2219_v13, %v1961_v35  ;;  %v1993_v8 = vmax.f32 %v1929_v61, 0.0  ;;  %v1831_v45 = vand.u32 2147483647, %v1767_v46  ;;  %v1799_v5 = vsub.f32 %v4223_v56, %v5133_v12  ;;  %v5137_v35 = vld [vmem:[#allocation39_spill] sm:$0xff] }
 0x2ac   : > { %v2251_v40 = vmax.f32 %v2187_v39, 0.0  ;;  %v2089_v0 = vand.u32 2147483647, %v2025_v36  ;;  %v2057_v48 = vsub.f32 %v4225_v11, %v5134_v29  ;;  %v1765_v19 = vsub.f32 %v4223_v56, %v5135_v55 }
 0x2ad   : > { %2332 = vmatpush.msra.mxu0 %v2283_v50  ;;  %v1895_v14 = vsub.f32 1.0, %v1831_v45  ;;  %v1863_v1 = vand.u32 2147483647, %v1799_v5  ;;  %v2023_v17 = vsub.f32 %v4225_v11, %v5136_v2  ;;  %v1797_v13 = vsub.f32 %v4223_v56, %v5137_v35  ;;  %v5138_v45 = vld [vmem:[#allocation41_spill] sm:$0xff] }
 0x2ae   : > { %v2315_v61 = vmul.f32 %v2251_v40, %v1993_v8  ;;  %v2153_v46 = vsub.f32 1.0, %v2089_v0  ;;  %v2121_v12 = vand.u32 2147483647, %v2057_v48  ;;  %v1829_v39 = vand.u32 2147483647, %v1765_v19 }
 0x2af   : > { %v1959_v36 = vmax.f32 %v1895_v14, 0.0  ;;  %v1927_v62 = vsub.f32 1.0, %v1863_v1  ;;  %v2087_v47 = vand.u32 2147483647, %v2023_v17  ;;  %v1861_v29 = vand.u32 2147483647, %v1797_v13 }
 0x2b0   : > { %2352 = vmatpush.msra.mxu1 %v2315_v61  ;;  %v2217_v23 = vmax.f32 %v2153_v46, 0.0  ;;  %v2185_v55 = vsub.f32 1.0, %v2121_v12  ;;  %v1893_v50 = vsub.f32 1.0, %v1829_v39  ;;  %v2055_v5 = vsub.f32 %v4225_v11, %v5138_v45  ;;  %v5139_v46 = vld [vmem:[#allocation42_spill] sm:$0xff] }
 0x2b1   : > { %v1991_v37 = vmax.f32 %v1927_v62, 0.0  ;;  %v2151_v2 = vsub.f32 1.0, %v2087_v47  ;;  %v1925_v30 = vsub.f32 1.0, %v1861_v29  ;;  %v1780_v8 = vsub.f32 %v4284_v53, %v3463_v41 }
 0x2b2   : > { %v2281_v40 = vmul.f32 %v2217_v23, %v1959_v36  ;;  %v2249_v0 = vmax.f32 %v2185_v55, 0.0  ;;  %v1957_v48 = vmax.f32 %v1893_v50, 0.0  ;;  %v2119_v19 = vand.u32 2147483647, %v2055_v5  ;;  %v5140_v50 = vld [vmem:[#allocation44_spill] sm:$0xff] }
 0x2b3   : > { %v2215_v1 = vmax.f32 %v2151_v2, 0.0  ;;  %v1989_v14 = vmax.f32 %v1925_v30, 0.0  ;;  %v1844_v17 = vand.u32 2147483647, %v1780_v8  ;;  %v2038_v12 = vsub.f32 %v4286_v7, %v3490_v57 }
 0x2b4   : > { %2333 = vmatpush.msra.mxu0 %v2281_v40  ;;  %v2313_v13 = vmul.f32 %v2249_v0, %v1991_v37  ;;  %v2183_v61 = vsub.f32 1.0, %v2119_v19  ;;  %v1812_v47 = vsub.f32 %v4284_v53, %v3465_v42  ;;  %v2070_v62 = vsub.f32 %v4286_v7, %v3492_v58  ;;  %v5141_v0 = vld [vmem:[#allocation43_spill] sm:$0xff] }
 0x2b5   : > { %v2279_v29 = vmul.f32 %v2215_v1, %v1957_v48  ;;  %v1908_v23 = vsub.f32 1.0, %v1844_v17  ;;  %v2102_v55 = vand.u32 2147483647, %v2038_v12  ;;  %v1763_v2 = vsub.f32 %v4223_v56, %v5139_v46 }
 0x2b6   : > { %2353 = vmatpush.msra.mxu1 %v2313_v13  ;;  %v2247_v30 = vmax.f32 %v2183_v61, 0.0  ;;  %v1876_v39 = vand.u32 2147483647, %v1812_v47  ;;  %v2134_v36 = vand.u32 2147483647, %v2070_v62  ;;  %v2021_v37 = vsub.f32 %v4225_v11, %v5140_v50 }
 0x2b7   : > { %2334 = vmatpush.msra.mxu0 %v2279_v29  ;;  %v1972_v5 = vmax.f32 %v1908_v23, 0.0  ;;  %v2166_v8 = vsub.f32 1.0, %v2102_v55  ;;  %v1827_v40 = vand.u32 2147483647, %v1763_v2  ;;  %v1795_v19 = vsub.f32 %v4223_v56, %v5141_v0 }
 0x2b8   : > { %v2311_v48 = vmul.f32 %v2247_v30, %v1989_v14  ;;  %v1940_v1 = vsub.f32 1.0, %v1876_v39  ;;  %v2198_v17 = vsub.f32 1.0, %v2134_v36  ;;  %v2085_v12 = vand.u32 2147483647, %v2021_v37 }
 0x2b9   : > { %v2230_v58 = vmax.f32 %v2166_v8, 0.0  ;;  %v1891_v42 = vsub.f32 1.0, %v1827_v40  ;;  %v1859_v13 = vand.u32 2147483647, %v1795_v19  ;;  %v2053_v61 = vsub.f32 %v4225_v11, %v5088_v34 }
 0x2ba   : > { %2354 = vmatpush.msra.mxu1 %v2311_v48  ;;  %v2004_v47 = vmax.f32 %v1940_v1, 0.0  ;;  %v2262_v62 = vmax.f32 %v2198_v17, 0.0  ;;  %v2149_v29 = vsub.f32 1.0, %v2085_v12  ;;  %v1778_v23 = vsub.f32 %v4284_v53, %v3467_v43  ;;  %v5142_v1 = vld [vmem:[#allocation46_spill] sm:$0xff] }
 0x2bb   : > { %v2294_v55 = vmul.f32 %v2230_v58, %v1972_v5  ;;  %v1955_v2 = vmax.f32 %v1891_v42, 0.0  ;;  %v1923_v57 = vsub.f32 1.0, %v1859_v13  ;;  %v2117_v14 = vand.u32 2147483647, %v2053_v61 }
 0x2bc   : > { %v2326_v30 = vmul.f32 %v2262_v62, %v2004_v47  ;;  %v2213_v39 = vmax.f32 %v2149_v29, 0.0  ;;  %v1842_v36 = vand.u32 2147483647, %v1778_v23  ;;  %v2036_v37 = vsub.f32 %v4286_v7, %v3496_v60  ;;  %v5143_v47 = vld [vmem:[#allocation48_spill] sm:$0xff] }
 0x2bd   : > { %2367 = vmatpush.msra.mxu2 %v2294_v55  ;;  %v1987_v8 = vmax.f32 %v1923_v57, 0.0  ;;  %v2181_v40 = vsub.f32 1.0, %v2117_v14  ;;  %v1810_v19 = vsub.f32 %v4284_v53, %v3469_v44  ;;  %v2068_v48 = vsub.f32 %v4286_v7, %v3504_v3  ;;  %v5144_v55 = vld [vmem:[#allocation47_spill] sm:$0xff] }
 0x2be   : > { %2387 = vmatpush.msra.mxu3 %v2326_v30  ;;  %v2277_v58 = vmul.f32 %v2213_v39, %v1955_v2  ;;  %v1906_v42 = vsub.f32 1.0, %v1842_v36  ;;  %v2100_v5 = vand.u32 2147483647, %v2036_v37  ;;  %v1761_v17 = vsub.f32 %v4223_v56, %v5142_v1 }
 0x2bf   : > { %v2245_v12 = vmax.f32 %v2181_v40, 0.0  ;;  %v1874_v13 = vand.u32 2147483647, %v1810_v19  ;;  %v2132_v61 = vand.u32 2147483647, %v2068_v48  ;;  %v2019_v57 = vsub.f32 %v4225_v11, %v5143_v47 }
 0x2c0   : > { %2335 = vmatpush.msra.mxu0 %v2277_v58  ;;  %v1970_v62 = vmax.f32 %v1906_v42, 0.0  ;;  %v2164_v29 = vsub.f32 1.0, %v2100_v5  ;;  %v1825_v23 = vand.u32 2147483647, %v1761_v17  ;;  %v1793_v14 = vsub.f32 %v4223_v56, %v5144_v55 }
 0x2c1   : > { %v2309_v30 = vmul.f32 %v2245_v12, %v1987_v8  ;;  %v1938_v2 = vsub.f32 1.0, %v1874_v13  ;;  %v2196_v39 = vsub.f32 1.0, %v2132_v61  ;;  %v2083_v36 = vand.u32 2147483647, %v2019_v57 }
 0x2c2   : > { %v2228_v37 = vmax.f32 %v2164_v29, 0.0  ;;  %v1889_v3 = vsub.f32 1.0, %v1825_v23  ;;  %v1857_v44 = vand.u32 2147483647, %v1793_v14  ;;  %v2051_v40 = vsub.f32 %v4225_v11, %v5092_v6 }
 0x2c3   : > { %2355 = vmatpush.msra.mxu1 %v2309_v30  ;;  %v2002_v19 = vmax.f32 %v1938_v2, 0.0  ;;  %v2260_v48 = vmax.f32 %v2196_v39, 0.0  ;;  %v2147_v58 = vsub.f32 1.0, %v2083_v36  ;;  %v1776_v42 = vsub.f32 %v4284_v53, %v5112_v59  ;;  %v5145_v2 = vld [vmem:[#allocation50_spill] sm:$0xff] }
 0x2c4   : > { %v2292_v5 = vmul.f32 %v2228_v37, %v1970_v62  ;;  %v1953_v17 = vmax.f32 %v1889_v3, 0.0  ;;  %v1921_v60 = vsub.f32 1.0, %v1857_v44  ;;  %v2115_v8 = vand.u32 2147483647, %v2051_v40 }
 0x2c5   : > { %v2324_v12 = vmul.f32 %v2260_v48, %v2002_v19  ;;  %v2211_v13 = vmax.f32 %v2147_v58, 0.0  ;;  %v1840_v61 = vand.u32 2147483647, %v1776_v42  ;;  %v2034_v57 = vsub.f32 %v4286_v7, %v5113_v9  ;;  %v5146_v42 = vld [vmem:[#allocation51_spill] sm:$0xff] }
 0x2c6   : > { %2368 = vmatpush.msra.mxu2 %v2292_v5  ;;  %v1985_v29 = vmax.f32 %v1921_v60, 0.0  ;;  %v2179_v23 = vsub.f32 1.0, %v2115_v8  ;;  %v1808_v14 = vsub.f32 %v4284_v53, %v5114_v20  ;;  %v2066_v30 = vsub.f32 %v4286_v7, %v5115_v21 }
 0x2c7   : > { %2388 = vmatpush.msra.mxu3 %v2324_v12  ;;  %v2275_v62 = vmul.f32 %v2211_v13, %v1953_v17  ;;  %v1904_v3 = vsub.f32 1.0, %v1840_v61  ;;  %v2098_v44 = vand.u32 2147483647, %v2034_v57  ;;  %v1759_v39 = vsub.f32 %v4223_v56, %v5145_v2 }
 0x2c8   : > { %v2243_v36 = vmax.f32 %v2179_v23, 0.0  ;;  %v1872_v37 = vand.u32 2147483647, %v1808_v14  ;;  %v2130_v40 = vand.u32 2147483647, %v2066_v30  ;;  %v2017_v60 = vsub.f32 %v4225_v11, %v5094_v16 }
 0x2c9   : > { %2336 = vmatpush.msra.mxu0 %v2275_v62  ;;  %v1968_v19 = vmax.f32 %v1904_v3, 0.0  ;;  %v2162_v48 = vsub.f32 1.0, %v2098_v44  ;;  %v1823_v58 = vand.u32 2147483647, %v1759_v39  ;;  %v1791_v5 = vsub.f32 %v4223_v56, %v5146_v42 }
 0x2ca   : > { %v2307_v8 = vmul.f32 %v2243_v36, %v1985_v29  ;;  %v1936_v17 = vsub.f32 1.0, %v1872_v37  ;;  %v2194_v12 = vsub.f32 1.0, %v2130_v40  ;;  %v2081_v13 = vand.u32 2147483647, %v2017_v60 }
 0x2cb   : > { %v2226_v61 = vmax.f32 %v2162_v48, 0.0  ;;  %v1887_v57 = vsub.f32 1.0, %v1823_v58  ;;  %v1855_v21 = vand.u32 2147483647, %v1791_v5  ;;  %v2049_v23 = vsub.f32 %v4225_v11, %v5096_v24 }
 0x2cc   : > { %2356 = vmatpush.msra.mxu1 %v2307_v8  ;;  %v2000_v14 = vmax.f32 %v1936_v17, 0.0  ;;  %v2258_v30 = vmax.f32 %v2194_v12, 0.0  ;;  %v2145_v62 = vsub.f32 1.0, %v2081_v13  ;;  %v1774_v3 = vsub.f32 %v4284_v53, %v5116_v22 }
 0x2cd   : > { %v2290_v44 = vmul.f32 %v2226_v61, %v1968_v19  ;;  %v1951_v39 = vmax.f32 %v1887_v57, 0.0  ;;  %v1919_v20 = vsub.f32 1.0, %v1855_v21  ;;  %v2113_v29 = vand.u32 2147483647, %v2049_v23 }
 0x2ce   : > { %v2322_v36 = vmul.f32 %v2258_v30, %v2000_v14  ;;  %v2209_v37 = vmax.f32 %v2145_v62, 0.0  ;;  %v1838_v40 = vand.u32 2147483647, %v1774_v3  ;;  %v2032_v60 = vsub.f32 %v4286_v7, %v5117_v51 }
 0x2cf   : > { %2369 = vmatpush.msra.mxu2 %v2290_v44  ;;  %v1983_v48 = vmax.f32 %v1919_v20, 0.0  ;;  %v2177_v58 = vsub.f32 1.0, %v2113_v29  ;;  %v1806_v5 = vsub.f32 %v4284_v53, %v5118_v18  ;;  %v2064_v8 = vsub.f32 %v4286_v7, %v5119_v49 }
 0x2d0   : > { %2389 = vmatpush.msra.mxu3 %v2322_v36  ;;  %v2273_v19 = vmul.f32 %v2209_v37, %v1951_v39  ;;  %v1902_v17 = vsub.f32 1.0, %v1838_v40  ;;  %v2096_v21 = vand.u32 2147483647, %v2032_v60  ;;  %v1757_v12 = vsub.f32 %v4223_v56, %v5097_v15 }
 0x2d1   : > { %v2241_v13 = vmax.f32 %v2177_v58, 0.0  ;;  %v1870_v61 = vand.u32 2147483647, %v1806_v5  ;;  %v2128_v57 = vand.u32 2147483647, %v2064_v8  ;;  %v2015_v20 = vsub.f32 %v4225_v11, %v5098_v26 }
 0x2d2   : > { %2337 = vmatpush.msra.mxu0 %v2273_v19  ;;  %v1966_v23 = vmax.f32 %v1902_v17, 0.0  ;;  %v2160_v14 = vsub.f32 1.0, %v2096_v21  ;;  %v1821_v30 = vand.u32 2147483647, %v1757_v12  ;;  %v1789_v62 = vsub.f32 %v4223_v56, %v5099_v25 }
 0x2d3   : > { %v2305_v3 = vmul.f32 %v2241_v13, %v1983_v48  ;;  %v1934_v44 = vsub.f32 1.0, %v1870_v61  ;;  %v2192_v39 = vsub.f32 1.0, %v2128_v57  ;;  %v2079_v29 = vand.u32 2147483647, %v2015_v20 }
 0x2d4   : > { %v2224_v36 = vmax.f32 %v2160_v14, 0.0  ;;  %v1885_v37 = vsub.f32 1.0, %v1821_v30  ;;  %v1853_v40 = vand.u32 2147483647, %v1789_v62  ;;  %v2047_v60 = vsub.f32 %v4225_v11, %v5100_v27 }
 0x2d5   : > { %2357 = vmatpush.msra.mxu1 %v2305_v3  ;;  %v1998_v58 = vmax.f32 %v1934_v44, 0.0  ;;  %v2256_v5 = vmax.f32 %v2192_v39, 0.0  ;;  %v2143_v8 = vsub.f32 1.0, %v2079_v29  ;;  %v1772_v19 = vsub.f32 %v4284_v53, %v5120_v10 }
 0x2d6   : > { %v2288_v17 = vmul.f32 %v2224_v36, %v1966_v23  ;;  %v1949_v21 = vmax.f32 %v1885_v37, 0.0  ;;  %v1917_v12 = vsub.f32 1.0, %v1853_v40  ;;  %v2111_v48 = vand.u32 2147483647, %v2047_v60 }
 0x2d7   : > { %v2320_v13 = vmul.f32 %v2256_v5, %v1998_v58  ;;  %v2207_v61 = vmax.f32 %v2143_v8, 0.0  ;;  %v1836_v57 = vand.u32 2147483647, %v1772_v19  ;;  %v2030_v20 = vsub.f32 %v4286_v7, %v5121_v33 }
 0x2d8   : > { %2370 = vmatpush.msra.mxu2 %v2288_v17  ;;  %v1981_v14 = vmax.f32 %v1917_v12, 0.0  ;;  %v2175_v30 = vsub.f32 1.0, %v2111_v48  ;;  %v1804_v62 = vsub.f32 %v4284_v53, %v5122_v31  ;;  %v2062_v3 = vsub.f32 %v4286_v7, %v5123_v28 }
 0x2d9   : > { %2390 = vmatpush.msra.mxu3 %v2320_v13  ;;  %v2271_v23 = vmul.f32 %v2207_v61, %v1949_v21  ;;  %v1900_v44 = vsub.f32 1.0, %v1836_v57  ;;  %v2094_v39 = vand.u32 2147483647, %v2030_v20  ;;  %v1755_v29 = vsub.f32 %v4223_v56, %v5101_v54 }
 0x2da   : > { %v2239_v36 = vmax.f32 %v2175_v30, 0.0  ;;  %v1868_v37 = vand.u32 2147483647, %v1804_v62  ;;  %v2126_v40 = vand.u32 2147483647, %v2062_v3  ;;  %v2013_v60 = vsub.f32 %v4225_v11, %v5102_v32 }
 0x2db   : > { %2338 = vmatpush.msra.mxu0 %v2271_v23  ;;  %v1964_v58 = vmax.f32 %v1900_v44, 0.0  ;;  %v2158_v5 = vsub.f32 1.0, %v2094_v39  ;;  %v1819_v8 = vand.u32 2147483647, %v1755_v29  ;;  %v1787_v19 = vsub.f32 %v4223_v56, %v5103_v52 }
 0x2dc   : > { %v2303_v17 = vmul.f32 %v2239_v36, %v1981_v14  ;;  %v1932_v21 = vsub.f32 1.0, %v1868_v37  ;;  %v2190_v12 = vsub.f32 1.0, %v2126_v40  ;;  %v2077_v48 = vand.u32 2147483647, %v2013_v60 }
 0x2dd   : > { %v2222_v13 = vmax.f32 %v2158_v5, 0.0  ;;  %v1883_v61 = vsub.f32 1.0, %v1819_v8  ;;  %v1851_v57 = vand.u32 2147483647, %v1787_v19  ;;  %v2045_v20 = vsub.f32 %v4225_v11, %v5104_v4  ;;  %v5147_v19 = vld [vmem:[#allocation31_spill] sm:$0xff] }
 0x2de   : > { %2358 = vmatpush.msra.mxu1 %v2303_v17  ;;  %v1996_v30 = vmax.f32 %v1932_v21, 0.0  ;;  %v2254_v62 = vmax.f32 %v2190_v12, 0.0  ;;  %v2141_v3 = vsub.f32 1.0, %v2077_v48  ;;  %v1770_v23 = vsub.f32 %v4284_v53, %v5124_v63  ;;  %v5148_v21 = vld [vmem:[#allocation33_spill] sm:$0xff] }
 0x2df   : > { %v2286_v44 = vmul.f32 %v2222_v13, %v1964_v58  ;;  %v1947_v39 = vmax.f32 %v1883_v61, 0.0  ;;  %v1915_v29 = vsub.f32 1.0, %v1851_v57  ;;  %v2109_v14 = vand.u32 2147483647, %v2045_v20  ;;  %v5149_v61 = vld [vmem:[#allocation62_spill] sm:$0xff] }
 0x2e0   : > { %v2318_v36 = vmul.f32 %v2254_v62, %v1996_v30  ;;  %v2205_v37 = vmax.f32 %v2141_v3, 0.0  ;;  %v1834_v40 = vand.u32 2147483647, %v1770_v23  ;;  %v2028_v60 = vsub.f32 %v4286_v7, %v5125_v38  ;;  %v5150_v3 = vld [vmem:[#allocation64_spill] sm:$0xff] }
 0x2e1   : > { %2371 = vmatpush.msra.mxu2 %v2286_v44  ;;  %v1979_v5 = vmax.f32 %v1915_v29, 0.0  ;;  %v2173_v8 = vsub.f32 1.0, %v2109_v14  ;;  %v1802_v17 = vsub.f32 %v4284_v53, %v5147_v19  ;;  %v2060_v12 = vsub.f32 %v4286_v7, %v5148_v21  ;;  %v5151_v19 = vld [vmem:[#allocation63_spill] sm:$0xff] }
 0x2e2   : > { %2391 = vmatpush.msra.mxu3 %v2318_v36  ;;  %v2269_v58 = vmul.f32 %v2205_v37, %v1947_v39  ;;  %v1898_v48 = vsub.f32 1.0, %v1834_v40  ;;  %v2092_v13 = vand.u32 2147483647, %v2028_v60  ;;  %v1753_v57 = vsub.f32 %v4223_v56, %v5149_v61 }
 0x2e3   : > { %v2237_v20 = vmax.f32 %v2173_v8, 0.0  ;;  %v1866_v30 = vand.u32 2147483647, %v1802_v17  ;;  %v2124_v62 = vand.u32 2147483647, %v2060_v12  ;;  %v2011_v23 = vsub.f32 %v4225_v11, %v5150_v3  ;;  %v5152_v8 = vld [vmem:[#allocation65_spill] sm:$0xff] }
 0x2e4   : > { %2339 = vmatpush.msra.mxu0 %v2269_v58  ;;  %v1962_v44 = vmax.f32 %v1898_v48, 0.0  ;;  %v2156_v29 = vsub.f32 1.0, %v2092_v13  ;;  %v1817_v14 = vand.u32 2147483647, %v1753_v57  ;;  %v1785_v21 = vsub.f32 %v4223_v56, %v5151_v19  ;;  %v5153_v48 = vld [vmem:[#allocation34_spill] sm:$0xff] }
 0x2e5   : > { %v2301_v36 = vmul.f32 %v2237_v20, %v1979_v5  ;;  %v1930_v39 = vsub.f32 1.0, %v1866_v30  ;;  %v2188_v37 = vsub.f32 1.0, %v2124_v62  ;;  %v2075_v40 = vand.u32 2147483647, %v2011_v23  ;;  %v5154_v23 = vld [vmem:[#allocation36_spill] sm:$0xff] }
 0x2e6   : > { %v2220_v60 = vmax.f32 %v2156_v29, 0.0  ;;  %v1881_v38 = vsub.f32 1.0, %v1817_v14  ;;  %v1849_v63 = vand.u32 2147483647, %v1785_v21  ;;  %v2043_v17 = vsub.f32 %v4225_v11, %v5152_v8 }
 0x2e7   : > { %2359 = vmatpush.msra.mxu1 %v2301_v36  ;;  %v1994_v12 = vmax.f32 %v1930_v39, 0.0  ;;  %v2252_v28 = vmax.f32 %v2188_v37, 0.0  ;;  %v2139_v58 = vsub.f32 1.0, %v2075_v40  ;;  %v1768_v13 = vsub.f32 %v4284_v53, %v5153_v48  ;;  %v5155_v36 = vld [vmem:[#allocation35_spill] sm:$0xff]  ;;  %v5156_v37 = vld [vmem:[#allocation37_spill] sm:$0xff] }
 0x2e8   : > { %v2284_v57 = vmul.f32 %v2220_v60, %v1962_v44  ;;  %v1945_v31 = vmax.f32 %v1881_v38, 0.0  ;;  %v1913_v33 = vsub.f32 1.0, %v1849_v63  ;;  %v2107_v5 = vand.u32 2147483647, %v2043_v17  ;;  %v5157_v60 = vld [vmem:[#allocation66_spill] sm:$0xff] }
 0x2e9   : > { %v2316_v20 = vmul.f32 %v2252_v28, %v1994_v12  ;;  %v2203_v30 = vmax.f32 %v2139_v58, 0.0  ;;  %v1832_v62 = vand.u32 2147483647, %v1768_v13  ;;  %v2026_v21 = vsub.f32 %v4286_v7, %v5154_v23  ;;  %v5158_v13 = vld [vmem:[#allocation68_spill] sm:$0xff]  ;;  %v5159_v23 = vld [vmem:[#allocation67_spill] sm:$0xff] }
 0x2ea   : > { %2372 = vmatpush.msra.mxu2 %v2284_v57  ;;  %v1977_v29 = vmax.f32 %v1913_v33, 0.0  ;;  %v2171_v14 = vsub.f32 1.0, %v2107_v5  ;;  %v1800_v39 = vsub.f32 %v4284_v53, %v5155_v36  ;;  %v2058_v40 = vsub.f32 %v4286_v7, %v5156_v37 }
 0x2eb   : > { %2392 = vmatpush.msra.mxu3 %v2316_v20  ;;  %v2267_v44 = vmul.f32 %v2203_v30, %v1945_v31  ;;  %v1896_v38 = vsub.f32 1.0, %v1832_v62  ;;  %v2090_v63 = vand.u32 2147483647, %v2026_v21  ;;  %v1751_v28 = vsub.f32 %v4223_v56, %v5157_v60 }
 0x2ec   : > { %v2235_v17 = vmax.f32 %v2171_v14, 0.0  ;;  %v1864_v12 = vand.u32 2147483647, %v1800_v39  ;;  %v2122_v58 = vand.u32 2147483647, %v2058_v40  ;;  %v2009_v33 = vsub.f32 %v4225_v11, %v5158_v13  ;;  %v5160_v14 = vld [vmem:[#allocation69_spill] sm:$0xff] }
 0x2ed   : > { %2340 = vmatpush.msra.mxu0 %v2267_v44  ;;  %v1960_v57 = vmax.f32 %v1896_v38, 0.0  ;;  %v2154_v5 = vsub.f32 1.0, %v2090_v63  ;;  %v1815_v36 = vand.u32 2147483647, %v1751_v28  ;;  %v1783_v37 = vsub.f32 %v4223_v56, %v5159_v23  ;;  %v5161_v38 = vld [vmem:[#allocation38_spill] sm:$0xff] }
 0x2ee   : > { %v2299_v20 = vmul.f32 %v2235_v17, %v1977_v29  ;;  %v1928_v31 = vsub.f32 1.0, %v1864_v12  ;;  %v2186_v30 = vsub.f32 1.0, %v2122_v58  ;;  %v2073_v62 = vand.u32 2147483647, %v2009_v33  ;;  %v5162_v33 = vld [vmem:[#allocation40_spill] sm:$0xff] }
 0x2ef   : > { %v2218_v21 = vmax.f32 %v2154_v5, 0.0  ;;  %v1879_v48 = vsub.f32 1.0, %v1815_v36  ;;  %v1847_v10 = vand.u32 2147483647, %v1783_v37  ;;  %v2041_v39 = vsub.f32 %v4225_v11, %v5160_v14 }
 0x2f0   : > { %2360 = vmatpush.msra.mxu1 %v2299_v20  ;;  %v1992_v40 = vmax.f32 %v1928_v31, 0.0  ;;  %v2250_v49 = vmax.f32 %v2186_v30, 0.0  ;;  %v2137_v44 = vsub.f32 1.0, %v2073_v62  ;;  %v1766_v63 = vsub.f32 %v4284_v53, %v5161_v38  ;;  %v5163_v30 = vld [vmem:[#allocation70_spill] sm:$0xff] }
 0x2f1   : > { %v2282_v28 = vmul.f32 %v2218_v21, %v1960_v57  ;;  %v1943_v18 = vmax.f32 %v1879_v48, 0.0  ;;  %v1911_v51 = vsub.f32 1.0, %v1847_v10  ;;  %v2105_v29 = vand.u32 2147483647, %v2041_v39 }
 0x2f2   : > { %v2314_v17 = vmul.f32 %v2250_v49, %v1992_v40  ;;  %v2201_v12 = vmax.f32 %v2137_v44, 0.0  ;;  %v1830_v58 = vand.u32 2147483647, %v1766_v63  ;;  %v2024_v36 = vsub.f32 %v4286_v7, %v5162_v33  ;;  %v5164_v40 = vld [vmem:[#allocation72_spill] sm:$0xff] }
 0x2f3   : > { %2373 = vmatpush.msra.mxu2 %v2282_v28  ;;  %v1975_v37 = vmax.f32 %v1911_v51, 0.0  ;;  %v2169_v5 = vsub.f32 1.0, %v2105_v29  ;;  %v1798_v20 = vsub.f32 %v4284_v53, %v5137_v35  ;;  %v2056_v31 = vsub.f32 %v4286_v7, %v5138_v45  ;;  %v5165_v29 = vld [vmem:[#allocation71_spill] sm:$0xff] }
 0x2f4   : > { %2393 = vmatpush.msra.mxu3 %v2314_v17  ;;  %v2265_v57 = vmul.f32 %v2201_v12, %v1943_v18  ;;  %v1894_v48 = vsub.f32 1.0, %v1830_v58  ;;  %v2088_v10 = vand.u32 2147483647, %v2024_v36  ;;  %v1749_v49 = vsub.f32 %v4223_v56, %v5163_v30 }
 0x2f5   : > { %v2233_v62 = vmax.f32 %v2169_v5, 0.0  ;;  %v1862_v21 = vand.u32 2147483647, %v1798_v20  ;;  %v2120_v39 = vand.u32 2147483647, %v2056_v31  ;;  %v2007_v51 = vsub.f32 %v4225_v11, %v5164_v40  ;;  %v5166_v5 = vld [vmem:[#allocation73_spill] sm:$0xff] }
 0x2f6   : > { %2341 = vmatpush.msra.mxu0 %v2265_v57  ;;  %v1958_v44 = vmax.f32 %v1894_v48, 0.0  ;;  %v2152_v63 = vsub.f32 1.0, %v2088_v10  ;;  %v1813_v28 = vand.u32 2147483647, %v1749_v49  ;;  %v1781_v45 = vsub.f32 %v4223_v56, %v5165_v29 }
 0x2f7   : > { %v2297_v17 = vmul.f32 %v2233_v62, %v1975_v37  ;;  %v1926_v18 = vsub.f32 1.0, %v1862_v21  ;;  %v2184_v12 = vsub.f32 1.0, %v2120_v39  ;;  %v2071_v58 = vand.u32 2147483647, %v2007_v51 }
 0x2f8   : > { %v2216_v36 = vmax.f32 %v2152_v63, 0.0  ;;  %v1877_v35 = vsub.f32 1.0, %v1813_v28  ;;  %v1845_v33 = vand.u32 2147483647, %v1781_v45  ;;  %v2039_v20 = vsub.f32 %v4225_v11, %v5166_v5 }
 0x2f9   : > { %2361 = vmatpush.msra.mxu1 %v2297_v17  ;;  %v1990_v31 = vmax.f32 %v1926_v18, 0.0  ;;  %v2248_v38 = vmax.f32 %v2184_v12, 0.0  ;;  %v2135_v57 = vsub.f32 1.0, %v2071_v58  ;;  %v1764_v48 = vsub.f32 %v4284_v53, %v5139_v46 }
 0x2fa   : > { %v2280_v10 = vmul.f32 %v2216_v36, %v1958_v44  ;;  %v1941_v49 = vmax.f32 %v1877_v35, 0.0  ;;  %v1909_v56 = vsub.f32 1.0, %v1845_v33  ;;  %v2103_v37 = vand.u32 2147483647, %v2039_v20 }
 0x2fb   : > { %v2312_v62 = vmul.f32 %v2248_v38, %v1990_v31  ;;  %v2199_v21 = vmax.f32 %v2135_v57, 0.0  ;;  %v1828_v39 = vand.u32 2147483647, %v1764_v48  ;;  %v2022_v45 = vsub.f32 %v4286_v7, %v5140_v50 }
 0x2fc   : > { %2374 = vmatpush.msra.mxu2 %v2280_v10  ;;  %v1973_v51 = vmax.f32 %v1909_v56, 0.0  ;;  %v2167_v11 = vsub.f32 1.0, %v2103_v37  ;;  %v1796_v63 = vsub.f32 %v4284_v53, %v5141_v0  ;;  %v2054_v28 = vsub.f32 %v4286_v7, %v5088_v34  ;;  %v5167_v56 = vld [vmem:[#allocation45_spill] sm:$0xff] }
 0x2fd   : > { %2394 = vmatpush.msra.mxu3 %v2312_v62  ;;  %v2263_v44 = vmul.f32 %v2199_v21, %v1941_v49  ;;  %v1892_v35 = vsub.f32 1.0, %v1828_v39  ;;  %v2086_v33 = vand.u32 2147483647, %v2022_v45  ;;  %v1762_v38 = vsub.f32 %v4284_v53, %v5142_v1 }
 0x2fe   : > { %v2231_v17 = vmax.f32 %v2167_v11, 0.0  ;;  %v1860_v18 = vand.u32 2147483647, %v1796_v63  ;;  %v2118_v12 = vand.u32 2147483647, %v2054_v28  ;;  %v2020_v58 = vsub.f32 %v4286_v7, %v5143_v47 }
 0x2ff   : > { %2342 = vmatpush.msra.mxu0 %v2263_v44  ;;  %v1956_v36 = vmax.f32 %v1892_v35, 0.0  ;;  %v2150_v20 = vsub.f32 1.0, %v2086_v33  ;;  %v1826_v31 = vand.u32 2147483647, %v1762_v38  ;;  %v1794_v57 = vsub.f32 %v4284_v53, %v5144_v55 }
 0x300   : > { %v2295_v48 = vmul.f32 %v2231_v17, %v1973_v51  ;;  %v1924_v10 = vsub.f32 1.0, %v1860_v18  ;;  %v2182_v49 = vsub.f32 1.0, %v2118_v12  ;;  %2343 = vmatmul.f32.vlgmr.msra.gmra.mxu0 %v5167_v56  ;;  %v2084_v37 = vand.u32 2147483647, %v2020_v58  ;;  %v5168_v51 = vld [vmem:[#allocation49_spill] sm:$0xff] }
 0x301   : > { %v2214_v62 = vmax.f32 %v2150_v20, 0.0  ;;  %v1890_v21 = vsub.f32 1.0, %v1826_v31  ;;  %v1858_v39 = vand.u32 2147483647, %v1794_v57  ;;  %v2052_v45 = vsub.f32 %v4286_v7, %v5092_v6 }
 0x302   : > { %2362 = vmatpush.msra.mxu1 %v2295_v48  ;;  %v1988_v11 = vmax.f32 %v1924_v10, 0.0  ;;  %v2246_v63 = vmax.f32 %v2182_v49, 0.0  ;;  %v2148_v28 = vsub.f32 1.0, %v2084_v37  ;;  %v1760_v44 = vsub.f32 %v4284_v53, %v5145_v2 }
 0x303   : > { %v2278_v35 = vmul.f32 %v2214_v62, %v1956_v36  ;;  %2363 = vmatmul.f32.vlgmr.msra.gmra.mxu1 %v5168_v51  ;;  %v1954_v33 = vmax.f32 %v1890_v21, 0.0  ;;  %v1922_v38 = vsub.f32 1.0, %v1858_v39  ;;  %v2116_v17 = vand.u32 2147483647, %v2052_v45 }
 0x304   : > { %v2310_v18 = vmul.f32 %v2246_v63, %v1988_v11  ;;  %v2212_v12 = vmax.f32 %v2148_v28, 0.0  ;;  %v1824_v58 = vand.u32 2147483647, %v1760_v44  ;;  %v2018_v20 = vsub.f32 %v4286_v7, %v5094_v16 }
 0x305   : > { %2375 = vmatpush.msra.mxu2 %v2278_v35  ;;  %v1986_v31 = vmax.f32 %v1922_v38, 0.0  ;;  %v2180_v57 = vsub.f32 1.0, %v2116_v17  ;;  %v1792_v48 = vsub.f32 %v4284_v53, %v5146_v42  ;;  %v2050_v36 = vsub.f32 %v4286_v7, %v5096_v24 }
 0x306   : > { %2395 = vmatpush.msra.mxu3 %v2310_v18  ;;  %v2276_v10 = vmul.f32 %v2212_v12, %v1954_v33  ;;  %v1888_v49 = vsub.f32 1.0, %v1824_v58  ;;  %v2082_v37 = vand.u32 2147483647, %v2018_v20  ;;  %v1758_v62 = vsub.f32 %v4284_v53, %v5097_v15 }
 0x307   : > { %v2244_v21 = vmax.f32 %v2180_v57, 0.0  ;;  %v1856_v39 = vand.u32 2147483647, %v1792_v48  ;;  %v2114_v45 = vand.u32 2147483647, %v2050_v36  ;;  %v2016_v11 = vsub.f32 %v4286_v7, %v5098_v26 }
 0x308   : > { %2376 = vmatpush.msra.mxu2 %v2276_v10  ;;  %v1952_v63 = vmax.f32 %v1888_v49, 0.0  ;;  %v2146_v28 = vsub.f32 1.0, %v2082_v37  ;;  %v1822_v44 = vand.u32 2147483647, %v1758_v62  ;;  %v1790_v35 = vsub.f32 %v4284_v53, %v5099_v25 }
 0x309   : > { %v2308_v38 = vmul.f32 %v2244_v21, %v1986_v31  ;;  %v1920_v33 = vsub.f32 1.0, %v1856_v39  ;;  %v2178_v17 = vsub.f32 1.0, %v2114_v45  ;;  %v2080_v18 = vand.u32 2147483647, %v2016_v11 }
 0x30a   : > { %v2210_v12 = vmax.f32 %v2146_v28, 0.0  ;;  %v1886_v58 = vsub.f32 1.0, %v1822_v44  ;;  %v1854_v20 = vand.u32 2147483647, %v1790_v35  ;;  %v2048_v57 = vsub.f32 %v4286_v7, %v5100_v27 }
 0x30b   : > { %2396 = vmatpush.msra.mxu3 %v2308_v38  ;;  %v1984_v48 = vmax.f32 %v1920_v33, 0.0  ;;  %v2242_v36 = vmax.f32 %v2178_v17, 0.0  ;;  %v2144_v10 = vsub.f32 1.0, %v2080_v18  ;;  %v1756_v49 = vsub.f32 %v4284_v53, %v5101_v54 }
 0x30c   : > { %v2274_v37 = vmul.f32 %v2210_v12, %v1952_v63  ;;  %v1950_v62 = vmax.f32 %v1886_v58, 0.0  ;;  %v1918_v25 = vsub.f32 1.0, %v1854_v20  ;;  %v2112_v31 = vand.u32 2147483647, %v2048_v57 }
 0x30d   : > { %v2306_v21 = vmul.f32 %v2242_v36, %v1984_v48  ;;  %v2208_v39 = vmax.f32 %v2144_v10, 0.0  ;;  %v1820_v45 = vand.u32 2147483647, %v1756_v49  ;;  %v2014_v11 = vsub.f32 %v4286_v7, %v5102_v32 }
 0x30e   : > { %2377 = vmatpush.msra.mxu2 %v2274_v37  ;;  %v1982_v28 = vmax.f32 %v1918_v25, 0.0  ;;  %v2176_v44 = vsub.f32 1.0, %v2112_v31  ;;  %v1788_v35 = vsub.f32 %v4284_v53, %v5103_v52  ;;  %v2046_v38 = vsub.f32 %v4286_v7, %v5104_v4 }
 0x30f   : > { %2397 = vmatpush.msra.mxu3 %v2306_v21  ;;  %v2272_v63 = vmul.f32 %v2208_v39, %v1950_v62  ;;  %v1884_v33 = vsub.f32 1.0, %v1820_v45  ;;  %v2078_v17 = vand.u32 2147483647, %v2014_v11  ;;  %v1754_v18 = vsub.f32 %v4284_v53, %v5149_v61 }
 0x310   : > { %v2240_v12 = vmax.f32 %v2176_v44, 0.0  ;;  %v1852_v58 = vand.u32 2147483647, %v1788_v35  ;;  %v2110_v20 = vand.u32 2147483647, %v2046_v38  ;;  %v2012_v25 = vsub.f32 %v4286_v7, %v5150_v3 }
 0x311   : > { %2378 = vmatpush.msra.mxu2 %v2272_v63  ;;  %v1948_v57 = vmax.f32 %v1884_v33, 0.0  ;;  %v2142_v48 = vsub.f32 1.0, %v2078_v17  ;;  %v1818_v36 = vand.u32 2147483647, %v1754_v18  ;;  %v1786_v10 = vsub.f32 %v4284_v53, %v5151_v19 }
 0x312   : > { %v2304_v49 = vmul.f32 %v2240_v12, %v1982_v28  ;;  %v1916_v37 = vsub.f32 1.0, %v1852_v58  ;;  %v2174_v62 = vsub.f32 1.0, %v2110_v20  ;;  %v2076_v31 = vand.u32 2147483647, %v2012_v25 }
 0x313   : > { %v2206_v21 = vmax.f32 %v2142_v48, 0.0  ;;  %v1882_v39 = vsub.f32 1.0, %v1818_v36  ;;  %v1850_v45 = vand.u32 2147483647, %v1786_v10  ;;  %v2044_v11 = vsub.f32 %v4286_v7, %v5152_v8 }
 0x314   : > { %2398 = vmatpush.msra.mxu3 %v2304_v49  ;;  %v1980_v44 = vmax.f32 %v1916_v37, 0.0  ;;  %v2238_v35 = vmax.f32 %v2174_v62, 0.0  ;;  %v2140_v38 = vsub.f32 1.0, %v2076_v31  ;;  %v1752_v63 = vsub.f32 %v4284_v53, %v5157_v60 }
 0x315   : > { %v2270_v33 = vmul.f32 %v2206_v21, %v1948_v57  ;;  %v1946_v17 = vmax.f32 %v1882_v39, 0.0  ;;  %v1914_v18 = vsub.f32 1.0, %v1850_v45  ;;  %v2108_v28 = vand.u32 2147483647, %v2044_v11 }
 0x316   : > { %v2302_v12 = vmul.f32 %v2238_v35, %v1980_v44  ;;  %v2204_v58 = vmax.f32 %v2140_v38, 0.0  ;;  %v1816_v20 = vand.u32 2147483647, %v1752_v63  ;;  %v2010_v25 = vsub.f32 %v4286_v7, %v5158_v13 }
 0x317   : > { %2379 = vmatpush.msra.mxu2 %v2270_v33  ;;  %v1978_v48 = vmax.f32 %v1914_v18, 0.0  ;;  %v2172_v36 = vsub.f32 1.0, %v2108_v28  ;;  %v1784_v10 = vsub.f32 %v4284_v53, %v5159_v23  ;;  %v2042_v49 = vsub.f32 %v4286_v7, %v5160_v14 }
 0x318   : > { %2399 = vmatpush.msra.mxu3 %v2302_v12  ;;  %v2268_v57 = vmul.f32 %v2204_v58, %v1946_v17  ;;  %v1880_v37 = vsub.f32 1.0, %v1816_v20  ;;  %v2074_v62 = vand.u32 2147483647, %v2010_v25  ;;  %v1750_v31 = vsub.f32 %v4284_v53, %v5163_v30 }
 0x319   : > { %v2236_v21 = vmax.f32 %v2172_v36, 0.0  ;;  %v1848_v39 = vand.u32 2147483647, %v1784_v10  ;;  %v2106_v45 = vand.u32 2147483647, %v2042_v49  ;;  %v2008_v11 = vsub.f32 %v4286_v7, %v5164_v40 }
 0x31a   : > { %2380 = vmatpush.msra.mxu2 %v2268_v57  ;;  %v1944_v44 = vmax.f32 %v1880_v37, 0.0  ;;  %v2138_v35 = vsub.f32 1.0, %v2074_v62  ;;  %v1814_v38 = vand.u32 2147483647, %v1750_v31  ;;  %v1782_v63 = vsub.f32 %v4284_v53, %v5165_v29 }
 0x31b   : > { %v2300_v33 = vmul.f32 %v2236_v21, %v1978_v48  ;;  %v1912_v17 = vsub.f32 1.0, %v1848_v39  ;;  %v2170_v18 = vsub.f32 1.0, %v2106_v45  ;;  %v2072_v28 = vand.u32 2147483647, %v2008_v11 }
 0x31c   : > { %v2202_v12 = vmax.f32 %v2138_v35, 0.0  ;;  %v1878_v58 = vsub.f32 1.0, %v1814_v38  ;;  %v1846_v20 = vand.u32 2147483647, %v1782_v63  ;;  %v2040_v25 = vsub.f32 %v4286_v7, %v5166_v5  ;;  %v5170_v63 = vld [vmem:[#allocation8_spill] sm:$0xff] }
 0x31d   : > { %2400 = vmatpush.msra.mxu3 %v2300_v33  ;;  %v1976_v36 = vmax.f32 %v1912_v17, 0.0  ;;  %v2234_v10 = vmax.f32 %v2170_v18, 0.0  ;;  %v2136_v49 = vsub.f32 1.0, %v2072_v28  ;;  %v5171_v17 = vld [vmem:[#allocation12_spill] sm:$0xff] }
 0x31e   : > { %v2266_v57 = vmul.f32 %v2202_v12, %v1944_v44  ;;  %v1942_v37 = vmax.f32 %v1878_v58, 0.0  ;;  %v1910_v62 = vsub.f32 1.0, %v1846_v20  ;;  %v2104_v31 = vand.u32 2147483647, %v2040_v25  ;;  %v5172_v58 = vld [vmem:[#allocation14_spill] sm:$0xff] }
 0x31f   : > { %v2298_v40 = vmul.f32 %v2234_v10, %v1976_v36  ;;  %v2200_v53 = vmax.f32 %v2136_v49, 0.0  ;;  %v5173_v25 = vld [vmem:[#allocation10_spill] sm:$0xff]  ;;  %v5174_v36 = vld [vmem:[#allocation15_spill] sm:$0xff] }
 0x320   : > { %2381 = vmatpush.msra.mxu2 %v2266_v57  ;;  %v1974_v48 = vmax.f32 %v1910_v62, 0.0  ;;  %v2168_v21 = vsub.f32 1.0, %v2104_v31 }
 0x321   : > { %2401 = vmatpush.msra.mxu3 %v2298_v40  ;;  %v2264_v39 = vmul.f32 %v2200_v53, %v1942_v37 }
 0x322   : > { %v2232_v45 = vmax.f32 %v2168_v21, 0.0 }
 0x323   : > { %2382 = vmatpush.msra.mxu2 %v2264_v39 }
 0x324   : > { %v2296_v11 = vmul.f32 %v2232_v45, %v1974_v48  ;;  %2383 = vmatmul.f32.vlgmr.msra.gmra.mxu2 %v5167_v56 }
 0x326   : > { %2402 = vmatpush.msra.mxu3 %v2296_v11 }
 0x327   : > { %2403 = vmatmul.f32.vlgmr.msra.gmra.mxu3 %v5168_v51 }
 0x37d   : > { %v2344_v7 = vpop.f32.mrf.mxu0 }
 0x380   : > { %v2364_v44 = vpop.f32.mrf.mxu1 }
 0x381   : > { %v2365_v35 = vadd.f32 %v2364_v44, %v2344_v7 }
 0x383   : > { %v4499_v38 = vadd.f32 %v2365_v35, %v5167_v56 }
 0x385   : > { %5169 = vst [vmem:[#allocation52_spill] sm:$0xff] %v4499_v38  ;;  %v2409_v33 = vadd.f32 %v4499_v38, %v5170_v63  ;;  %v2411_v40 = vadd.f32 %v4499_v38, %v5171_v17  ;;  %v5175_v63 = vld [vmem:[#allocation16_spill] sm:$0xff]  ;;  %v5176_v17 = vld [vmem:[#allocation11_spill] sm:$0xff] }
 0x387   : > { %v4505_v18 = vperm.slane %v2409_v33, 0  ;;  %v4507_v28 = vperm.slane %v2411_v40, 1 }
 0x389   : > { %v2445_v12 = vsub.f32 %v4505_v18, %v3463_v41  ;;  %v2703_v20 = vsub.f32 %v4507_v28, %v5172_v58  ;;  %v2477_v56 = vsub.f32 %v4505_v18, %v5173_v25  ;;  %v2735_v10 = vsub.f32 %v4507_v28, %v5174_v36 }
 0x38a   : > { %v2443_v35 = vsub.f32 %v4505_v18, %v3467_v43  ;;  %v2701_v33 = vsub.f32 %v4507_v28, %v5175_v63  ;;  %v2475_v40 = vsub.f32 %v4505_v18, %v5176_v17 }
 0x38b   : > { %v2509_v49 = vand.u32 2147483647, %v2445_v12  ;;  %v2767_v57 = vand.u32 2147483647, %v2703_v20  ;;  %v2541_v37 = vand.u32 2147483647, %v2477_v56 }
 0x38c   : > { %v2799_v62 = vand.u32 2147483647, %v2735_v10  ;;  %v5177_v20 = vld [vmem:[#allocation17_spill] sm:$0xff]  ;;  %v2441_v10 = vsub.f32 %v4505_v18, %v5112_v59 }
 0x38d   : > { %v2573_v31 = vsub.f32 1.0, %v2509_v49  ;;  %v2831_v53 = vsub.f32 1.0, %v2767_v57  ;;  %v2605_v48 = vsub.f32 1.0, %v2541_v37  ;;  %v2733_v56 = vsub.f32 %v4507_v28, %v5177_v20 }
 0x38e   : > { %v2863_v21 = vsub.f32 1.0, %v2799_v62  ;;  %v2699_v49 = vsub.f32 %v4507_v28, %v5113_v9  ;;  %v2507_v57 = vand.u32 2147483647, %v2443_v35  ;;  %v2765_v37 = vand.u32 2147483647, %v2701_v33 }
 0x38f   : > { %v2637_v39 = vmax.f32 %v2573_v31, 0.0  ;;  %v2895_v45 = vmax.f32 %v2831_v53, 0.0  ;;  %v2669_v11 = vmax.f32 %v2605_v48, 0.0  ;;  %v2539_v62 = vand.u32 2147483647, %v2475_v40  ;;  %v5178_v31 = vld [vmem:[#allocation19_spill] sm:$0xff] }
 0x390   : > { %v2927_v7 = vmax.f32 %v2863_v21, 0.0  ;;  %v2473_v53 = vsub.f32 %v4505_v18, %v5178_v31  ;;  %v2797_v48 = vand.u32 2147483647, %v2733_v56  ;;  %v2505_v21 = vand.u32 2147483647, %v2441_v10 }
 0x391   : > { %v2959_v44 = vmul.f32 %v2895_v45, %v2637_v39  ;;  %v2763_v39 = vand.u32 2147483647, %v2699_v49  ;;  %v5179_v45 = vld [vmem:[#allocation21_spill] sm:$0xff]  ;;  %v2829_v38 = vsub.f32 1.0, %v2765_v37  ;;  %v2603_v5 = vsub.f32 1.0, %v2539_v62  ;;  %v5180_v37 = vld [vmem:[#allocation24_spill] sm:$0xff] }
 0x392   : > { %v2991_v12 = vmul.f32 %v2927_v7, %v2669_v11  ;;  %v2731_v11 = vsub.f32 %v4507_v28, %v5179_v45  ;;  %v2571_v7 = vsub.f32 1.0, %v2507_v57  ;;  %v2537_v29 = vand.u32 2147483647, %v2473_v53 }
 0x393   : > { %2993 = vmatpush.msrb.mxu0 %v2959_v44  ;;  %v2861_v30 = vsub.f32 1.0, %v2797_v48  ;;  %v2569_v14 = vsub.f32 1.0, %v2505_v21  ;;  %v2827_v44 = vsub.f32 1.0, %v2763_v39  ;;  %v2893_v40 = vmax.f32 %v2829_v38, 0.0  ;;  %v5181_v39 = vld [vmem:[#allocation23_spill] sm:$0xff] }
 0x394   : > { %3013 = vmatpush.msrb.mxu1 %v2991_v12  ;;  %v2795_v35 = vand.u32 2147483647, %v2731_v11  ;;  %v2635_v33 = vmax.f32 %v2571_v7, 0.0  ;;  %v2667_v23 = vmax.f32 %v2603_v5, 0.0  ;;  %v2601_v13 = vsub.f32 1.0, %v2537_v29  ;;  %v5183_v11 = vld [vmem:[#allocation26_spill] sm:$0xff] }
 0x395   : > { %v2925_v60 = vmax.f32 %v2861_v30, 0.0  ;;  %v2633_v12 = vmax.f32 %v2569_v14, 0.0  ;;  %v2891_v56 = vmax.f32 %v2827_v44, 0.0  ;;  %v2439_v57 = vsub.f32 %v4505_v18, %v5116_v22  ;;  %v5182_v14 = vld [vmem:[#allocation25_spill] sm:$0xff]  ;;  %v5196_v22 = vld [vmem:[#allocation40_spill] sm:$0xff] }
 0x396   : > { %v2859_v10 = vsub.f32 1.0, %v2795_v35  ;;  %v2957_v49 = vmul.f32 %v2893_v40, %v2635_v33  ;;  %v2665_v8 = vmax.f32 %v2601_v13, 0.0  ;;  %v2697_v62 = vsub.f32 %v4507_v28, %v5180_v37  ;;  %v5184_v35 = vld [vmem:[#allocation28_spill] sm:$0xff] }
 0x397   : > { %v2989_v53 = vmul.f32 %v2925_v60, %v2667_v23  ;;  %v2955_v48 = vmul.f32 %v2891_v56, %v2633_v12  ;;  %v2471_v38 = vsub.f32 %v4505_v18, %v5181_v39  ;;  %v2503_v29 = vand.u32 2147483647, %v2439_v57  ;;  %v5185_v60 = vld [vmem:[#allocation27_spill] sm:$0xff] }
 0x398   : > { %v2923_v21 = vmax.f32 %v2859_v10, 0.0  ;;  %2994 = vmatpush.msrb.mxu0 %v2957_v49  ;;  %v2761_v30 = vand.u32 2147483647, %v2697_v62  ;;  %v2729_v5 = vsub.f32 %v4507_v28, %v5182_v14  ;;  %v2437_v13 = vsub.f32 %v4505_v18, %v5183_v11  ;;  %v5186_v14 = vld [vmem:[#allocation29_spill] sm:$0xff] }
 0x399   : > { %3014 = vmatpush.msrb.mxu1 %v2989_v53  ;;  %v2535_v44 = vand.u32 2147483647, %v2471_v38  ;;  %v2695_v23 = vsub.f32 %v4507_v28, %v5184_v35  ;;  %v2469_v33 = vsub.f32 %v4505_v18, %v5185_v60  ;;  %v2567_v40 = vsub.f32 1.0, %v2503_v29 }
 0x39a   : > { %v2987_v7 = vmul.f32 %v2923_v21, %v2665_v8  ;;  %2995 = vmatpush.msrb.mxu0 %v2955_v48  ;;  %v2825_v12 = vsub.f32 1.0, %v2761_v30  ;;  %v2793_v56 = vand.u32 2147483647, %v2729_v5  ;;  %v2501_v10 = vand.u32 2147483647, %v2437_v13  ;;  %v5187_v5 = vld [vmem:[#allocation30_spill] sm:$0xff] }
 0x39b   : > { %v2599_v49 = vsub.f32 1.0, %v2535_v44  ;;  %v2759_v57 = vand.u32 2147483647, %v2695_v23  ;;  %v2533_v62 = vand.u32 2147483647, %v2469_v33  ;;  %v2727_v53 = vsub.f32 %v4507_v28, %v5186_v14  ;;  %v5188_v33 = vld [vmem:[#allocation32_spill] sm:$0xff] }
 0x39c   : > { %3015 = vmatpush.msrb.mxu1 %v2987_v7  ;;  %v2631_v8 = vmax.f32 %v2567_v40, 0.0  ;;  %v2889_v21 = vmax.f32 %v2825_v12, 0.0  ;;  %v2857_v38 = vsub.f32 1.0, %v2793_v56  ;;  %v2565_v11 = vsub.f32 1.0, %v2501_v10  ;;  %v5189_v56 = vld [vmem:[#allocation31_spill] sm:$0xff] }
 0x39d   : > { %v2663_v35 = vmax.f32 %v2599_v49, 0.0  ;;  %v2823_v39 = vsub.f32 1.0, %v2759_v57  ;;  %v2597_v37 = vsub.f32 1.0, %v2533_v62  ;;  %v2791_v60 = vand.u32 2147483647, %v2727_v53  ;;  %v5190_v49 = vld [vmem:[#allocation33_spill] sm:$0xff] }
 0x39e   : > { %v2953_v48 = vmul.f32 %v2889_v21, %v2631_v8  ;;  %v2921_v29 = vmax.f32 %v2857_v38, 0.0  ;;  %v2629_v30 = vmax.f32 %v2565_v11, 0.0  ;;  %v2435_v13 = vsub.f32 %v4505_v18, %v5187_v5  ;;  %v5191_v8 = vld [vmem:[#allocation34_spill] sm:$0xff]  ;;  %v5192_v38 = vld [vmem:[#allocation36_spill] sm:$0xff] }
 0x39f   : > { %v2887_v7 = vmax.f32 %v2823_v39, 0.0  ;;  %v2661_v44 = vmax.f32 %v2597_v37, 0.0  ;;  %v2855_v23 = vsub.f32 1.0, %v2791_v60  ;;  %v2693_v14 = vsub.f32 %v4507_v28, %v5188_v33 }
 0x3a0   : > { %2996 = vmatpush.msrb.mxu0 %v2953_v48  ;;  %v2985_v40 = vmul.f32 %v2921_v29, %v2663_v35  ;;  %v2499_v12 = vand.u32 2147483647, %v2435_v13  ;;  %v2467_v10 = vsub.f32 %v4505_v18, %v5189_v56  ;;  %v2725_v57 = vsub.f32 %v4507_v28, %v5190_v49  ;;  %v5193_v56 = vld [vmem:[#allocation35_spill] sm:$0xff] }
 0x3a1   : > { %v2951_v62 = vmul.f32 %v2887_v7, %v2629_v30  ;;  %v2919_v11 = vmax.f32 %v2855_v23, 0.0  ;;  %v2757_v53 = vand.u32 2147483647, %v2693_v14  ;;  %v2433_v39 = vsub.f32 %v4505_v18, %v5191_v8 }
 0x3a2   : > { %3016 = vmatpush.msrb.mxu1 %v2985_v40  ;;  %v2563_v37 = vsub.f32 1.0, %v2499_v12  ;;  %v2531_v60 = vand.u32 2147483647, %v2467_v10  ;;  %v2789_v21 = vand.u32 2147483647, %v2725_v57  ;;  %v2691_v35 = vsub.f32 %v4507_v28, %v5192_v38  ;;  %v5194_v57 = vld [vmem:[#allocation37_spill] sm:$0xff] }
 0x3a3   : > { %2997 = vmatpush.msrb.mxu0 %v2951_v62  ;;  %v2983_v48 = vmul.f32 %v2919_v11, %v2661_v44  ;;  %v2821_v29 = vsub.f32 1.0, %v2757_v53  ;;  %v2497_v13 = vand.u32 2147483647, %v2433_v39  ;;  %v2465_v49 = vsub.f32 %v4505_v18, %v5193_v56  ;;  %v5195_v11 = vld [vmem:[#allocation38_spill] sm:$0xff] }
 0x3a4   : > { %v2627_v30 = vmax.f32 %v2563_v37, 0.0  ;;  %v2595_v7 = vsub.f32 1.0, %v2531_v60  ;;  %v2853_v14 = vsub.f32 1.0, %v2789_v21  ;;  %v2755_v23 = vand.u32 2147483647, %v2691_v35 }
 0x3a5   : > { %3017 = vmatpush.msrb.mxu1 %v2983_v48  ;;  %v2885_v40 = vmax.f32 %v2821_v29, 0.0  ;;  %v2561_v12 = vsub.f32 1.0, %v2497_v13  ;;  %v2529_v10 = vand.u32 2147483647, %v2465_v49  ;;  %v2723_v8 = vsub.f32 %v4507_v28, %v5194_v57 }
 0x3a6   : > { %v2659_v38 = vmax.f32 %v2595_v7, 0.0  ;;  %v2917_v62 = vmax.f32 %v2853_v14, 0.0  ;;  %v2819_v44 = vsub.f32 1.0, %v2755_v23  ;;  %v2431_v53 = vsub.f32 %v4505_v18, %v5195_v11  ;;  %v5197_v14 = vld [vmem:[#allocation39_spill] sm:$0xff] }
 0x3a7   : > { %v2384_v33 = vpop.f32.mrf.mxu2  ;;  %v2949_v56 = vmul.f32 %v2885_v40, %v2627_v30  ;;  %v2625_v37 = vmax.f32 %v2561_v12, 0.0  ;;  %v2593_v60 = vsub.f32 1.0, %v2529_v10  ;;  %v2787_v21 = vand.u32 2147483647, %v2723_v8  ;;  %v5198_v8 = vld [vmem:[#allocation41_spill] sm:$0xff] }
 0x3a8   : > { %v2981_v5 = vmul.f32 %v2917_v62, %v2659_v38  ;;  %v2883_v48 = vmax.f32 %v2819_v44, 0.0  ;;  %v2495_v29 = vand.u32 2147483647, %v2431_v53  ;;  %v2689_v7 = vsub.f32 %v4507_v28, %v5196_v22  ;;  %v5199_v62 = vld [vmem:[#allocation9_spill] sm:$0xff] }
 0x3a9   : > { %2998 = vmatpush.msrb.mxu0 %v2949_v56  ;;  %v2657_v49 = vmax.f32 %v2593_v60, 0.0  ;;  %v2851_v13 = vsub.f32 1.0, %v2787_v21  ;;  %v2463_v23 = vsub.f32 %v4505_v18, %v5197_v14  ;;  %v2429_v10 = vsub.f32 %v4505_v18, %v5139_v46  ;;  %v5200_v53 = vld [vmem:[#allocation13_spill] sm:$0xff] }
 0x3aa   : > { %v2404_v39 = vpop.f32.mrf.mxu3  ;;  %3018 = vmatpush.msrb.mxu1 %v2981_v5  ;;  %v2947_v30 = vmul.f32 %v2883_v48, %v2625_v37  ;;  %v2559_v40 = vsub.f32 1.0, %v2495_v29  ;;  %v2753_v12 = vand.u32 2147483647, %v2689_v7  ;;  %v2687_v7 = vsub.f32 %v4507_v28, %v5140_v50 }
 0x3ab   : > { %v2405_v35 = vadd.f32 %v2404_v39, %v2384_v33  ;;  %v2721_v33 = vsub.f32 %v4507_v28, %v5198_v8  ;;  %v2915_v38 = vmax.f32 %v2851_v13, 0.0  ;;  %v2527_v56 = vand.u32 2147483647, %v2463_v23 }
 0x3ac   : > { %2999 = vmatpush.msrb.mxu0 %v2947_v30  ;;  %v2817_v60 = vsub.f32 1.0, %v2753_v12  ;;  %v2461_v30 = vsub.f32 %v4505_v18, %v5141_v0 }
 0x3ad   : > { %v4572_v11 = vadd.f32 %v2405_v35, %v5168_v51  ;;  %v2623_v51 = vmax.f32 %v2559_v40, 0.0  ;;  %v2785_v5 = vand.u32 2147483647, %v2721_v33  ;;  %v2979_v37 = vmul.f32 %v2915_v38, %v2657_v49 }
 0x3ae   : > { %v2591_v21 = vsub.f32 1.0, %v2527_v56  ;;  %v2493_v35 = vand.u32 2147483647, %v2429_v10  ;;  %v2881_v23 = vmax.f32 %v2817_v60, 0.0  ;;  %v2751_v49 = vand.u32 2147483647, %v2687_v7 }
 0x3af   : > { %v2410_v44 = vadd.f32 %v4572_v11, %v5199_v62  ;;  %v2412_v39 = vadd.f32 %v4572_v11, %v5200_v53  ;;  %v2849_v13 = vsub.f32 1.0, %v2785_v5  ;;  %3019 = vmatpush.msrb.mxu1 %v2979_v37  ;;  %v2719_v33 = vsub.f32 %v4507_v28, %v5088_v34 }
 0x3b0   : > { %v2655_v62 = vmax.f32 %v2591_v21, 0.0  ;;  %v2557_v46 = vsub.f32 1.0, %v2493_v35  ;;  %v2427_v38 = vsub.f32 %v4505_v18, %v5142_v1  ;;  %v2945_v12 = vmul.f32 %v2881_v23, %v2623_v51 }
 0x3b1   : > { %v4582_v48 = vperm.slane %v2410_v44, 0  ;;  %v4584_v29 = vperm.slane %v2412_v39, 1  ;;  %v2913_v40 = vmax.f32 %v2849_v13, 0.0  ;;  %v2525_v10 = vand.u32 2147483647, %v2461_v30 }
 0x3b2   : > { %v2621_v56 = vmax.f32 %v2557_v46, 0.0  ;;  %v2685_v44 = vsub.f32 %v4507_v28, %v5143_v47  ;;  %v2815_v39 = vsub.f32 1.0, %v2751_v49  ;;  %v2783_v5 = vand.u32 2147483647, %v2719_v33  ;;  %3000 = vmatpush.msrb.mxu0 %v2945_v12 }
 0x3b3   : > { %v2977_v53 = vmul.f32 %v2913_v40, %v2655_v62  ;;  %v2491_v37 = vand.u32 2147483647, %v2427_v38  ;;  %v2589_v60 = vsub.f32 1.0, %v2525_v10  ;;  %v2459_v35 = vsub.f32 %v4505_v18, %v5144_v55 }
 0x3b4   : > { %v2749_v21 = vand.u32 2147483647, %v2685_v44  ;;  %v2717_v13 = vsub.f32 %v4507_v28, %v5092_v6  ;;  %v2879_v51 = vmax.f32 %v2815_v39, 0.0  ;;  %v2847_v46 = vsub.f32 1.0, %v2783_v5 }
 0x3b5   : > { %3020 = vmatpush.msrb.mxu1 %v2977_v53  ;;  %v2555_v7 = vsub.f32 1.0, %v2491_v37  ;;  %v2425_v23 = vsub.f32 %v4505_v18, %v5145_v2  ;;  %v2653_v62 = vmax.f32 %v2589_v60, 0.0  ;;  %v2523_v40 = vand.u32 2147483647, %v2459_v35 }
 0x3b6   : > { %v2813_v30 = vsub.f32 1.0, %v2749_v21  ;;  %v2781_v49 = vand.u32 2147483647, %v2717_v13  ;;  %v2943_v33 = vmul.f32 %v2879_v51, %v2621_v56  ;;  %v2911_v38 = vmax.f32 %v2847_v46, 0.0 }
 0x3b7   : > { %v2619_v12 = vmax.f32 %v2555_v7, 0.0  ;;  %v2489_v10 = vand.u32 2147483647, %v2425_v23  ;;  %v2587_v55 = vsub.f32 1.0, %v2523_v40  ;;  %v2683_v53 = vsub.f32 %v4507_v28, %v5094_v16 }
 0x3b8   : > { %v2877_v44 = vmax.f32 %v2813_v30, 0.0  ;;  %v2845_v47 = vsub.f32 1.0, %v2781_v49  ;;  %3001 = vmatpush.msrb.mxu0 %v2943_v33  ;;  %v2975_v39 = vmul.f32 %v2911_v38, %v2653_v62  ;;  %v2457_v37 = vsub.f32 %v4505_v18, %v5146_v42 }
 0x3b9   : > { %v2553_v5 = vsub.f32 1.0, %v2489_v10  ;;  %v2715_v60 = vsub.f32 %v4507_v28, %v5096_v24  ;;  %v2651_v56 = vmax.f32 %v2587_v55, 0.0  ;;  %v2747_v13 = vand.u32 2147483647, %v2683_v53 }
 0x3ba   : > { %v2941_v21 = vmul.f32 %v2877_v44, %v2619_v12  ;;  %v2909_v35 = vmax.f32 %v2845_v47, 0.0  ;;  %3021 = vmatpush.msrb.mxu1 %v2975_v39  ;;  %v2521_v46 = vand.u32 2147483647, %v2457_v37  ;;  %v2446_v23 = vsub.f32 %v4582_v48, %v3463_v41 }
 0x3bb   : > { %v2617_v51 = vmax.f32 %v2553_v5, 0.0  ;;  %v2779_v7 = vand.u32 2147483647, %v2715_v60  ;;  %v2811_v30 = vsub.f32 1.0, %v2747_v13  ;;  %v2704_v40 = vsub.f32 %v4584_v29, %v5172_v58 }
 0x3bc   : > { %3002 = vmatpush.msrb.mxu0 %v2941_v21  ;;  %v2973_v62 = vmul.f32 %v2909_v35, %v2651_v56  ;;  %v2478_v49 = vsub.f32 %v4582_v48, %v5173_v25  ;;  %v2585_v33 = vsub.f32 1.0, %v2521_v46  ;;  %v2510_v47 = vand.u32 2147483647, %v2446_v23 }
 0x3bd   : > { %v2843_v55 = vsub.f32 1.0, %v2779_v7  ;;  %v2736_v38 = vsub.f32 %v4584_v29, %v5174_v36  ;;  %v2875_v12 = vmax.f32 %v2811_v30, 0.0  ;;  %v2768_v10 = vand.u32 2147483647, %v2704_v40 }
 0x3be   : > { %3022 = vmatpush.msrb.mxu1 %v2973_v62  ;;  %v2542_v44 = vand.u32 2147483647, %v2478_v49  ;;  %v2423_v41 = vsub.f32 %v4505_v18, %v5097_v15  ;;  %v2649_v53 = vmax.f32 %v2585_v33, 0.0  ;;  %v2574_v5 = vsub.f32 1.0, %v2510_v47  ;;  %v5201_v62 = vld [vmem:[#allocation55_spill] sm:$0xff] }
 0x3bf   : > { %v2907_v39 = vmax.f32 %v2843_v55, 0.0  ;;  %v2800_v58 = vand.u32 2147483647, %v2736_v38  ;;  %v2939_v37 = vmul.f32 %v2875_v12, %v2617_v51  ;;  %v2832_v60 = vsub.f32 1.0, %v2768_v10 }
 0x3c0   : > { %v2606_v25 = vsub.f32 1.0, %v2542_v44  ;;  %v2487_v21 = vand.u32 2147483647, %v2423_v41  ;;  %v2638_v35 = vmax.f32 %v2574_v5, 0.0  ;;  %v2681_v36 = vsub.f32 %v4507_v28, %v5098_v26 }
 0x3c1   : > { %v2971_v56 = vmul.f32 %v2907_v39, %v2649_v53  ;;  %v2864_v13 = vsub.f32 1.0, %v2800_v58  ;;  %3003 = vmatpush.msrb.mxu0 %v2939_v37  ;;  %v2896_v46 = vmax.f32 %v2832_v60, 0.0  ;;  %v2455_v30 = vsub.f32 %v4505_v18, %v5201_v62 }
 0x3c2   : > { %v2670_v7 = vmax.f32 %v2606_v25, 0.0  ;;  %v2551_v23 = vsub.f32 1.0, %v2487_v21  ;;  %v2745_v49 = vand.u32 2147483647, %v2681_v36  ;;  %v2713_v51 = vsub.f32 %v4507_v28, %v5100_v27 }
 0x3c3   : > { %3023 = vmatpush.msrb.mxu1 %v2971_v56  ;;  %v2928_v40 = vmax.f32 %v2864_v13, 0.0  ;;  %v2444_v33 = vsub.f32 %v4582_v48, %v3467_v43  ;;  %v2960_v55 = vmul.f32 %v2896_v46, %v2638_v35  ;;  %v2519_v38 = vand.u32 2147483647, %v2455_v30 }
 0x3c4   : > { %v2615_v47 = vmax.f32 %v2551_v23, 0.0  ;;  %v2702_v12 = vsub.f32 %v4584_v29, %v5175_v63  ;;  %v2809_v44 = vsub.f32 1.0, %v2745_v49  ;;  %v2777_v41 = vand.u32 2147483647, %v2713_v51 }
 0x3c5   : > { %v2992_v10 = vmul.f32 %v2928_v40, %v2670_v7  ;;  %v2508_v53 = vand.u32 2147483647, %v2444_v33  ;;  %3033 = vmatpush.msrb.mxu2 %v2960_v55  ;;  %v2583_v39 = vsub.f32 1.0, %v2519_v38  ;;  %v2476_v58 = vsub.f32 %v4582_v48, %v5176_v17 }
 0x3c6   : > { %v2766_v5 = vand.u32 2147483647, %v2702_v12  ;;  %v2734_v37 = vsub.f32 %v4584_v29, %v5177_v20  ;;  %v2873_v43 = vmax.f32 %v2809_v44, 0.0  ;;  %v2841_v60 = vsub.f32 1.0, %v2777_v41 }
 0x3c7   : > { %3053 = vmatpush.msrb.mxu3 %v2992_v10  ;;  %v2572_v25 = vsub.f32 1.0, %v2508_v53  ;;  %v2421_v63 = vsub.f32 %v4505_v18, %v5101_v54  ;;  %v2647_v21 = vmax.f32 %v2583_v39, 0.0  ;;  %v2540_v35 = vand.u32 2147483647, %v2476_v58 }
 0x3c8   : > { %v2830_v56 = vsub.f32 1.0, %v2766_v5  ;;  %v2798_v13 = vand.u32 2147483647, %v2734_v37  ;;  %v2937_v36 = vmul.f32 %v2873_v43, %v2615_v47  ;;  %v2905_v46 = vmax.f32 %v2841_v60, 0.0 }
 0x3c9   : > { %v2636_v7 = vmax.f32 %v2572_v25, 0.0  ;;  %v2485_v23 = vand.u32 2147483647, %v2421_v63  ;;  %v2604_v17 = vsub.f32 1.0, %v2540_v35  ;;  %v2679_v20 = vsub.f32 %v4507_v28, %v5102_v32 }
 0x3ca   : > { %v2894_v30 = vmax.f32 %v2830_v56, 0.0  ;;  %v2862_v40 = vsub.f32 1.0, %v2798_v13  ;;  %3004 = vmatpush.msrb.mxu0 %v2937_v36  ;;  %v2969_v49 = vmul.f32 %v2905_v46, %v2647_v21  ;;  %v2453_v33 = vsub.f32 %v4505_v18, %v5103_v52 }
 0x3cb   : > { %v2549_v51 = vsub.f32 1.0, %v2485_v23  ;;  %v2711_v55 = vsub.f32 %v4507_v28, %v5104_v4  ;;  %v2668_v47 = vmax.f32 %v2604_v17, 0.0  ;;  %v2743_v10 = vand.u32 2147483647, %v2679_v20 }
 0x3cc   : > { %v2958_v38 = vmul.f32 %v2894_v30, %v2636_v7  ;;  %v2926_v12 = vmax.f32 %v2862_v40, 0.0  ;;  %3024 = vmatpush.msrb.mxu1 %v2969_v49  ;;  %v2517_v41 = vand.u32 2147483647, %v2453_v33  ;;  %v2442_v39 = vsub.f32 %v4582_v48, %v5112_v59 }
 0x3cd   : > { %v2613_v44 = vmax.f32 %v2549_v51, 0.0  ;;  %v2775_v53 = vand.u32 2147483647, %v2711_v55  ;;  %v2807_v58 = vsub.f32 1.0, %v2743_v10  ;;  %v2700_v37 = vsub.f32 %v4584_v29, %v5113_v9  ;;  %v5202_v10 = vld [vmem:[#allocation65_spill] sm:$0xff] }
 0x3ce   : > { %3034 = vmatpush.msrb.mxu2 %v2958_v38  ;;  %v2990_v5 = vmul.f32 %v2926_v12, %v2668_v47  ;;  %v2474_v43 = vsub.f32 %v4582_v48, %v5178_v31  ;;  %v2581_v60 = vsub.f32 1.0, %v2517_v41  ;;  %v2506_v63 = vand.u32 2147483647, %v2442_v39  ;;  %v5203_v41 = vld [vmem:[#allocation22_spill] sm:$0xff] }
 0x3cf   : > { %v2839_v25 = vsub.f32 1.0, %v2775_v53  ;;  %v2732_v21 = vsub.f32 %v4584_v29, %v5179_v45  ;;  %v2871_v56 = vmax.f32 %v2807_v58, 0.0  ;;  %v2764_v35 = vand.u32 2147483647, %v2700_v37  ;;  %v5204_v37 = vld [vmem:[#allocation24_spill] sm:$0xff] }
 0x3d0   : > { %3054 = vmatpush.msrb.mxu3 %v2990_v5  ;;  %v2538_v13 = vand.u32 2147483647, %v2474_v43  ;;  %v2419_v59 = vsub.f32 %v4505_v18, %v5149_v61  ;;  %v2645_v36 = vmax.f32 %v2581_v60, 0.0  ;;  %v2570_v7 = vsub.f32 1.0, %v2506_v63 }
 0x3d1   : > { %v2903_v46 = vmax.f32 %v2839_v25, 0.0  ;;  %v2796_v9 = vand.u32 2147483647, %v2732_v21  ;;  %v2935_v23 = vmul.f32 %v2871_v56, %v2613_v44  ;;  %v2828_v30 = vsub.f32 1.0, %v2764_v35 }
 0x3d2   : > { %v2602_v31 = vsub.f32 1.0, %v2538_v13  ;;  %v2483_v17 = vand.u32 2147483647, %v2419_v59  ;;  %v2634_v20 = vmax.f32 %v2570_v7, 0.0  ;;  %v2677_v45 = vsub.f32 %v4507_v28, %v5150_v3  ;;  %v5205_v13 = vld [vmem:[#allocation23_spill] sm:$0xff] }
 0x3d3   : > { %v2967_v40 = vmul.f32 %v2903_v46, %v2645_v36  ;;  %v2860_v49 = vsub.f32 1.0, %v2796_v9  ;;  %3005 = vmatpush.msrb.mxu0 %v2935_v23  ;;  %v2892_v51 = vmax.f32 %v2828_v30, 0.0  ;;  %v2451_v38 = vsub.f32 %v4505_v18, %v5151_v19  ;;  %v5206_v36 = vld [vmem:[#allocation25_spill] sm:$0xff]  ;;  %v5207_v30 = vld [vmem:[#allocation66_spill] sm:$0xff] }
 0x3d4   : > { %v2666_v33 = vmax.f32 %v2602_v31, 0.0  ;;  %v2547_v55 = vsub.f32 1.0, %v2483_v17  ;;  %v2741_v12 = vand.u32 2147483647, %v2677_v45  ;;  %v2709_v44 = vsub.f32 %v4507_v28, %v5202_v10 }
 0x3d5   : > { %3025 = vmatpush.msrb.mxu1 %v2967_v40  ;;  %v2924_v47 = vmax.f32 %v2860_v49, 0.0  ;;  %v2440_v53 = vsub.f32 %v4582_v48, %v5203_v41  ;;  %v2956_v39 = vmul.f32 %v2892_v51, %v2634_v20  ;;  %v2515_v58 = vand.u32 2147483647, %v2451_v38 }
 0x3d6   : > { %v2611_v5 = vmax.f32 %v2547_v55, 0.0  ;;  %v2698_v43 = vsub.f32 %v4584_v29, %v5204_v37  ;;  %v2805_v25 = vsub.f32 1.0, %v2741_v12  ;;  %v2773_v63 = vand.u32 2147483647, %v2709_v44  ;;  %v5208_v44 = vld [vmem:[#allocation68_spill] sm:$0xff] }
 0x3d7   : > { %v2988_v60 = vmul.f32 %v2924_v47, %v2666_v33  ;;  %v2504_v21 = vand.u32 2147483647, %v2440_v53  ;;  %3035 = vmatpush.msrb.mxu2 %v2956_v39  ;;  %v2579_v56 = vsub.f32 1.0, %v2515_v58  ;;  %v2472_v59 = vsub.f32 %v4582_v48, %v5205_v13  ;;  %v5209_v58 = vld [vmem:[#allocation67_spill] sm:$0xff] }
 0x3d8   : > { %v2762_v35 = vand.u32 2147483647, %v2698_v43  ;;  %v2730_v46 = vsub.f32 %v4584_v29, %v5206_v36  ;;  %v2869_v7 = vmax.f32 %v2805_v25, 0.0  ;;  %v2837_v9 = vsub.f32 1.0, %v2773_v63  ;;  %v5210_v43 = vld [vmem:[#allocation69_spill] sm:$0xff] }
 0x3d9   : > { %3055 = vmatpush.msrb.mxu3 %v2988_v60  ;;  %v2568_v23 = vsub.f32 1.0, %v2504_v21  ;;  %v2417_v31 = vsub.f32 %v4505_v18, %v5207_v30  ;;  %v2643_v17 = vmax.f32 %v2579_v56, 0.0  ;;  %v2536_v20 = vand.u32 2147483647, %v2472_v59  ;;  %v5211_v59 = vld [vmem:[#allocation26_spill] sm:$0xff] }
 0x3da   : > { %v2826_v40 = vsub.f32 1.0, %v2762_v35  ;;  %v2794_v49 = vand.u32 2147483647, %v2730_v46  ;;  %v2933_v45 = vmul.f32 %v2869_v7, %v2611_v5  ;;  %v2901_v51 = vmax.f32 %v2837_v9, 0.0  ;;  %v5212_v9 = vld [vmem:[#allocation28_spill] sm:$0xff] }
 0x3db   : > { %v2632_v33 = vmax.f32 %v2568_v23, 0.0  ;;  %v2481_v55 = vand.u32 2147483647, %v2417_v31  ;;  %v2600_v47 = vsub.f32 1.0, %v2536_v20  ;;  %v2675_v41 = vsub.f32 %v4507_v28, %v5208_v44  ;;  %v5213_v31 = vld [vmem:[#allocation27_spill] sm:$0xff] }
 0x3dc   : > { %v2890_v38 = vmax.f32 %v2826_v40, 0.0  ;;  %v2858_v12 = vsub.f32 1.0, %v2794_v49  ;;  %3006 = vmatpush.msrb.mxu0 %v2933_v45  ;;  %v2965_v53 = vmul.f32 %v2901_v51, %v2643_v17  ;;  %v2449_v37 = vsub.f32 %v4505_v18, %v5209_v58  ;;  %v5214_v45 = vld [vmem:[#allocation29_spill] sm:$0xff] }
 0x3dd   : > { %v2545_v39 = vsub.f32 1.0, %v2481_v55  ;;  %v2707_v60 = vsub.f32 %v4507_v28, %v5210_v43  ;;  %v2664_v5 = vmax.f32 %v2600_v47, 0.0  ;;  %v2739_v21 = vand.u32 2147483647, %v2675_v41  ;;  %v5215_v47 = vld [vmem:[#allocation70_spill] sm:$0xff] }
 0x3de   : > { %v2954_v25 = vmul.f32 %v2890_v38, %v2632_v33  ;;  %v2922_v63 = vmax.f32 %v2858_v12, 0.0  ;;  %3026 = vmatpush.msrb.mxu1 %v2965_v53  ;;  %v2513_v35 = vand.u32 2147483647, %v2449_v37  ;;  %v2438_v36 = vsub.f32 %v4582_v48, %v5211_v59  ;;  %v5216_v59 = vld [vmem:[#allocation72_spill] sm:$0xff] }
 0x3df   : > { %v2609_v56 = vmax.f32 %v2545_v39, 0.0  ;;  %v2771_v13 = vand.u32 2147483647, %v2707_v60  ;;  %v2803_v7 = vsub.f32 1.0, %v2739_v21  ;;  %v2696_v23 = vsub.f32 %v4584_v29, %v5212_v9 }
 0x3e0   : > { %3036 = vmatpush.msrb.mxu2 %v2954_v25  ;;  %v2986_v46 = vmul.f32 %v2922_v63, %v2664_v5  ;;  %v2470_v17 = vsub.f32 %v4582_v48, %v5213_v31  ;;  %v2577_v40 = vsub.f32 1.0, %v2513_v35  ;;  %v2502_v49 = vand.u32 2147483647, %v2438_v36 }
 0x3e1   : > { %v2835_v20 = vsub.f32 1.0, %v2771_v13  ;;  %v2728_v51 = vsub.f32 %v4584_v29, %v5214_v45  ;;  %v2867_v33 = vmax.f32 %v2803_v7, 0.0  ;;  %v2760_v55 = vand.u32 2147483647, %v2696_v23  ;;  %v5217_v23 = vld [vmem:[#allocation71_spill] sm:$0xff] }
 0x3e2   : > { %3056 = vmatpush.msrb.mxu3 %v2986_v46  ;;  %v2534_v38 = vand.u32 2147483647, %v2470_v17  ;;  %v2415_v12 = vsub.f32 %v4505_v18, %v5215_v47  ;;  %v2641_v41 = vmax.f32 %v2577_v40, 0.0  ;;  %v2566_v39 = vsub.f32 1.0, %v2502_v49  ;;  %v5219_v49 = vld [vmem:[#allocation30_spill] sm:$0xff] }
 0x3e3   : > { %v2899_v53 = vmax.f32 %v2835_v20, 0.0  ;;  %v2792_v37 = vand.u32 2147483647, %v2728_v51  ;;  %v2931_v60 = vmul.f32 %v2867_v33, %v2609_v56  ;;  %v2824_v25 = vsub.f32 1.0, %v2760_v55  ;;  %v5218_v56 = vld [vmem:[#allocation73_spill] sm:$0xff] }
 0x3e4   : > { %v2598_v5 = vsub.f32 1.0, %v2534_v38  ;;  %v2479_v63 = vand.u32 2147483647, %v2415_v12  ;;  %v2630_v35 = vmax.f32 %v2566_v39, 0.0  ;;  %v2673_v36 = vsub.f32 %v4507_v28, %v5216_v59  ;;  %v5220_v38 = vld [vmem:[#allocation32_spill] sm:$0xff] }
 0x3e5   : > { %v2963_v21 = vmul.f32 %v2899_v53, %v2641_v41  ;;  %v2856_v13 = vsub.f32 1.0, %v2792_v37  ;;  %3007 = vmatpush.msrb.mxu0 %v2931_v60  ;;  %v2888_v46 = vmax.f32 %v2824_v25, 0.0  ;;  %v2447_v31 = vsub.f32 %v4505_v18, %v5217_v23  ;;  %v5221_v25 = vld [vmem:[#allocation31_spill] sm:$0xff] }
 0x3e6   : > { %v2662_v7 = vmax.f32 %v2598_v5, 0.0  ;;  %v2543_v9 = vsub.f32 1.0, %v2479_v63  ;;  %v2737_v40 = vand.u32 2147483647, %v2673_v36  ;;  %v2705_v20 = vsub.f32 %v4507_v28, %v5218_v56  ;;  %v5222_v28 = vld [vmem:[#allocation33_spill] sm:$0xff]  ;;  %v5223_v36 = vld [vmem:[#allocation34_spill] sm:$0xff] }
 0x3e7   : > { %3027 = vmatpush.msrb.mxu1 %v2963_v21  ;;  %v2920_v17 = vmax.f32 %v2856_v13, 0.0  ;;  %v2436_v45 = vsub.f32 %v4582_v48, %v5219_v49  ;;  %v2952_v51 = vmul.f32 %v2888_v46, %v2630_v35  ;;  %v2511_v55 = vand.u32 2147483647, %v2447_v31 }
 0x3e8   : > { %v2607_v33 = vmax.f32 %v2543_v9, 0.0  ;;  %v2694_v12 = vsub.f32 %v4584_v29, %v5220_v38  ;;  %v2801_v53 = vsub.f32 1.0, %v2737_v40  ;;  %v2769_v39 = vand.u32 2147483647, %v2705_v20 }
 0x3e9   : > { %v2984_v41 = vmul.f32 %v2920_v17, %v2662_v7  ;;  %v2500_v37 = vand.u32 2147483647, %v2436_v45  ;;  %3037 = vmatpush.msrb.mxu2 %v2952_v51  ;;  %v2575_v18 = vsub.f32 1.0, %v2511_v55  ;;  %v2468_v5 = vsub.f32 %v4582_v48, %v5221_v25 }
 0x3ea   : > { %v2758_v60 = vand.u32 2147483647, %v2694_v12  ;;  %v2726_v63 = vsub.f32 %v4584_v29, %v5222_v28  ;;  %v2865_v21 = vmax.f32 %v2801_v53, 0.0  ;;  %v2833_v35 = vsub.f32 1.0, %v2769_v39  ;;  %v5224_v12 = vld [vmem:[#allocation36_spill] sm:$0xff] }
 0x3eb   : > { %3057 = vmatpush.msrb.mxu3 %v2984_v41  ;;  %v2564_v13 = vsub.f32 1.0, %v2500_v37  ;;  %v2434_v46 = vsub.f32 %v4582_v48, %v5223_v36  ;;  %v2639_v7 = vmax.f32 %v2575_v18, 0.0  ;;  %v2532_v31 = vand.u32 2147483647, %v2468_v5  ;;  %v5225_v37 = vld [vmem:[#allocation35_spill] sm:$0xff]  ;;  %v5226_v28 = vld [vmem:[#allocation52_spill] sm:$0xff] }
 0x3ec   : > { %v2822_v9 = vsub.f32 1.0, %v2758_v60  ;;  %v2790_v17 = vand.u32 2147483647, %v2726_v63  ;;  %v2929_v40 = vmul.f32 %v2865_v21, %v2607_v33  ;;  %v2897_v20 = vmax.f32 %v2833_v35, 0.0  ;;  %v5227_v36 = vld [vmem:[#allocation38_spill] sm:$0xff] }
 0x3ed   : > { %v2628_v49 = vmax.f32 %v2564_v13, 0.0  ;;  %v2498_v45 = vand.u32 2147483647, %v2434_v46  ;;  %v2596_v55 = vsub.f32 1.0, %v2532_v31  ;;  %v2692_v41 = vsub.f32 %v4584_v29, %v5224_v12 }
 0x3ee   : > { %v2886_v51 = vmax.f32 %v2822_v9, 0.0  ;;  %v2854_v38 = vsub.f32 1.0, %v2790_v17  ;;  %3008 = vmatpush.msrb.mxu0 %v2929_v40  ;;  %v2961_v53 = vmul.f32 %v2897_v20, %v2639_v7  ;;  %v2466_v25 = vsub.f32 %v4582_v48, %v5225_v37 }
 0x3ef   : > { %v2562_v39 = vsub.f32 1.0, %v2498_v45  ;;  %v2724_v18 = vsub.f32 %v4584_v29, %v5194_v57  ;;  %v2660_v33 = vmax.f32 %v2596_v55, 0.0  ;;  %3009 = vmatmul.f32.vlgmr.msrb.gmra.mxu0 %v5226_v28  ;;  %v2756_v63 = vand.u32 2147483647, %v2692_v41 }
 0x3f0   : > { %v2950_v60 = vmul.f32 %v2886_v51, %v2628_v49  ;;  %v2918_v5 = vmax.f32 %v2854_v38, 0.0  ;;  %3028 = vmatpush.msrb.mxu1 %v2961_v53  ;;  %v2530_v35 = vand.u32 2147483647, %v2466_v25  ;;  %v2432_v46 = vsub.f32 %v4582_v48, %v5227_v36  ;;  %v5228_v38 = vld [vmem:[#allocation42_spill] sm:$0xff] }
 0x3f1   : > { %v2626_v21 = vmax.f32 %v2562_v39, 0.0  ;;  %v2788_v13 = vand.u32 2147483647, %v2724_v18  ;;  %3029 = vmatmul.f32.vlgmr.msrb.gmra.mxu1 %v4572_v11  ;;  %v2820_v9 = vsub.f32 1.0, %v2756_v63  ;;  %v2690_v57 = vsub.f32 %v4584_v29, %v5196_v22 }
 0x3f2   : > { %3038 = vmatpush.msrb.mxu2 %v2950_v60  ;;  %v2982_v7 = vmul.f32 %v2918_v5, %v2660_v33  ;;  %v2464_v31 = vsub.f32 %v4582_v48, %v5197_v14  ;;  %v2594_v17 = vsub.f32 1.0, %v2530_v35  ;;  %v2496_v20 = vand.u32 2147483647, %v2432_v46 }
 0x3f3   : > { %v2852_v40 = vsub.f32 1.0, %v2788_v13  ;;  %v2722_v49 = vsub.f32 %v4584_v29, %v5198_v8  ;;  %v2884_v45 = vmax.f32 %v2820_v9, 0.0  ;;  %v2754_v51 = vand.u32 2147483647, %v2690_v57 }
 0x3f4   : > { %3058 = vmatpush.msrb.mxu3 %v2982_v7  ;;  %v2528_v55 = vand.u32 2147483647, %v2464_v31  ;;  %v2430_v12 = vsub.f32 %v4582_v48, %v5228_v38  ;;  %v2658_v41 = vmax.f32 %v2594_v17, 0.0  ;;  %v2560_v39 = vsub.f32 1.0, %v2496_v20  ;;  %v5230_v38 = vld [vmem:[#allocation47_spill] sm:$0xff] }
 0x3f5   : > { %v2916_v53 = vmax.f32 %v2852_v40, 0.0  ;;  %v2786_v22 = vand.u32 2147483647, %v2722_v49  ;;  %v2948_v37 = vmul.f32 %v2884_v45, %v2626_v21  ;;  %v2818_v25 = vsub.f32 1.0, %v2754_v51 }
 0x3f6   : > { %v2592_v14 = vsub.f32 1.0, %v2528_v55  ;;  %v2494_v18 = vand.u32 2147483647, %v2430_v12  ;;  %v2624_v33 = vmax.f32 %v2560_v39, 0.0  ;;  %v2688_v8 = vsub.f32 %v4584_v29, %v5140_v50  ;;  %v5229_v50 = vld [vmem:[#allocation48_spill] sm:$0xff] }
 0x3f7   : > { %v2980_v60 = vmul.f32 %v2916_v53, %v2658_v41  ;;  %v2850_v5 = vsub.f32 1.0, %v2786_v22  ;;  %3039 = vmatpush.msrb.mxu2 %v2948_v37  ;;  %v2882_v63 = vmax.f32 %v2818_v25, 0.0  ;;  %v2462_v36 = vsub.f32 %v4582_v48, %v5141_v0 }
 0x3f8   : > { %v2656_v35 = vmax.f32 %v2592_v14, 0.0  ;;  %v2558_v13 = vsub.f32 1.0, %v2494_v18  ;;  %v2752_v7 = vand.u32 2147483647, %v2688_v8  ;;  %v2720_v21 = vsub.f32 %v4584_v29, %v5088_v34 }
 0x3f9   : > { %3059 = vmatpush.msrb.mxu3 %v2980_v60  ;;  %v2914_v46 = vmax.f32 %v2850_v5, 0.0  ;;  %v2428_v9 = vsub.f32 %v4582_v48, %v5142_v1  ;;  %v2946_v57 = vmul.f32 %v2882_v63, %v2624_v33  ;;  %v2526_v17 = vand.u32 2147483647, %v2462_v36 }
 0x3fa   : > { %v2622_v31 = vmax.f32 %v2558_v13, 0.0  ;;  %v2686_v40 = vsub.f32 %v4584_v29, %v5229_v50  ;;  %v2816_v49 = vsub.f32 1.0, %v2752_v7  ;;  %v2784_v45 = vand.u32 2147483647, %v2720_v21 }
 0x3fb   : > { %v2978_v20 = vmul.f32 %v2914_v46, %v2656_v35  ;;  %v2492_v51 = vand.u32 2147483647, %v2428_v9  ;;  %3040 = vmatpush.msrb.mxu2 %v2946_v57  ;;  %v2590_v0 = vsub.f32 1.0, %v2526_v17  ;;  %v2460_v12 = vsub.f32 %v4582_v48, %v5230_v38 }
 0x3fc   : > { %v2750_v55 = vand.u32 2147483647, %v2686_v40  ;;  %v2718_v34 = vsub.f32 %v4584_v29, %v5092_v6  ;;  %v2880_v1 = vmax.f32 %v2816_v49, 0.0  ;;  %v2848_v41 = vsub.f32 1.0, %v2784_v45 }
 0x3fd   : > { %3060 = vmatpush.msrb.mxu3 %v2978_v20  ;;  %v2556_v53 = vsub.f32 1.0, %v2492_v51  ;;  %v2426_v39 = vsub.f32 %v4582_v48, %v5145_v2  ;;  %v2654_v22 = vmax.f32 %v2590_v0, 0.0  ;;  %v2524_v25 = vand.u32 2147483647, %v2460_v12 }
 0x3fe   : > { %v2814_v37 = vsub.f32 1.0, %v2750_v55  ;;  %v2782_v14 = vand.u32 2147483647, %v2718_v34  ;;  %v2944_v18 = vmul.f32 %v2880_v1, %v2622_v31  ;;  %v2912_v60 = vmax.f32 %v2848_v41, 0.0 }
 0x3ff   : > { %v2620_v33 = vmax.f32 %v2556_v53, 0.0  ;;  %v2490_v5 = vand.u32 2147483647, %v2426_v39  ;;  %v2588_v63 = vsub.f32 1.0, %v2524_v25  ;;  %v2684_v6 = vsub.f32 %v4584_v29, %v5094_v16 }
 0x400   : > { %v2878_v8 = vmax.f32 %v2814_v37, 0.0  ;;  %v2846_v35 = vsub.f32 1.0, %v2782_v14  ;;  %3041 = vmatpush.msrb.mxu2 %v2944_v18  ;;  %v2976_v13 = vmul.f32 %v2912_v60, %v2654_v22  ;;  %v2458_v2 = vsub.f32 %v4582_v48, %v5146_v42 }
 0x401   : > { %v2554_v36 = vsub.f32 1.0, %v2490_v5  ;;  %v2716_v46 = vsub.f32 %v4584_v29, %v5096_v24  ;;  %v2652_v21 = vmax.f32 %v2588_v63, 0.0  ;;  %v2748_v57 = vand.u32 2147483647, %v2684_v6 }
 0x402   : > { %v2942_v7 = vmul.f32 %v2878_v8, %v2620_v33  ;;  %v2910_v9 = vmax.f32 %v2846_v35, 0.0  ;;  %3061 = vmatpush.msrb.mxu3 %v2976_v13  ;;  %v2522_v17 = vand.u32 2147483647, %v2458_v2  ;;  %v2424_v16 = vsub.f32 %v4582_v48, %v5097_v15 }
 0x403   : > { %v2618_v31 = vmax.f32 %v2554_v36, 0.0  ;;  %v2780_v50 = vand.u32 2147483647, %v2716_v46  ;;  %v2812_v20 = vsub.f32 1.0, %v2748_v57  ;;  %v2682_v42 = vsub.f32 %v4584_v29, %v5098_v26 }
 0x404   : > { %3042 = vmatpush.msrb.mxu2 %v2942_v7  ;;  %v2974_v40 = vmul.f32 %v2910_v9, %v2652_v21  ;;  %v2456_v24 = vsub.f32 %v4582_v48, %v5201_v62  ;;  %v2586_v49 = vsub.f32 1.0, %v2522_v17  ;;  %v2488_v51 = vand.u32 2147483647, %v2424_v16 }
 0x405   : > { %v2844_v45 = vsub.f32 1.0, %v2780_v50  ;;  %v2714_v0 = vsub.f32 %v4584_v29, %v5100_v27  ;;  %v2876_v55 = vmax.f32 %v2812_v20, 0.0  ;;  %v2746_v38 = vand.u32 2147483647, %v2682_v42 }
 0x406   : > { %3062 = vmatpush.msrb.mxu3 %v2974_v40  ;;  %v2520_v12 = vand.u32 2147483647, %v2456_v24  ;;  %v2422_v15 = vsub.f32 %v4582_v48, %v5101_v54  ;;  %v2650_v34 = vmax.f32 %v2586_v49, 0.0  ;;  %v2552_v41 = vsub.f32 1.0, %v2488_v51 }
 0x407   : > { %v2908_v1 = vmax.f32 %v2844_v45, 0.0  ;;  %v2778_v26 = vand.u32 2147483647, %v2714_v0  ;;  %v2940_v53 = vmul.f32 %v2876_v55, %v2618_v31  ;;  %v2810_v39 = vsub.f32 1.0, %v2746_v38 }
 0x408   : > { %v2584_v62 = vsub.f32 1.0, %v2520_v12  ;;  %v2486_v22 = vand.u32 2147483647, %v2422_v15  ;;  %v2616_v25 = vmax.f32 %v2552_v41, 0.0  ;;  %v2680_v27 = vsub.f32 %v4584_v29, %v5102_v32 }
 0x409   : > { %v2972_v37 = vmul.f32 %v2908_v1, %v2650_v34  ;;  %v2842_v14 = vsub.f32 1.0, %v2778_v26  ;;  %3043 = vmatpush.msrb.mxu2 %v2940_v53  ;;  %v2874_v18 = vmax.f32 %v2810_v39, 0.0  ;;  %v2454_v54 = vsub.f32 %v4582_v48, %v5103_v52 }
 0x40a   : > { %v2648_v60 = vmax.f32 %v2584_v62, 0.0  ;;  %v2550_v33 = vsub.f32 1.0, %v2486_v22  ;;  %v2744_v8 = vand.u32 2147483647, %v2680_v27  ;;  %v2712_v63 = vsub.f32 %v4584_v29, %v5104_v4 }
 0x40b   : > { %3063 = vmatpush.msrb.mxu3 %v2972_v37  ;;  %v2906_v5 = vmax.f32 %v2842_v14, 0.0  ;;  %v2420_v35 = vsub.f32 %v4582_v48, %v5149_v61  ;;  %v2938_v6 = vmul.f32 %v2874_v18, %v2616_v25  ;;  %v2518_v36 = vand.u32 2147483647, %v2454_v54 }
 0x40c   : > { %v2614_v13 = vmax.f32 %v2550_v33, 0.0  ;;  %v2678_v32 = vsub.f32 %v4584_v29, %v5150_v3  ;;  %v2808_v46 = vsub.f32 1.0, %v2744_v8  ;;  %v2776_v7 = vand.u32 2147483647, %v2712_v63 }
 0x40d   : > { %v2970_v2 = vmul.f32 %v2906_v5, %v2648_v60  ;;  %v2484_v21 = vand.u32 2147483647, %v2420_v35  ;;  %3044 = vmatpush.msrb.mxu2 %v2938_v6  ;;  %v2582_v52 = vsub.f32 1.0, %v2518_v36  ;;  %v2452_v57 = vsub.f32 %v4582_v48, %v5151_v19 }
 0x40e   : > { %v2742_v9 = vand.u32 2147483647, %v2678_v32  ;;  %v2710_v4 = vsub.f32 %v4584_v29, %v5202_v10  ;;  %v2872_v61 = vmax.f32 %v2808_v46, 0.0  ;;  %v2840_v31 = vsub.f32 1.0, %v2776_v7 }
 0x40f   : > { %3064 = vmatpush.msrb.mxu3 %v2970_v2  ;;  %v2548_v17 = vsub.f32 1.0, %v2484_v21  ;;  %v2418_v3 = vsub.f32 %v4582_v48, %v5207_v30  ;;  %v2646_v50 = vmax.f32 %v2582_v52, 0.0  ;;  %v2516_v40 = vand.u32 2147483647, %v2452_v57 }
 0x410   : > { %v2806_v16 = vsub.f32 1.0, %v2742_v9  ;;  %v2774_v20 = vand.u32 2147483647, %v2710_v4  ;;  %v2936_v42 = vmul.f32 %v2872_v61, %v2614_v13  ;;  %v2904_v24 = vmax.f32 %v2840_v31, 0.0 }
 0x411   : > { %v2612_v49 = vmax.f32 %v2548_v17, 0.0  ;;  %v2482_v45 = vand.u32 2147483647, %v2418_v3  ;;  %v2580_v19 = vsub.f32 1.0, %v2516_v40  ;;  %v2676_v10 = vsub.f32 %v4584_v29, %v5208_v44 }
 0x412   : > { %v2870_v51 = vmax.f32 %v2806_v16, 0.0  ;;  %v2838_v0 = vsub.f32 1.0, %v2774_v20  ;;  %3045 = vmatpush.msrb.mxu2 %v2936_v42  ;;  %v2968_v55 = vmul.f32 %v2904_v24, %v2646_v50  ;;  %v2450_v30 = vsub.f32 %v4582_v48, %v5209_v58 }
 0x413   : > { %v2546_v38 = vsub.f32 1.0, %v2482_v45  ;;  %v2708_v12 = vsub.f32 %v4584_v29, %v5210_v43  ;;  %v2644_v34 = vmax.f32 %v2580_v19, 0.0  ;;  %v2740_v41 = vand.u32 2147483647, %v2676_v10 }
 0x414   : > { %v2934_v15 = vmul.f32 %v2870_v51, %v2612_v49  ;;  %v2902_v1 = vmax.f32 %v2838_v0, 0.0  ;;  %3065 = vmatpush.msrb.mxu3 %v2968_v55  ;;  %v2514_v53 = vand.u32 2147483647, %v2450_v30  ;;  %v2416_v44 = vsub.f32 %v4582_v48, %v5215_v47 }
 0x415   : > { %v2610_v26 = vmax.f32 %v2546_v38, 0.0  ;;  %v2772_v39 = vand.u32 2147483647, %v2708_v12  ;;  %v2804_v22 = vsub.f32 1.0, %v2740_v41  ;;  %v2674_v58 = vsub.f32 %v4584_v29, %v5216_v59 }
 0x416   : > { %3046 = vmatpush.msrb.mxu2 %v2934_v15  ;;  %v2966_v62 = vmul.f32 %v2902_v1, %v2644_v34  ;;  %v2448_v43 = vsub.f32 %v4582_v48, %v5217_v23  ;;  %v2578_v37 = vsub.f32 1.0, %v2514_v53  ;;  %v2480_v14 = vand.u32 2147483647, %v2416_v44 }
 0x417   : > { %v2836_v25 = vsub.f32 1.0, %v2772_v39  ;;  %v2706_v27 = vsub.f32 %v4584_v29, %v5218_v56  ;;  %v2868_v18 = vmax.f32 %v2804_v22, 0.0  ;;  %v2738_v60 = vand.u32 2147483647, %v2674_v58 }
 0x418   : > { %3066 = vmatpush.msrb.mxu3 %v2966_v62  ;;  %v2512_v33 = vand.u32 2147483647, %v2448_v43  ;;  %v2642_v47 = vmax.f32 %v2578_v37, 0.0  ;;  %v2544_v5 = vsub.f32 1.0, %v2480_v14 }
 0x419   : > { %v2900_v54 = vmax.f32 %v2836_v25, 0.0  ;;  %v2770_v8 = vand.u32 2147483647, %v2706_v27  ;;  %v2932_v63 = vmul.f32 %v2868_v18, %v2610_v26  ;;  %v2802_v35 = vsub.f32 1.0, %v2738_v60 }
 0x41a   : > { %v2576_v59 = vsub.f32 1.0, %v2512_v33  ;;  %v2608_v13 = vmax.f32 %v2544_v5, 0.0 }
 0x41b   : > { %v2964_v6 = vmul.f32 %v2900_v54, %v2642_v47  ;;  %v2834_v48 = vsub.f32 1.0, %v2770_v8  ;;  %3047 = vmatpush.msrb.mxu2 %v2932_v63  ;;  %v2866_v23 = vmax.f32 %v2802_v35, 0.0 }
 0x41c   : > { %v2640_v36 = vmax.f32 %v2576_v59, 0.0 }
 0x41d   : > { %3067 = vmatpush.msrb.mxu3 %v2964_v6  ;;  %v2898_v29 = vmax.f32 %v2834_v48, 0.0  ;;  %v2930_v56 = vmul.f32 %v2866_v23, %v2608_v13 }
 0x41f   : > { %v2962_v32 = vmul.f32 %v2898_v29, %v2640_v36  ;;  %3048 = vmatpush.msrb.mxu2 %v2930_v56 }
 0x420   : > { %3049 = vmatmul.f32.vlgmr.msrb.gmra.mxu2 %v5226_v28 }
 0x421   : > { %3068 = vmatpush.msrb.mxu3 %v2962_v32 }
 0x422   : > { %3069 = vmatmul.f32.vlgmr.msrb.gmra.mxu3 %v4572_v11 }
 0x46c   : > { %v3010_v2 = vpop.f32.mrf.mxu0 }
 0x46e   : > { %v3030_v46 = vpop.f32.mrf.mxu1 }
 0x46f   : > { %v3031_v7 = vadd.f32 %v3030_v46, %v3010_v2 }
 0x471   : > { %v3073_v21 = vadd.f32 %v3031_v7, %v5226_v28 }
 0x473   : > { %3075 = vst [vmem:[%s134_s17] sm:$0xff] %v3073_v21 }
 0x4a3   : > { %v3050_v52 = vpop.f32.mrf.mxu2 }
 0x4a5   : > { %v3070_v9 = vpop.f32.mrf.mxu3 }
 0x4a6   : > { %v3071_v57 = vadd.f32 %v3070_v9, %v3050_v52 }
 0x4a8   : > { %v3074_v4 = vadd.f32 %v3071_v57, %v4572_v11 }
 0x4aa   : > { %3076 = vst [vmem:[%s134_s17 + $0x8] sm:$0xff] %v3074_v4 }
 0x4ab   : > { %3283 = shalt.err (!%p3280_p4)
}
 0x4ac   : > { %3182 = dma.vmem_to_hbm [thread:$0]  (%p3384_p11), %s3092_s27, 256, %s3094_s28, %s3078_s29  }
 0x4ad PF: > { %s3105_s13 = sand.u32 1, %s3310_s6   ;;  %p5231_p7 = scmp.ge.s32.totalorder %s3322_s9, 2 }
 0x4ae   : > { %s3106_s14 = scalar_lea.sflag [#allocation4], %s3105_s13 }
 0x4af   : > { %p3189_p5 = pnand %p5231_p7, %p3388_p12 }
 0x4b1   : > { %p3190_p8 = pneg %p3189_p5 }
 0x4b3   : > { %3305 = dma.done.wait (%p3190_p8), %s3106_s14, 256  }
 0x4b4   : > { %3307 = vsyncadd (%p3190_p8), %s3106_s14, 4294967040  ;;  %p14_p10 = scmp.ge.s32.totalorder %s3359_s12, 4   ;;  %s5232_s6 = smov %s3314_s7 }
 0x4b5   : > { %s5233_s7 = smov %s3318_s8  ;;  %s5234_s8 = smov %s3371_s15 }
 0x4b6   : > { %s5235_s9 = smov %s3359_s12  ;;  %16 = sbr.rel (!%p14_p10) target bundleno = 5 (0x5), region = 69 }
 0x4bb   :  { %3112 = vsyncpa [#allocation3], 1 }
 0x4bc   :  { %3114 = vsyncpa [#allocation3 + $0x1], 1 }
 0x4bd   :  { %3115 = vsyncpa [#allocation4], 1 }
 0x4be   :  { %3117 = vsyncpa [#allocation4 + $0x1], 1 }

</bundles_post_ra>
